<compile_context>
chip_gen: v7x
topology: tpu7x:2x2x1
jax: 0.10.0
libtpu: 0.0.40
codegen_flags: <defaults>
</compile_context>

<pallas_src>
import functools

import jax
import jax.numpy as jnp
from jax.experimental import pallas as pl
from jax.experimental.pallas import tpu as pltpu


# ---------------- small config (scaled-down, structure-preserving) ----------
class Config:
    embedding_dim = 128     # stands in for 256
    hidden_dim = 128        # stands in for 1024
    image_size = 16         # stands in for 64
    max_seq_length = 9      # decoder consumes captions[:, :-1]
    feat_channels = 256     # stands in for ResNet50's 2048
    vocab_size = 256


# ---------------- Encoder kernel: stem conv + ReLU + avgpool + projection ----
def _encoder_kernel(xph_ref, sw_ref, sb_ref, pw_ref, pb_ref, o_ref, *, OH, OW, C):
    """One image: 3x3/stride-2 conv stem + ReLU + global avg pool + projection."""
    xph = xph_ref[...]                         # (4, 1, OH+1, OW+1, C) f32 phases
    sw = sw_ref[...]                           # (9*C, FC) bf16 stem weights
    FC = sw.shape[1]
    M = OH * OW

    # Build each conv tap in VMEM from contiguous static slices of the stride-2
    # phases (no strided access, no im2col in HBM) and accumulate 9 small
    # bf16 matmuls into an f32 feature map that never leaves VMEM.
    feat = jnp.zeros((M, FC), jnp.float32)
    for ky in range(3):
        for kx in range(3):
            p = 2 * (ky % 2) + (kx % 2)        # which stride-2 phase holds this tap
            r0, c0 = ky // 2, kx // 2
            tap = xph[p, 0, r0:r0 + OH, c0:c0 + OW, :].reshape(M, C)
            w_t = sw[(ky * 3 + kx) * C:(ky * 3 + kx + 1) * C, :]
            feat = feat + jnp.dot(tap.astype(jnp.bfloat16), w_t,
                                  preferred_element_type=jnp.float32)

    feat = jnp.maximum(feat + sb_ref[...], 0.0)                   # bias + ReLU
    pooled = jnp.sum(feat, axis=0, keepdims=True) * (1.0 / M)     # AdaptiveAvgPool2d((1,1))
    proj = (jnp.dot(pooled.astype(jnp.bfloat16), pw_ref[...],
                    preferred_element_type=jnp.float32) + pb_ref[...])
    o_ref[...] = proj.reshape(o_ref.shape).astype(o_ref.dtype)


def pallas_encoder(xph, stem_w_flat, stem_b, proj_w, proj_b, *, OH, OW):
    """xph: (4, B, OH+1, OW+1, C) f32 stride-2 phases -> features (B, E) f32."""
    P, B, Hh, Wh, C = xph.shape
    assert P == 4 and Hh >= OH + 1 and Wh >= OW + 1
    K2C, FC = stem_w_flat.shape
    E = proj_w.shape[1]
    kernel = functools.partial(_encoder_kernel, OH=OH, OW=OW, C=C)
    out = pl.pallas_call(
        kernel,
        out_shape=jax.ShapeDtypeStruct((B, 1, E), jnp.float32),
        grid_spec=pltpu.PrefetchScalarGridSpec(
            num_scalar_prefetch=0,
            grid=(B,),                                   # batch axis -> v7x parallelism
            in_specs=[
                pl.BlockSpec((P, 1, Hh, Wh, C), lambda b: (0, b, 0, 0, 0)),
                pl.BlockSpec((K2C, FC), lambda b: (0, 0)),
                pl.BlockSpec((1, FC), lambda b: (0, 0)),
                pl.BlockSpec((FC, E), lambda b: (0, 0)),
                pl.BlockSpec((1, E), lambda b: (0, 0)),
            ],
            out_specs=pl.BlockSpec((1, 1, E), lambda b: (b, 0, 0)),
        ),
        compiler_params=pltpu.CompilerParams(
            dimension_semantics=("parallel",),
            vmem_limit_bytes=32 * 1024 * 1024,
        ),
    )(xph, stem_w_flat, stem_b.reshape(1, FC), proj_w, proj_b.reshape(1, E))
    return out.reshape(B, E)


# ---------------- Decoder kernel: hoisted-gate LSTM + vocab-tiled fc ----------
def _decoder_kernel(x_ref, wih_ref, whh_ref, b_ref, fcw_ref, fcb_ref, o_ref,
                    gx_ref, hs_ref, *, T, B, H):
    v = pl.program_id(0)

    @pl.when(v == 0)
    def _():
        # Hoisted input projection: one bf16 MXU matmul covers all T steps,
        # spilled to VMEM so the unrolled recurrence only keeps (B,4H) live.
        gx_ref[...] = (jnp.dot(x_ref[...], wih_ref[...],
                               preferred_element_type=jnp.float32) + b_ref[...])
        whh = whh_ref[...]                               # (H, 4H) bf16, resident
        # TODO(synk): on v5e/v6e, pltpu.matmul_push_rhs could keep whh in the MXU
        # weight registers across the T steps instead of re-pushing it per dot.
        h_bf = jnp.zeros((B, H), jnp.bfloat16)
        c = jnp.zeros((B, H), jnp.float32)
        hs = []
        # TODO(synk): switch to lax.fori_loop with a small unroll if T grows >~16.
        for t in range(T):                               # small T: full static unroll
            gates = gx_ref[t * B:(t + 1) * B, :] + jnp.dot(
                h_bf, whh, preferred_element_type=jnp.float32)   # order i, f, g, o
            i = jax.nn.sigmoid(gates[:, 0 * H:1 * H])
            f = jax.nn.sigmoid(gates[:, 1 * H:2 * H])
            g = jnp.tanh(gates[:, 2 * H:3 * H])
            o = jax.nn.sigmoid(gates[:, 3 * H:4 * H])
            c = f * c + i * g
            h = o * jnp.tanh(c)
            h_bf = h.astype(jnp.bfloat16)
            hs.append(h)
        # One dense (T*B, H) store — no per-step masked (B, H) sub-tile stores.
        hs_ref[...] = jnp.concatenate(hs, axis=0).astype(jnp.bfloat16)

    # fc epilogue, vocab-tiled: (T*B, H) bf16 @ (H, tv) bf16 -> lane-dense store.
    # TODO(synk): at real vocab sizes this tile axis could be a separate
    # pallas_call marked "parallel" to use the v7x second TensorCore.
    o_ref[...] = (jnp.dot(hs_ref[...], fcw_ref[...],
                          preferred_element_type=jnp.float32)
                  + fcb_ref[...]).astype(o_ref.dtype)


def pallas_decoder(x_tb, w_ih_t, w_hh_t, b, fc_w, fc_b, *, T, B, vocab_tile=128):
    """x_tb: (T*B, E) bf16, time-major rows (embeddings + broadcast features).

    Returns logits (T*B, V) f32, rows ordered (t, b).  Single-layer LSTM with
    zero initial state, PyTorch gate semantics (b = b_ih + b_hh), fc fused in.
    """
    E = x_tb.shape[1]
    H = w_hh_t.shape[0]
    V = fc_w.shape[1]
    tv = min(vocab_tile, V)
    assert V % tv == 0, "vocab tile must divide vocab size"
    nV = V // tv
    kernel = functools.partial(_decoder_kernel, T=T, B=B, H=H)
    return pl.pallas_call(
        kernel,
        out_shape=jax.ShapeDtypeStruct((T * B, V), jnp.float32),
        grid_spec=pltpu.PrefetchScalarGridSpec(
            num_scalar_prefetch=0,
            grid=(nV,),
            in_specs=[
                pl.BlockSpec((T * B, E), lambda v: (0, 0)),
                pl.BlockSpec((E, 4 * H), lambda v: (0, 0)),
                pl.BlockSpec((H, 4 * H), lambda v: (0, 0)),
                pl.BlockSpec((1, 4 * H), lambda v: (0, 0)),
                pl.BlockSpec((H, tv), lambda v: (0, v)),    # fc_w streams per tile
                pl.BlockSpec((1, tv), lambda v: (0, v)),
            ],
            out_specs=pl.BlockSpec((T * B, tv), lambda v: (0, v)),
            scratch_shapes=[
                pltpu.VMEM((T * B, 4 * H), jnp.float32),    # hoisted gates_x
                pltpu.VMEM((T * B, H), jnp.bfloat16),       # hidden states for the fc
            ],
        ),
        compiler_params=pltpu.CompilerParams(
            # vocab tiles depend on the recurrence scratch written at v == 0,
            # so this axis must stay sequential.
            dimension_semantics=("arbitrary",),
            vmem_limit_bytes=32 * 1024 * 1024,
        ),
    )(x_tb, w_ih_t, w_hh_t, b.reshape(1, 4 * H), fc_w, fc_b.reshape(1, V))


# ---------------- JAX glue: pad + stride-2 phase split (no im2col) -----------
def phase_decompose(images_nchw, *, k=3, stride=2, pad=1):
    """(B,C,H,W) -> (4, B, Hp//2, Wp//2, C) stride-2 phases of the padded image.

    Same byte count as the (padded) image: the 9 conv taps are reconstructed
    inside the kernel from contiguous slices of these phases, so there is no
    im2col amplification in HBM.  Only the tiny input image is transposed here.
    """
    B, C, H, W = images_nchw.shape
    x = jnp.transpose(images_nchw, (0, 2, 3, 1))                 # (B, H, W, C)
    xp = jnp.pad(x, ((0, 0), (pad, pad), (pad, pad), (0, 0)))
    Hp, Wp = H + 2 * pad, W + 2 * pad
    assert Hp % 2 == 0 and Wp % 2 == 0
    OH = (Hp - k) // stride + 1
    OW = (Wp - k) // stride + 1
    xph = xp.reshape(B, Hp // 2, 2, Wp // 2, 2, C)
    xph = jnp.transpose(xph, (2, 4, 0, 1, 3, 5)).reshape(4, B, Hp // 2, Wp // 2, C)
    return xph, OH, OW


# ---------------- the model ---------------------------------------------------
def init_params(key, vocab_size):
    ks = jax.random.split(key, 10)
    E, H, FC = Config.embedding_dim, Config.hidden_dim, Config.feat_channels
    s = 0.02
    return {
        # Encoder: conv stem (stand-in backbone) + projection
        "stem_w": jax.random.normal(ks[0], (FC, 3, 3, 3), jnp.float32) * s,   # OIHW
        "stem_b": jax.random.normal(ks[1], (FC,), jnp.float32) * s,
        "proj_w": jax.random.normal(ks[2], (FC, E), jnp.float32) * s,         # (in, out)
        "proj_b": jax.random.normal(ks[3], (E,), jnp.float32) * s,
        # Decoder
        "embed": jax.random.normal(ks[4], (vocab_size, E), jnp.float32) * s,
        "w_ih_t": jax.random.normal(ks[5], (E, 4 * H), jnp.float32) * s,      # (E, 4H)
        "w_hh_t": jax.random.normal(ks[6], (H, 4 * H), jnp.float32) * s,      # (H, 4H)
        "b_lstm": jax.random.normal(ks[7], (4 * H,), jnp.float32) * s,        # b_ih + b_hh
        "fc_w": jax.random.normal(ks[8], (H, vocab_size), jnp.float32) * s,
        "fc_b": jax.random.normal(ks[9], (vocab_size,), jnp.float32) * s,
    }


def image_caption_forward(params, images, captions):
    """images: (B, 3, S, S) f32 NCHW; captions: (B, L) int32.

    Returns logits (B, L-1, vocab) f32.  Matches the PyTorch forward: features
    are broadcast-added to the embeddings at every time step (embeddings +
    features.unsqueeze(1).expand(...)), then LSTM, then fc.
    """
    B = images.shape[0]
    E, FC, V = Config.embedding_dim, Config.feat_channels, Config.vocab_size

    # ---- Encoder (fused stem + pool + projection; no im2col in HBM) ----
    xph, OH, OW = phase_decompose(images, k=3, stride=2, pad=1)
    # OIHW -> (ky, kx, Cin, Cout) flat, matching the in-kernel tap ordering.
    stem_w_flat = params["stem_w"].transpose(2, 3, 1, 0).reshape(-1, FC)
    features = pallas_encoder(xph,
                              stem_w_flat.astype(jnp.bfloat16),
                              params["stem_b"],
                              params["proj_w"].astype(jnp.bfloat16),
                              params["proj_b"],
                              OH=OH, OW=OW)                     # (B, E) f32

    # ---- Decoder (hoisted gates + unrolled LSTM + vocab-tiled fc) ----
    tok = captions[:, :-1]                                      # (B, T)
    T = tok.shape[1]
    # TODO(synk): embedding gather stays in XLA (jnp.take); a Pallas DMA gather
    # only pays off at much larger vocab/batch.
    emb = jnp.take(params["embed"], tok, axis=0)                # (B, T, E)
    x = emb + features[:, None, :]                              # broadcast add, once
    x_tb = jnp.transpose(x, (1, 0, 2)).reshape(T * B, E).astype(jnp.bfloat16)
    logits = pallas_decoder(x_tb,
                            params["w_ih_t"].astype(jnp.bfloat16),
                            params["w_hh_t"].astype(jnp.bfloat16),
                            params["b_lstm"],
                            params["fc_w"].astype(jnp.bfloat16),
                            params["fc_b"],
                            T=T, B=B)                           # (T*B, V), (t, b) rows
    return jnp.transpose(logits.reshape(T, B, V), (1, 0, 2))


# ---------------- demo ---------------------------------------------------------
if __name__ == "__main__":
    key = jax.random.PRNGKey(0)
    k_img, k_cap, k_par = jax.random.split(key, 3)

    B = 2
    images = jax.random.normal(k_img, (B, 3, Config.image_size, Config.image_size),
                               jnp.float32)
    captions = jax.random.randint(k_cap, (B, Config.max_seq_length), 0,
                                  Config.vocab_size, jnp.int32)
    params = init_params(k_par, Config.vocab_size)

    out = jax.jit(image_caption_forward)(params, images, captions)
    out = jax.block_until_ready(out)
    assert out.shape == (B, Config.max_seq_length - 1, Config.vocab_size), out.shape
    assert bool(jnp.all(jnp.isfinite(out)))
    print("KERNEL_OK")
</pallas_src>

<mosaic_0001>
module attributes {stable_mosaic.version = 11 : i64} {
  func.func @_encoder_kernel(%arg0: i32, %arg1: memref<4x1x9x9x3xf32, #tpu.memory_space<vmem>>, %arg2: memref<27x256xbf16, #tpu.memory_space<vmem>>, %arg3: memref<1x256xf32, #tpu.memory_space<vmem>>, %arg4: memref<256x128xbf16, #tpu.memory_space<vmem>>, %arg5: memref<1x128xf32, #tpu.memory_space<vmem>>, %arg6: memref<1x1x128xf32, #tpu.memory_space<vmem>>) attributes {dimension_semantics = [#tpu.dimension_semantics<parallel>], iteration_bounds = array<i64: 2>, scalar_prefetch = 0 : i64, scratch_operands = 0 : i64, tpu.core_type = #tpu.core_type<tc>, window_params = [{transform_indices = @transform_0, window_bounds = array<i64: 4, 1, 9, 9, 3>}, {pipeline_mode = #tpu.pipeline_mode<synchronous>, transform_indices = @transform_1, window_bounds = array<i64: 27, 256>}, {pipeline_mode = #tpu.pipeline_mode<synchronous>, transform_indices = @transform_2, window_bounds = array<i64: 1, 256>}, {pipeline_mode = #tpu.pipeline_mode<synchronous>, transform_indices = @transform_3, window_bounds = array<i64: 256, 128>}, {pipeline_mode = #tpu.pipeline_mode<synchronous>, transform_indices = @transform_4, window_bounds = array<i64: 1, 128>}, {transform_indices = @transform_5, window_bounds = array<i64: 1, 1, 128>}]} {
    %c0 = arith.constant 0 : index
    %c0_0 = arith.constant 0 : index
    %c0_1 = arith.constant 0 : index
    %c0_2 = arith.constant 0 : index
    %c0_3 = arith.constant 0 : index
    %0 = vector.load %arg1[%c0, %c0_0, %c0_1, %c0_2, %c0_3] : memref<4x1x9x9x3xf32, #tpu.memory_space<vmem>>, vector<4x1x9x9x3xf32>
    %c0_4 = arith.constant 0 : index
    %c0_5 = arith.constant 0 : index
    %1 = vector.load %arg2[%c0_4, %c0_5] : memref<27x256xbf16, #tpu.memory_space<vmem>>, vector<27x256xbf16>
    %cst = arith.constant 0.000000e+00 : f32
    %2 = vector.broadcast %cst : f32 to vector<64x256xf32>
    %3 = vector.extract_strided_slice %0 {offsets = [0, 0, 0, 0, 0], sizes = [1, 1, 8, 8, 3], strides = [1, 1, 1, 1, 1]} : vector<4x1x9x9x3xf32> to vector<1x1x8x8x3xf32>
    %4 = vector.shape_cast %3 : vector<1x1x8x8x3xf32> to vector<8x8x3xf32>
    %5 = vector.shape_cast %4 : vector<8x8x3xf32> to vector<64x3xf32>
    %6 = vector.extract_strided_slice %1 {offsets = [0, 0], sizes = [3, 256], strides = [1, 1]} : vector<27x256xbf16> to vector<3x256xbf16>
    %7 = arith.truncf %5 : vector<64x3xf32> to vector<64x3xbf16>
    %cst_6 = arith.constant dense<0.000000e+00> : vector<64x256xf32>
    %8 = tpu.matmul %7, %6, %cst_6 {dimension_numbers = #tpu.dot_dimension_numbers<[1], [0], [0], [1], [0, 0, 1, 1], [], []>} : vector<64x3xbf16>, vector<3x256xbf16>, vector<64x256xf32> -> vector<64x256xf32>
    %9 = arith.addf %2, %8 : vector<64x256xf32>
    %10 = vector.extract_strided_slice %0 {offsets = [1, 0, 0, 0, 0], sizes = [1, 1, 8, 8, 3], strides = [1, 1, 1, 1, 1]} : vector<4x1x9x9x3xf32> to vector<1x1x8x8x3xf32>
    %11 = vector.shape_cast %10 : vector<1x1x8x8x3xf32> to vector<8x8x3xf32>
    %12 = vector.shape_cast %11 : vector<8x8x3xf32> to vector<64x3xf32>
    %13 = vector.extract_strided_slice %1 {offsets = [3, 0], sizes = [3, 256], strides = [1, 1]} : vector<27x256xbf16> to vector<3x256xbf16>
    %14 = arith.truncf %12 : vector<64x3xf32> to vector<64x3xbf16>
    %cst_7 = arith.constant dense<0.000000e+00> : vector<64x256xf32>
    %15 = tpu.matmul %14, %13, %cst_7 {dimension_numbers = #tpu.dot_dimension_numbers<[1], [0], [0], [1], [0, 0, 1, 1], [], []>} : vector<64x3xbf16>, vector<3x256xbf16>, vector<64x256xf32> -> vector<64x256xf32>
    %16 = arith.addf %9, %15 : vector<64x256xf32>
    %17 = vector.extract_strided_slice %0 {offsets = [0, 0, 0, 1, 0], sizes = [1, 1, 8, 8, 3], strides = [1, 1, 1, 1, 1]} : vector<4x1x9x9x3xf32> to vector<1x1x8x8x3xf32>
    %18 = vector.shape_cast %17 : vector<1x1x8x8x3xf32> to vector<8x8x3xf32>
    %19 = vector.shape_cast %18 : vector<8x8x3xf32> to vector<64x3xf32>
    %20 = vector.extract_strided_slice %1 {offsets = [6, 0], sizes = [3, 256], strides = [1, 1]} : vector<27x256xbf16> to vector<3x256xbf16>
    %21 = arith.truncf %19 : vector<64x3xf32> to vector<64x3xbf16>
    %cst_8 = arith.constant dense<0.000000e+00> : vector<64x256xf32>
    %22 = tpu.matmul %21, %20, %cst_8 {dimension_numbers = #tpu.dot_dimension_numbers<[1], [0], [0], [1], [0, 0, 1, 1], [], []>} : vector<64x3xbf16>, vector<3x256xbf16>, vector<64x256xf32> -> vector<64x256xf32>
    %23 = arith.addf %16, %22 : vector<64x256xf32>
    %24 = vector.extract_strided_slice %0 {offsets = [2, 0, 0, 0, 0], sizes = [1, 1, 8, 8, 3], strides = [1, 1, 1, 1, 1]} : vector<4x1x9x9x3xf32> to vector<1x1x8x8x3xf32>
    %25 = vector.shape_cast %24 : vector<1x1x8x8x3xf32> to vector<8x8x3xf32>
    %26 = vector.shape_cast %25 : vector<8x8x3xf32> to vector<64x3xf32>
    %27 = vector.extract_strided_slice %1 {offsets = [9, 0], sizes = [3, 256], strides = [1, 1]} : vector<27x256xbf16> to vector<3x256xbf16>
    %28 = arith.truncf %26 : vector<64x3xf32> to vector<64x3xbf16>
    %cst_9 = arith.constant dense<0.000000e+00> : vector<64x256xf32>
    %29 = tpu.matmul %28, %27, %cst_9 {dimension_numbers = #tpu.dot_dimension_numbers<[1], [0], [0], [1], [0, 0, 1, 1], [], []>} : vector<64x3xbf16>, vector<3x256xbf16>, vector<64x256xf32> -> vector<64x256xf32>
    %30 = arith.addf %23, %29 : vector<64x256xf32>
    %31 = vector.extract_strided_slice %0 {offsets = [3, 0, 0, 0, 0], sizes = [1, 1, 8, 8, 3], strides = [1, 1, 1, 1, 1]} : vector<4x1x9x9x3xf32> to vector<1x1x8x8x3xf32>
    %32 = vector.shape_cast %31 : vector<1x1x8x8x3xf32> to vector<8x8x3xf32>
    %33 = vector.shape_cast %32 : vector<8x8x3xf32> to vector<64x3xf32>
    %34 = vector.extract_strided_slice %1 {offsets = [12, 0], sizes = [3, 256], strides = [1, 1]} : vector<27x256xbf16> to vector<3x256xbf16>
    %35 = arith.truncf %33 : vector<64x3xf32> to vector<64x3xbf16>
    %cst_10 = arith.constant dense<0.000000e+00> : vector<64x256xf32>
    %36 = tpu.matmul %35, %34, %cst_10 {dimension_numbers = #tpu.dot_dimension_numbers<[1], [0], [0], [1], [0, 0, 1, 1], [], []>} : vector<64x3xbf16>, vector<3x256xbf16>, vector<64x256xf32> -> vector<64x256xf32>
    %37 = arith.addf %30, %36 : vector<64x256xf32>
    %38 = vector.extract_strided_slice %0 {offsets = [2, 0, 0, 1, 0], sizes = [1, 1, 8, 8, 3], strides = [1, 1, 1, 1, 1]} : vector<4x1x9x9x3xf32> to vector<1x1x8x8x3xf32>
    %39 = vector.shape_cast %38 : vector<1x1x8x8x3xf32> to vector<8x8x3xf32>
    %40 = vector.shape_cast %39 : vector<8x8x3xf32> to vector<64x3xf32>
    %41 = vector.extract_strided_slice %1 {offsets = [15, 0], sizes = [3, 256], strides = [1, 1]} : vector<27x256xbf16> to vector<3x256xbf16>
    %42 = arith.truncf %40 : vector<64x3xf32> to vector<64x3xbf16>
    %cst_11 = arith.constant dense<0.000000e+00> : vector<64x256xf32>
    %43 = tpu.matmul %42, %41, %cst_11 {dimension_numbers = #tpu.dot_dimension_numbers<[1], [0], [0], [1], [0, 0, 1, 1], [], []>} : vector<64x3xbf16>, vector<3x256xbf16>, vector<64x256xf32> -> vector<64x256xf32>
    %44 = arith.addf %37, %43 : vector<64x256xf32>
    %45 = vector.extract_strided_slice %0 {offsets = [0, 0, 1, 0, 0], sizes = [1, 1, 8, 8, 3], strides = [1, 1, 1, 1, 1]} : vector<4x1x9x9x3xf32> to vector<1x1x8x8x3xf32>
    %46 = vector.shape_cast %45 : vector<1x1x8x8x3xf32> to vector<8x8x3xf32>
    %47 = vector.shape_cast %46 : vector<8x8x3xf32> to vector<64x3xf32>
    %48 = vector.extract_strided_slice %1 {offsets = [18, 0], sizes = [3, 256], strides = [1, 1]} : vector<27x256xbf16> to vector<3x256xbf16>
    %49 = arith.truncf %47 : vector<64x3xf32> to vector<64x3xbf16>
    %cst_12 = arith.constant dense<0.000000e+00> : vector<64x256xf32>
    %50 = tpu.matmul %49, %48, %cst_12 {dimension_numbers = #tpu.dot_dimension_numbers<[1], [0], [0], [1], [0, 0, 1, 1], [], []>} : vector<64x3xbf16>, vector<3x256xbf16>, vector<64x256xf32> -> vector<64x256xf32>
    %51 = arith.addf %44, %50 : vector<64x256xf32>
    %52 = vector.extract_strided_slice %0 {offsets = [1, 0, 1, 0, 0], sizes = [1, 1, 8, 8, 3], strides = [1, 1, 1, 1, 1]} : vector<4x1x9x9x3xf32> to vector<1x1x8x8x3xf32>
    %53 = vector.shape_cast %52 : vector<1x1x8x8x3xf32> to vector<8x8x3xf32>
    %54 = vector.shape_cast %53 : vector<8x8x3xf32> to vector<64x3xf32>
    %55 = vector.extract_strided_slice %1 {offsets = [21, 0], sizes = [3, 256], strides = [1, 1]} : vector<27x256xbf16> to vector<3x256xbf16>
    %56 = arith.truncf %54 : vector<64x3xf32> to vector<64x3xbf16>
    %cst_13 = arith.constant dense<0.000000e+00> : vector<64x256xf32>
    %57 = tpu.matmul %56, %55, %cst_13 {dimension_numbers = #tpu.dot_dimension_numbers<[1], [0], [0], [1], [0, 0, 1, 1], [], []>} : vector<64x3xbf16>, vector<3x256xbf16>, vector<64x256xf32> -> vector<64x256xf32>
    %58 = arith.addf %51, %57 : vector<64x256xf32>
    %59 = vector.extract_strided_slice %0 {offsets = [0, 0, 1, 1, 0], sizes = [1, 1, 8, 8, 3], strides = [1, 1, 1, 1, 1]} : vector<4x1x9x9x3xf32> to vector<1x1x8x8x3xf32>
    %60 = vector.shape_cast %59 : vector<1x1x8x8x3xf32> to vector<8x8x3xf32>
    %61 = vector.shape_cast %60 : vector<8x8x3xf32> to vector<64x3xf32>
    %62 = vector.extract_strided_slice %1 {offsets = [24, 0], sizes = [3, 256], strides = [1, 1]} : vector<27x256xbf16> to vector<3x256xbf16>
    %63 = arith.truncf %61 : vector<64x3xf32> to vector<64x3xbf16>
    %cst_14 = arith.constant dense<0.000000e+00> : vector<64x256xf32>
    %64 = tpu.matmul %63, %62, %cst_14 {dimension_numbers = #tpu.dot_dimension_numbers<[1], [0], [0], [1], [0, 0, 1, 1], [], []>} : vector<64x3xbf16>, vector<3x256xbf16>, vector<64x256xf32> -> vector<64x256xf32>
    %65 = arith.addf %58, %64 : vector<64x256xf32>
    %c0_15 = arith.constant 0 : index
    %c0_16 = arith.constant 0 : index
    %66 = vector.load %arg3[%c0_15, %c0_16] : memref<1x256xf32, #tpu.memory_space<vmem>>, vector<1x256xf32>
    %67 = vector.broadcast %66 : vector<1x256xf32> to vector<64x256xf32>
    %68 = arith.addf %65, %67 : vector<64x256xf32>
    %cst_17 = arith.constant 0.000000e+00 : f32
    %69 = vector.broadcast %cst_17 : f32 to vector<64x256xf32>
    %70 = arith.maximumf %68, %69 : vector<64x256xf32>
    %cst_18 = arith.constant dense<0.000000e+00> : vector<256xf32>
    %71 = vector.multi_reduction <add>, %70, %cst_18 [0] : vector<64x256xf32> to vector<256xf32>
    %72 = vector.shape_cast %71 : vector<256xf32> to vector<1x256xf32>
    %cst_19 = arith.constant 1.562500e-02 : f32
    %73 = vector.broadcast %cst_19 : f32 to vector<1x256xf32>
    %74 = arith.mulf %72, %73 : vector<1x256xf32>
    %75 = arith.truncf %74 : vector<1x256xf32> to vector<1x256xbf16>
    %c0_20 = arith.constant 0 : index
    %c0_21 = arith.constant 0 : index
    %76 = vector.load %arg4[%c0_20, %c0_21] : memref<256x128xbf16, #tpu.memory_space<vmem>>, vector<256x128xbf16>
    %cst_22 = arith.constant dense<0.000000e+00> : vector<1x128xf32>
    %77 = tpu.matmul %75, %76, %cst_22 {dimension_numbers = #tpu.dot_dimension_numbers<[1], [0], [0], [1], [0, 0, 1, 1], [], []>} : vector<1x256xbf16>, vector<256x128xbf16>, vector<1x128xf32> -> vector<1x128xf32>
    %c0_23 = arith.constant 0 : index
    %c0_24 = arith.constant 0 : index
    %78 = vector.load %arg5[%c0_23, %c0_24] : memref<1x128xf32, #tpu.memory_space<vmem>>, vector<1x128xf32>
    %79 = arith.addf %77, %78 : vector<1x128xf32>
    %80 = vector.shape_cast %79 : vector<1x128xf32> to vector<1x1x128xf32>
    %c0_25 = arith.constant 0 : index
    %c0_26 = arith.constant 0 : index
    %c0_27 = arith.constant 0 : index
    %81 = vector.load %arg6[%c0_25, %c0_26, %c0_27] : memref<1x1x128xf32, #tpu.memory_space<vmem>>, vector<1x1x128xf32>
    tpu.vector_store %arg6[%c0_25, %c0_26, %c0_27], %80 {strides = array<i32>} : memref<1x1x128xf32, #tpu.memory_space<vmem>>, vector<1x1x128xf32>,
    return
  }
  func.func @transform_0(%arg0: i32) -> (i32, i32, i32, i32, i32) {
    %c0_i32 = arith.constant 0 : i32
    %c0_i32_0 = arith.constant 0 : i32
    %c0_i32_1 = arith.constant 0 : i32
    %c0_i32_2 = arith.constant 0 : i32
    %c0_i32_3 = arith.constant 0 : i32
    return %c0_i32, %arg0, %c0_i32_0, %c0_i32_1, %c0_i32_2 : i32, i32, i32, i32, i32
  }
  func.func @transform_1(%arg0: i32) -> (i32, i32) {
    %c0_i32 = arith.constant 0 : i32
    %c0_i32_0 = arith.constant 0 : i32
    %c0_i32_1 = arith.constant 0 : i32
    return %c0_i32, %c0_i32_0 : i32, i32
  }
  func.func @transform_2(%arg0: i32) -> (i32, i32) {
    %c0_i32 = arith.constant 0 : i32
    %c0_i32_0 = arith.constant 0 : i32
    %c0_i32_1 = arith.constant 0 : i32
    return %c0_i32, %c0_i32_0 : i32, i32
  }
  func.func @transform_3(%arg0: i32) -> (i32, i32) {
    %c0_i32 = arith.constant 0 : i32
    %c0_i32_0 = arith.constant 0 : i32
    %c0_i32_1 = arith.constant 0 : i32
    return %c0_i32, %c0_i32_0 : i32, i32
  }
  func.func @transform_4(%arg0: i32) -> (i32, i32) {
    %c0_i32 = arith.constant 0 : i32
    %c0_i32_0 = arith.constant 0 : i32
    %c0_i32_1 = arith.constant 0 : i32
    return %c0_i32, %c0_i32_0 : i32, i32
  }
  func.func @transform_5(%arg0: i32) -> (i32, i32, i32) {
    %c0_i32 = arith.constant 0 : i32
    %c0_i32_0 = arith.constant 0 : i32
    %c0_i32_1 = arith.constant 0 : i32
    return %arg0, %c0_i32, %c0_i32_0 : i32, i32, i32
  }
}

module attributes {stable_mosaic.version = 11 : i64} {
  func.func @_decoder_kernel(%arg0: i32, %arg1: memref<16x128xbf16, #tpu.memory_space<vmem>>, %arg2: memref<128x512xbf16, #tpu.memory_space<vmem>>, %arg3: memref<128x512xbf16, #tpu.memory_space<vmem>>, %arg4: memref<1x512xf32, #tpu.memory_space<vmem>>, %arg5: memref<128x128xbf16, #tpu.memory_space<vmem>>, %arg6: memref<1x128xf32, #tpu.memory_space<vmem>>, %arg7: memref<16x128xf32, #tpu.memory_space<vmem>>, %arg8: memref<16x512xf32, #tpu.memory_space<vmem>>, %arg9: memref<16x128xbf16, #tpu.memory_space<vmem>>) attributes {dimension_semantics = [#tpu.dimension_semantics<arbitrary>], iteration_bounds = array<i64: 2>, scalar_prefetch = 0 : i64, scratch_operands = 2 : i64, tpu.core_type = #tpu.core_type<tc>, window_params = [{pipeline_mode = #tpu.pipeline_mode<synchronous>, transform_indices = @transform_0, window_bounds = array<i64: 16, 128>}, {pipeline_mode = #tpu.pipeline_mode<synchronous>, transform_indices = @transform_1, window_bounds = array<i64: 128, 512>}, {pipeline_mode = #tpu.pipeline_mode<synchronous>, transform_indices = @transform_2, window_bounds = array<i64: 128, 512>}, {pipeline_mode = #tpu.pipeline_mode<synchronous>, transform_indices = @transform_3, window_bounds = array<i64: 1, 512>}, {transform_indices = @transform_4, window_bounds = array<i64: 128, 128>}, {transform_indices = @transform_5, window_bounds = array<i64: 1, 128>}, {transform_indices = @transform_6, window_bounds = array<i64: 16, 128>}]} {
    %c0_i32 = arith.constant 0 : i32
    %0 = arith.cmpi eq, %arg0, %c0_i32 : i32
    %1 = arith.extui %0 : i1 to i32
    %c0_i32_0 = arith.constant 0 : i32
    %2 = arith.cmpi ne, %1, %c0_i32_0 : i32
    scf.if %2 {
      %c0_8 = arith.constant 0 : index
      %c0_9 = arith.constant 0 : index
      %10 = vector.load %arg1[%c0_8, %c0_9] : memref<16x128xbf16, #tpu.memory_space<vmem>>, vector<16x128xbf16>
      %c0_10 = arith.constant 0 : index
      %c0_11 = arith.constant 0 : index
      %11 = vector.load %arg2[%c0_10, %c0_11] : memref<128x512xbf16, #tpu.memory_space<vmem>>, vector<128x512xbf16>
      %cst_12 = arith.constant dense<0.000000e+00> : vector<16x512xf32>
      %12 = tpu.matmul %10, %11, %cst_12 {dimension_numbers = #tpu.dot_dimension_numbers<[1], [0], [0], [1], [0, 0, 1, 1], [], []>} : vector<16x128xbf16>, vector<128x512xbf16>, vector<16x512xf32> -> vector<16x512xf32>
      %c0_13 = arith.constant 0 : index
      %c0_14 = arith.constant 0 : index
      %13 = vector.load %arg4[%c0_13, %c0_14] : memref<1x512xf32, #tpu.memory_space<vmem>>, vector<1x512xf32>
      %14 = vector.broadcast %13 : vector<1x512xf32> to vector<16x512xf32>
      %15 = arith.addf %12, %14 : vector<16x512xf32>
      %c0_15 = arith.constant 0 : index
      %c0_16 = arith.constant 0 : index
      %16 = vector.load %arg8[%c0_15, %c0_16] : memref<16x512xf32, #tpu.memory_space<vmem>>, vector<16x512xf32>
      tpu.vector_store %arg8[%c0_15, %c0_16], %15 {strides = array<i32>} : memref<16x512xf32, #tpu.memory_space<vmem>>, vector<16x512xf32>,
      %c0_17 = arith.constant 0 : index
      %c0_18 = arith.constant 0 : index
      %17 = vector.load %arg3[%c0_17, %c0_18] : memref<128x512xbf16, #tpu.memory_space<vmem>>, vector<128x512xbf16>
      %cst_19 = arith.constant 0.000000e+00 : bf16
      %18 = vector.broadcast %cst_19 : bf16 to vector<2x128xbf16>
      %cst_20 = arith.constant 0.000000e+00 : f32
      %19 = vector.broadcast %cst_20 : f32 to vector<2x128xf32>
      %c0_21 = arith.constant 0 : index
      %c0_22 = arith.constant 0 : index
      %20 = vector.load %arg8[%c0_21, %c0_22] : memref<16x512xf32, #tpu.memory_space<vmem>>, vector<2x512xf32>
      %cst_23 = arith.constant dense<0.000000e+00> : vector<2x512xf32>
      %21 = tpu.matmul %18, %17, %cst_23 {dimension_numbers = #tpu.dot_dimension_numbers<[1], [0], [0], [1], [0, 0, 1, 1], [], []>} : vector<2x128xbf16>, vector<128x512xbf16>, vector<2x512xf32> -> vector<2x512xf32>
      %22 = arith.addf %20, %21 : vector<2x512xf32>
      %23 = vector.extract_strided_slice %22 {offsets = [0, 0], sizes = [2, 128], strides = [1, 1]} : vector<2x512xf32> to vector<2x128xf32>
      %24 = arith.negf %23 : vector<2x128xf32>
      %25 = math.exp %24 : vector<2x128xf32>
      %cst_24 = arith.constant 1.000000e+00 : f32
      %26 = vector.broadcast %cst_24 : f32 to vector<2x128xf32>
      %27 = arith.addf %26, %25 : vector<2x128xf32>
      %28 = arith.divf %26, %27 : vector<2x128xf32>
      %29 = vector.extract_strided_slice %22 {offsets = [0, 128], sizes = [2, 128], strides = [1, 1]} : vector<2x512xf32> to vector<2x128xf32>
      %30 = arith.negf %29 : vector<2x128xf32>
      %31 = math.exp %30 : vector<2x128xf32>
      %cst_25 = arith.constant 1.000000e+00 : f32
      %32 = vector.broadcast %cst_25 : f32 to vector<2x128xf32>
      %33 = arith.addf %32, %31 : vector<2x128xf32>
      %34 = arith.divf %32, %33 : vector<2x128xf32>
      %35 = vector.extract_strided_slice %22 {offsets = [0, 256], sizes = [2, 128], strides = [1, 1]} : vector<2x512xf32> to vector<2x128xf32>
      %36 = math.tanh %35 : vector<2x128xf32>
      %37 = vector.extract_strided_slice %22 {offsets = [0, 384], sizes = [2, 128], strides = [1, 1]} : vector<2x512xf32> to vector<2x128xf32>
      %38 = arith.negf %37 : vector<2x128xf32>
      %39 = math.exp %38 : vector<2x128xf32>
      %cst_26 = arith.constant 1.000000e+00 : f32
      %40 = vector.broadcast %cst_26 : f32 to vector<2x128xf32>
      %41 = arith.addf %40, %39 : vector<2x128xf32>
      %42 = arith.divf %40, %41 : vector<2x128xf32>
      %43 = arith.mulf %34, %19 : vector<2x128xf32>
      %44 = arith.mulf %28, %36 : vector<2x128xf32>
      %45 = arith.addf %43, %44 : vector<2x128xf32>
      %46 = math.tanh %45 : vector<2x128xf32>
      %47 = arith.mulf %42, %46 : vector<2x128xf32>
      %48 = arith.truncf %47 : vector<2x128xf32> to vector<2x128xbf16>
      %c2 = arith.constant 2 : index
      %c0_27 = arith.constant 0 : index
      %49 = vector.load %arg8[%c2, %c0_27] : memref<16x512xf32, #tpu.memory_space<vmem>>, vector<2x512xf32>
      %cst_28 = arith.constant dense<0.000000e+00> : vector<2x512xf32>
      %50 = tpu.matmul %48, %17, %cst_28 {dimension_numbers = #tpu.dot_dimension_numbers<[1], [0], [0], [1], [0, 0, 1, 1], [], []>} : vector<2x128xbf16>, vector<128x512xbf16>, vector<2x512xf32> -> vector<2x512xf32>
      %51 = arith.addf %49, %50 : vector<2x512xf32>
      %52 = vector.extract_strided_slice %51 {offsets = [0, 0], sizes = [2, 128], strides = [1, 1]} : vector<2x512xf32> to vector<2x128xf32>
      %53 = arith.negf %52 : vector<2x128xf32>
      %54 = math.exp %53 : vector<2x128xf32>
      %cst_29 = arith.constant 1.000000e+00 : f32
      %55 = vector.broadcast %cst_29 : f32 to vector<2x128xf32>
      %56 = arith.addf %55, %54 : vector<2x128xf32>
      %57 = arith.divf %55, %56 : vector<2x128xf32>
      %58 = vector.extract_strided_slice %51 {offsets = [0, 128], sizes = [2, 128], strides = [1, 1]} : vector<2x512xf32> to vector<2x128xf32>
      %59 = arith.negf %58 : vector<2x128xf32>
      %60 = math.exp %59 : vector<2x128xf32>
      %cst_30 = arith.constant 1.000000e+00 : f32
      %61 = vector.broadcast %cst_30 : f32 to vector<2x128xf32>
      %62 = arith.addf %61, %60 : vector<2x128xf32>
      %63 = arith.divf %61, %62 : vector<2x128xf32>
      %64 = vector.extract_strided_slice %51 {offsets = [0, 256], sizes = [2, 128], strides = [1, 1]} : vector<2x512xf32> to vector<2x128xf32>
      %65 = math.tanh %64 : vector<2x128xf32>
      %66 = vector.extract_strided_slice %51 {offsets = [0, 384], sizes = [2, 128], strides = [1, 1]} : vector<2x512xf32> to vector<2x128xf32>
      %67 = arith.negf %66 : vector<2x128xf32>
      %68 = math.exp %67 : vector<2x128xf32>
      %cst_31 = arith.constant 1.000000e+00 : f32
      %69 = vector.broadcast %cst_31 : f32 to vector<2x128xf32>
      %70 = arith.addf %69, %68 : vector<2x128xf32>
      %71 = arith.divf %69, %70 : vector<2x128xf32>
      %72 = arith.mulf %63, %45 : vector<2x128xf32>
      %73 = arith.mulf %57, %65 : vector<2x128xf32>
      %74 = arith.addf %72, %73 : vector<2x128xf32>
      %75 = math.tanh %74 : vector<2x128xf32>
      %76 = arith.mulf %71, %75 : vector<2x128xf32>
      %77 = arith.truncf %76 : vector<2x128xf32> to vector<2x128xbf16>
      %c4 = arith.constant 4 : index
      %c0_32 = arith.constant 0 : index
      %78 = vector.load %arg8[%c4, %c0_32] : memref<16x512xf32, #tpu.memory_space<vmem>>, vector<2x512xf32>
      %cst_33 = arith.constant dense<0.000000e+00> : vector<2x512xf32>
      %79 = tpu.matmul %77, %17, %cst_33 {dimension_numbers = #tpu.dot_dimension_numbers<[1], [0], [0], [1], [0, 0, 1, 1], [], []>} : vector<2x128xbf16>, vector<128x512xbf16>, vector<2x512xf32> -> vector<2x512xf32>
      %80 = arith.addf %78, %79 : vector<2x512xf32>
      %81 = vector.extract_strided_slice %80 {offsets = [0, 0], sizes = [2, 128], strides = [1, 1]} : vector<2x512xf32> to vector<2x128xf32>
      %82 = arith.negf %81 : vector<2x128xf32>
      %83 = math.exp %82 : vector<2x128xf32>
      %cst_34 = arith.constant 1.000000e+00 : f32
      %84 = vector.broadcast %cst_34 : f32 to vector<2x128xf32>
      %85 = arith.addf %84, %83 : vector<2x128xf32>
      %86 = arith.divf %84, %85 : vector<2x128xf32>
      %87 = vector.extract_strided_slice %80 {offsets = [0, 128], sizes = [2, 128], strides = [1, 1]} : vector<2x512xf32> to vector<2x128xf32>
      %88 = arith.negf %87 : vector<2x128xf32>
      %89 = math.exp %88 : vector<2x128xf32>
      %cst_35 = arith.constant 1.000000e+00 : f32
      %90 = vector.broadcast %cst_35 : f32 to vector<2x128xf32>
      %91 = arith.addf %90, %89 : vector<2x128xf32>
      %92 = arith.divf %90, %91 : vector<2x128xf32>
      %93 = vector.extract_strided_slice %80 {offsets = [0, 256], sizes = [2, 128], strides = [1, 1]} : vector<2x512xf32> to vector<2x128xf32>
      %94 = math.tanh %93 : vector<2x128xf32>
      %95 = vector.extract_strided_slice %80 {offsets = [0, 384], sizes = [2, 128], strides = [1, 1]} : vector<2x512xf32> to vector<2x128xf32>
      %96 = arith.negf %95 : vector<2x128xf32>
      %97 = math.exp %96 : vector<2x128xf32>
      %cst_36 = arith.constant 1.000000e+00 : f32
      %98 = vector.broadcast %cst_36 : f32 to vector<2x128xf32>
      %99 = arith.addf %98, %97 : vector<2x128xf32>
      %100 = arith.divf %98, %99 : vector<2x128xf32>
      %101 = arith.mulf %92, %74 : vector<2x128xf32>
      %102 = arith.mulf %86, %94 : vector<2x128xf32>
      %103 = arith.addf %101, %102 : vector<2x128xf32>
      %104 = math.tanh %103 : vector<2x128xf32>
      %105 = arith.mulf %100, %104 : vector<2x128xf32>
      %106 = arith.truncf %105 : vector<2x128xf32> to vector<2x128xbf16>
      %c6 = arith.constant 6 : index
      %c0_37 = arith.constant 0 : index
      %107 = vector.load %arg8[%c6, %c0_37] : memref<16x512xf32, #tpu.memory_space<vmem>>, vector<2x512xf32>
      %cst_38 = arith.constant dense<0.000000e+00> : vector<2x512xf32>
      %108 = tpu.matmul %106, %17, %cst_38 {dimension_numbers = #tpu.dot_dimension_numbers<[1], [0], [0], [1], [0, 0, 1, 1], [], []>} : vector<2x128xbf16>, vector<128x512xbf16>, vector<2x512xf32> -> vector<2x512xf32>
      %109 = arith.addf %107, %108 : vector<2x512xf32>
      %110 = vector.extract_strided_slice %109 {offsets = [0, 0], sizes = [2, 128], strides = [1, 1]} : vector<2x512xf32> to vector<2x128xf32>
      %111 = arith.negf %110 : vector<2x128xf32>
      %112 = math.exp %111 : vector<2x128xf32>
      %cst_39 = arith.constant 1.000000e+00 : f32
      %113 = vector.broadcast %cst_39 : f32 to vector<2x128xf32>
      %114 = arith.addf %113, %112 : vector<2x128xf32>
      %115 = arith.divf %113, %114 : vector<2x128xf32>
      %116 = vector.extract_strided_slice %109 {offsets = [0, 128], sizes = [2, 128], strides = [1, 1]} : vector<2x512xf32> to vector<2x128xf32>
      %117 = arith.negf %116 : vector<2x128xf32>
      %118 = math.exp %117 : vector<2x128xf32>
      %cst_40 = arith.constant 1.000000e+00 : f32
      %119 = vector.broadcast %cst_40 : f32 to vector<2x128xf32>
      %120 = arith.addf %119, %118 : vector<2x128xf32>
      %121 = arith.divf %119, %120 : vector<2x128xf32>
      %122 = vector.extract_strided_slice %109 {offsets = [0, 256], sizes = [2, 128], strides = [1, 1]} : vector<2x512xf32> to vector<2x128xf32>
      %123 = math.tanh %122 : vector<2x128xf32>
      %124 = vector.extract_strided_slice %109 {offsets = [0, 384], sizes = [2, 128], strides = [1, 1]} : vector<2x512xf32> to vector<2x128xf32>
      %125 = arith.negf %124 : vector<2x128xf32>
      %126 = math.exp %125 : vector<2x128xf32>
      %cst_41 = arith.constant 1.000000e+00 : f32
      %127 = vector.broadcast %cst_41 : f32 to vector<2x128xf32>
      %128 = arith.addf %127, %126 : vector<2x128xf32>
      %129 = arith.divf %127, %128 : vector<2x128xf32>
      %130 = arith.mulf %121, %103 : vector<2x128xf32>
      %131 = arith.mulf %115, %123 : vector<2x128xf32>
      %132 = arith.addf %130, %131 : vector<2x128xf32>
      %133 = math.tanh %132 : vector<2x128xf32>
      %134 = arith.mulf %129, %133 : vector<2x128xf32>
      %135 = arith.truncf %134 : vector<2x128xf32> to vector<2x128xbf16>
      %c8 = arith.constant 8 : index
      %c0_42 = arith.constant 0 : index
      %136 = vector.load %arg8[%c8, %c0_42] : memref<16x512xf32, #tpu.memory_space<vmem>>, vector<2x512xf32>
      %cst_43 = arith.constant dense<0.000000e+00> : vector<2x512xf32>
      %137 = tpu.matmul %135, %17, %cst_43 {dimension_numbers = #tpu.dot_dimension_numbers<[1], [0], [0], [1], [0, 0, 1, 1], [], []>} : vector<2x128xbf16>, vector<128x512xbf16>, vector<2x512xf32> -> vector<2x512xf32>
      %138 = arith.addf %136, %137 : vector<2x512xf32>
      %139 = vector.extract_strided_slice %138 {offsets = [0, 0], sizes = [2, 128], strides = [1, 1]} : vector<2x512xf32> to vector<2x128xf32>
      %140 = arith.negf %139 : vector<2x128xf32>
      %141 = math.exp %140 : vector<2x128xf32>
      %cst_44 = arith.constant 1.000000e+00 : f32
      %142 = vector.broadcast %cst_44 : f32 to vector<2x128xf32>
      %143 = arith.addf %142, %141 : vector<2x128xf32>
      %144 = arith.divf %142, %143 : vector<2x128xf32>
      %145 = vector.extract_strided_slice %138 {offsets = [0, 128], sizes = [2, 128], strides = [1, 1]} : vector<2x512xf32> to vector<2x128xf32>
      %146 = arith.negf %145 : vector<2x128xf32>
      %147 = math.exp %146 : vector<2x128xf32>
      %cst_45 = arith.constant 1.000000e+00 : f32
      %148 = vector.broadcast %cst_45 : f32 to vector<2x128xf32>
      %149 = arith.addf %148, %147 : vector<2x128xf32>
      %150 = arith.divf %148, %149 : vector<2x128xf32>
      %151 = vector.extract_strided_slice %138 {offsets = [0, 256], sizes = [2, 128], strides = [1, 1]} : vector<2x512xf32> to vector<2x128xf32>
      %152 = math.tanh %151 : vector<2x128xf32>
      %153 = vector.extract_strided_slice %138 {offsets = [0, 384], sizes = [2, 128], strides = [1, 1]} : vector<2x512xf32> to vector<2x128xf32>
      %154 = arith.negf %153 : vector<2x128xf32>
      %155 = math.exp %154 : vector<2x128xf32>
      %cst_46 = arith.constant 1.000000e+00 : f32
      %156 = vector.broadcast %cst_46 : f32 to vector<2x128xf32>
      %157 = arith.addf %156, %155 : vector<2x128xf32>
      %158 = arith.divf %156, %157 : vector<2x128xf32>
      %159 = arith.mulf %150, %132 : vector<2x128xf32>
      %160 = arith.mulf %144, %152 : vector<2x128xf32>
      %161 = arith.addf %159, %160 : vector<2x128xf32>
      %162 = math.tanh %161 : vector<2x128xf32>
      %163 = arith.mulf %158, %162 : vector<2x128xf32>
      %164 = arith.truncf %163 : vector<2x128xf32> to vector<2x128xbf16>
      %c10 = arith.constant 10 : index
      %c0_47 = arith.constant 0 : index
      %165 = vector.load %arg8[%c10, %c0_47] : memref<16x512xf32, #tpu.memory_space<vmem>>, vector<2x512xf32>
      %cst_48 = arith.constant dense<0.000000e+00> : vector<2x512xf32>
      %166 = tpu.matmul %164, %17, %cst_48 {dimension_numbers = #tpu.dot_dimension_numbers<[1], [0], [0], [1], [0, 0, 1, 1], [], []>} : vector<2x128xbf16>, vector<128x512xbf16>, vector<2x512xf32> -> vector<2x512xf32>
      %167 = arith.addf %165, %166 : vector<2x512xf32>
      %168 = vector.extract_strided_slice %167 {offsets = [0, 0], sizes = [2, 128], strides = [1, 1]} : vector<2x512xf32> to vector<2x128xf32>
      %169 = arith.negf %168 : vector<2x128xf32>
      %170 = math.exp %169 : vector<2x128xf32>
      %cst_49 = arith.constant 1.000000e+00 : f32
      %171 = vector.broadcast %cst_49 : f32 to vector<2x128xf32>
      %172 = arith.addf %171, %170 : vector<2x128xf32>
      %173 = arith.divf %171, %172 : vector<2x128xf32>
      %174 = vector.extract_strided_slice %167 {offsets = [0, 128], sizes = [2, 128], strides = [1, 1]} : vector<2x512xf32> to vector<2x128xf32>
      %175 = arith.negf %174 : vector<2x128xf32>
      %176 = math.exp %175 : vector<2x128xf32>
      %cst_50 = arith.constant 1.000000e+00 : f32
      %177 = vector.broadcast %cst_50 : f32 to vector<2x128xf32>
      %178 = arith.addf %177, %176 : vector<2x128xf32>
      %179 = arith.divf %177, %178 : vector<2x128xf32>
      %180 = vector.extract_strided_slice %167 {offsets = [0, 256], sizes = [2, 128], strides = [1, 1]} : vector<2x512xf32> to vector<2x128xf32>
      %181 = math.tanh %180 : vector<2x128xf32>
      %182 = vector.extract_strided_slice %167 {offsets = [0, 384], sizes = [2, 128], strides = [1, 1]} : vector<2x512xf32> to vector<2x128xf32>
      %183 = arith.negf %182 : vector<2x128xf32>
      %184 = math.exp %183 : vector<2x128xf32>
      %cst_51 = arith.constant 1.000000e+00 : f32
      %185 = vector.broadcast %cst_51 : f32 to vector<2x128xf32>
      %186 = arith.addf %185, %184 : vector<2x128xf32>
      %187 = arith.divf %185, %186 : vector<2x128xf32>
      %188 = arith.mulf %179, %161 : vector<2x128xf32>
      %189 = arith.mulf %173, %181 : vector<2x128xf32>
      %190 = arith.addf %188, %189 : vector<2x128xf32>
      %191 = math.tanh %190 : vector<2x128xf32>
      %192 = arith.mulf %187, %191 : vector<2x128xf32>
      %193 = arith.truncf %192 : vector<2x128xf32> to vector<2x128xbf16>
      %c12 = arith.constant 12 : index
      %c0_52 = arith.constant 0 : index
      %194 = vector.load %arg8[%c12, %c0_52] : memref<16x512xf32, #tpu.memory_space<vmem>>, vector<2x512xf32>
      %cst_53 = arith.constant dense<0.000000e+00> : vector<2x512xf32>
      %195 = tpu.matmul %193, %17, %cst_53 {dimension_numbers = #tpu.dot_dimension_numbers<[1], [0], [0], [1], [0, 0, 1, 1], [], []>} : vector<2x128xbf16>, vector<128x512xbf16>, vector<2x512xf32> -> vector<2x512xf32>
      %196 = arith.addf %194, %195 : vector<2x512xf32>
      %197 = vector.extract_strided_slice %196 {offsets = [0, 0], sizes = [2, 128], strides = [1, 1]} : vector<2x512xf32> to vector<2x128xf32>
      %198 = arith.negf %197 : vector<2x128xf32>
      %199 = math.exp %198 : vector<2x128xf32>
      %cst_54 = arith.constant 1.000000e+00 : f32
      %200 = vector.broadcast %cst_54 : f32 to vector<2x128xf32>
      %201 = arith.addf %200, %199 : vector<2x128xf32>
      %202 = arith.divf %200, %201 : vector<2x128xf32>
      %203 = vector.extract_strided_slice %196 {offsets = [0, 128], sizes = [2, 128], strides = [1, 1]} : vector<2x512xf32> to vector<2x128xf32>
      %204 = arith.negf %203 : vector<2x128xf32>
      %205 = math.exp %204 : vector<2x128xf32>
      %cst_55 = arith.constant 1.000000e+00 : f32
      %206 = vector.broadcast %cst_55 : f32 to vector<2x128xf32>
      %207 = arith.addf %206, %205 : vector<2x128xf32>
      %208 = arith.divf %206, %207 : vector<2x128xf32>
      %209 = vector.extract_strided_slice %196 {offsets = [0, 256], sizes = [2, 128], strides = [1, 1]} : vector<2x512xf32> to vector<2x128xf32>
      %210 = math.tanh %209 : vector<2x128xf32>
      %211 = vector.extract_strided_slice %196 {offsets = [0, 384], sizes = [2, 128], strides = [1, 1]} : vector<2x512xf32> to vector<2x128xf32>
      %212 = arith.negf %211 : vector<2x128xf32>
      %213 = math.exp %212 : vector<2x128xf32>
      %cst_56 = arith.constant 1.000000e+00 : f32
      %214 = vector.broadcast %cst_56 : f32 to vector<2x128xf32>
      %215 = arith.addf %214, %213 : vector<2x128xf32>
      %216 = arith.divf %214, %215 : vector<2x128xf32>
      %217 = arith.mulf %208, %190 : vector<2x128xf32>
      %218 = arith.mulf %202, %210 : vector<2x128xf32>
      %219 = arith.addf %217, %218 : vector<2x128xf32>
      %220 = math.tanh %219 : vector<2x128xf32>
      %221 = arith.mulf %216, %220 : vector<2x128xf32>
      %222 = arith.truncf %221 : vector<2x128xf32> to vector<2x128xbf16>
      %c14 = arith.constant 14 : index
      %c0_57 = arith.constant 0 : index
      %223 = vector.load %arg8[%c14, %c0_57] : memref<16x512xf32, #tpu.memory_space<vmem>>, vector<2x512xf32>
      %cst_58 = arith.constant dense<0.000000e+00> : vector<2x512xf32>
      %224 = tpu.matmul %222, %17, %cst_58 {dimension_numbers = #tpu.dot_dimension_numbers<[1], [0], [0], [1], [0, 0, 1, 1], [], []>} : vector<2x128xbf16>, vector<128x512xbf16>, vector<2x512xf32> -> vector<2x512xf32>
      %225 = arith.addf %223, %224 : vector<2x512xf32>
      %226 = vector.extract_strided_slice %225 {offsets = [0, 0], sizes = [2, 128], strides = [1, 1]} : vector<2x512xf32> to vector<2x128xf32>
      %227 = arith.negf %226 : vector<2x128xf32>
      %228 = math.exp %227 : vector<2x128xf32>
      %cst_59 = arith.constant 1.000000e+00 : f32
      %229 = vector.broadcast %cst_59 : f32 to vector<2x128xf32>
      %230 = arith.addf %229, %228 : vector<2x128xf32>
      %231 = arith.divf %229, %230 : vector<2x128xf32>
      %232 = vector.extract_strided_slice %225 {offsets = [0, 128], sizes = [2, 128], strides = [1, 1]} : vector<2x512xf32> to vector<2x128xf32>
      %233 = arith.negf %232 : vector<2x128xf32>
      %234 = math.exp %233 : vector<2x128xf32>
      %cst_60 = arith.constant 1.000000e+00 : f32
      %235 = vector.broadcast %cst_60 : f32 to vector<2x128xf32>
      %236 = arith.addf %235, %234 : vector<2x128xf32>
      %237 = arith.divf %235, %236 : vector<2x128xf32>
      %238 = vector.extract_strided_slice %225 {offsets = [0, 256], sizes = [2, 128], strides = [1, 1]} : vector<2x512xf32> to vector<2x128xf32>
      %239 = math.tanh %238 : vector<2x128xf32>
      %240 = vector.extract_strided_slice %225 {offsets = [0, 384], sizes = [2, 128], strides = [1, 1]} : vector<2x512xf32> to vector<2x128xf32>
      %241 = arith.negf %240 : vector<2x128xf32>
      %242 = math.exp %241 : vector<2x128xf32>
      %cst_61 = arith.constant 1.000000e+00 : f32
      %243 = vector.broadcast %cst_61 : f32 to vector<2x128xf32>
      %244 = arith.addf %243, %242 : vector<2x128xf32>
      %245 = arith.divf %243, %244 : vector<2x128xf32>
      %246 = arith.mulf %237, %219 : vector<2x128xf32>
      %247 = arith.mulf %231, %239 : vector<2x128xf32>
      %248 = arith.addf %246, %247 : vector<2x128xf32>
      %249 = math.tanh %248 : vector<2x128xf32>
      %250 = arith.mulf %245, %249 : vector<2x128xf32>
      %251 = tpu.concatenate %47, %76, %105, %134, %163, %192, %221, %250 in 0 : vector<2x128xf32>, vector<2x128xf32>, vector<2x128xf32>, vector<2x128xf32>, vector<2x128xf32>, vector<2x128xf32>, vector<2x128xf32>, vector<2x128xf32> -> vector<16x128xf32>
      %252 = arith.truncf %251 : vector<16x128xf32> to vector<16x128xbf16>
      %c0_62 = arith.constant 0 : index
      %c0_63 = arith.constant 0 : index
      %253 = vector.load %arg9[%c0_62, %c0_63] : memref<16x128xbf16, #tpu.memory_space<vmem>>, vector<16x128xbf16>
      tpu.vector_store %arg9[%c0_62, %c0_63], %252 {strides = array<i32>} : memref<16x128xbf16, #tpu.memory_space<vmem>>, vector<16x128xbf16>,
    } else {
    }
    %c0 = arith.constant 0 : index
    %c0_1 = arith.constant 0 : index
    %3 = vector.load %arg9[%c0, %c0_1] : memref<16x128xbf16, #tpu.memory_space<vmem>>, vector<16x128xbf16>
    %c0_2 = arith.constant 0 : index
    %c0_3 = arith.constant 0 : index
    %4 = vector.load %arg5[%c0_2, %c0_3] : memref<128x128xbf16, #tpu.memory_space<vmem>>, vector<128x128xbf16>
    %cst = arith.constant dense<0.000000e+00> : vector<16x128xf32>
    %5 = tpu.matmul %3, %4, %cst {dimension_numbers = #tpu.dot_dimension_numbers<[1], [0], [0], [1], [0, 0, 1, 1], [], []>} : vector<16x128xbf16>, vector<128x128xbf16>, vector<16x128xf32> -> vector<16x128xf32>
    %c0_4 = arith.constant 0 : index
    %c0_5 = arith.constant 0 : index
    %6 = vector.load %arg6[%c0_4, %c0_5] : memref<1x128xf32, #tpu.memory_space<vmem>>, vector<1x128xf32>
    %7 = vector.broadcast %6 : vector<1x128xf32> to vector<16x128xf32>
    %8 = arith.addf %5, %7 : vector<16x128xf32>
    %c0_6 = arith.constant 0 : index
    %c0_7 = arith.constant 0 : index
    %9 = vector.load %arg7[%c0_6, %c0_7] : memref<16x128xf32, #tpu.memory_space<vmem>>, vector<16x128xf32>
    tpu.vector_store %arg7[%c0_6, %c0_7], %8 {strides = array<i32>} : memref<16x128xf32, #tpu.memory_space<vmem>>, vector<16x128xf32>,
    return
  }
  func.func @transform_0(%arg0: i32) -> (i32, i32) {
    %c0_i32 = arith.constant 0 : i32
    %c0_i32_0 = arith.constant 0 : i32
    %c0_i32_1 = arith.constant 0 : i32
    return %c0_i32, %c0_i32_0 : i32, i32
  }
  func.func @transform_1(%arg0: i32) -> (i32, i32) {
    %c0_i32 = arith.constant 0 : i32
    %c0_i32_0 = arith.constant 0 : i32
    %c0_i32_1 = arith.constant 0 : i32
    return %c0_i32, %c0_i32_0 : i32, i32
  }
  func.func @transform_2(%arg0: i32) -> (i32, i32) {
    %c0_i32 = arith.constant 0 : i32
    %c0_i32_0 = arith.constant 0 : i32
    %c0_i32_1 = arith.constant 0 : i32
    return %c0_i32, %c0_i32_0 : i32, i32
  }
  func.func @transform_3(%arg0: i32) -> (i32, i32) {
    %c0_i32 = arith.constant 0 : i32
    %c0_i32_0 = arith.constant 0 : i32
    %c0_i32_1 = arith.constant 0 : i32
    return %c0_i32, %c0_i32_0 : i32, i32
  }
  func.func @transform_4(%arg0: i32) -> (i32, i32) {
    %c0_i32 = arith.constant 0 : i32
    %c0_i32_0 = arith.constant 0 : i32
    return %c0_i32, %arg0 : i32, i32
  }
  func.func @transform_5(%arg0: i32) -> (i32, i32) {
    %c0_i32 = arith.constant 0 : i32
    %c0_i32_0 = arith.constant 0 : i32
    return %c0_i32, %arg0 : i32, i32
  }
  func.func @transform_6(%arg0: i32) -> (i32, i32) {
    %c0_i32 = arith.constant 0 : i32
    %c0_i32_0 = arith.constant 0 : i32
    return %c0_i32, %arg0 : i32, i32
  }
}

</mosaic_0001>

<bundles_post_ra>
// kernel: image_caption_forward.2
= control target key start
LH: loop header
LB: loop body
LE: loop exit
PB: predicated region body
PF: predicated region fallthrough
CT: control target
= control target key end

     0   :  { %s2393_s18 = smov 0   ;;  %s2395_s19 = smov 0   ;;  %s3050_s0 = inlined_call_operand.vmem [shape: f32[4,2,9,9,3], index: 0, kind: input, shape index: {}]   ;;  %s3051_s1 = inlined_call_operand.vmem [shape: bf16[27,256], index: 1, kind: input, shape index: {}]   ;;  %s3052_s2 = inlined_call_operand.vmem [shape: f32[1,256], index: 2, kind: input, shape index: {}]   ;;  %s3053_s3 = inlined_call_operand.vmem [shape: bf16[256,128], index: 3, kind: input, shape index: {}]   ;;  %s3054_s4 = inlined_call_operand.vmem [shape: f32[1,128], index: 4, kind: input, shape index: {}]   ;;  %s3055_s5 = inlined_call_operand.vmem [shape: f32[2,1,128], index: 5, kind: output, shape index: {}]  }
   0x1   :  { %s2397_s20 = smov 0  }
   0x2 LB: > { %s2058_s21 = sadd.s32 4294967295, %s2359_s20   ;;  %s2410_s22 = sadd.s32 1, %s2359_s20   ;;  %s2359_s20 = sphi %s2397_s20, %s3058_s20   ;;  %s2355_s19 = sphi %s2395_s19, %s3057_s19   ;;  %s2351_s18 = sphi %s2393_s18, %s3056_s18  }
   0x3   : > { %s19_s23 = ssub.s32 %s2359_s20, %s2410_s22  ;;  %s22_s24 = sadd.s32 1, %s2355_s19 }
   0x4   : > { %p20_p0 = scmp.eq.s32.totalorder %s19_s23, 0  ;;  %p29_p1 = scmp.ne.s32.totalorder %s2355_s19, %s2351_s18 }
   0x5   : > { %p30_p2 = scmp.eq.s32.totalorder %s2359_s20, 0  ;;  %p2061_p4 = scmp.ge.s32.totalorder %s2359_s20, 2 }
   0x6   : > { %s2419_s25 = scalar_select %p20_p0, %s2355_s19, %s22_s24  }
   0x7   : > { %p31_p3 = por %p30_p2, %p29_p1  ;;  %177 = sbr.rel (%p2061_p4) target bundleno = 55 (0x37), region = 32 }
   0xe   : > { %180 = sbr.rel (!%p31_p3) target bundleno = 55 (0x37), region = 36  ;;  %s182_s26 = sand.u32 (%p31_p3), 1, %s2355_s19  }
   0xf   : > { %s2281_s27 = smul.u32 (%p31_p3), 144, %s2359_s20 }
  0x10   : > { %s2280_s28 = smul.u32 (%p31_p3), 576, %s182_s26 }
  0x11   : > { %s2427_s6 = scalar_lea.vmem (%p31_p3), %s3050_s0, %s2281_s27 }
  0x12   : > { %v357_v0 = vld [vmem:[%s2427_s6] sm:$0xff] (%p31_p3)  ;;  %v359_v1 = vld [vmem:[%s2427_s6 + $0x8] sm:$0xff] (%p31_p3)  ;;  %v361_v2 = vld [vmem:[%s2427_s6 + $0x10] sm:$0xff] (%p31_p3)  ;;  %s2432_s7 = scalar_lea.vmem (%p31_p3), [#allocation2], %s2280_s28 }
  0x13   : > { %358 = vst [vmem:[%s2432_s7] sm:$0xff] (%p31_p3), %v357_v0  ;;  %360 = vst [vmem:[%s2432_s7 + $0x8] sm:$0xff] (%p31_p3), %v359_v1  ;;  %v363_v3 = vld [vmem:[%s2427_s6 + $0x18] sm:$0xff] (%p31_p3)  ;;  %v365_v4 = vld [vmem:[%s2427_s6 + $0x20] sm:$0xff] (%p31_p3) }
  0x14   : > { %362 = vst [vmem:[%s2432_s7 + $0x10] sm:$0xff] (%p31_p3), %v361_v2  ;;  %v367_v5 = vld [vmem:[%s2427_s6 + $0x28] sm:$0xff] (%p31_p3)  ;;  %364 = vst [vmem:[%s2432_s7 + $0x18] sm:$0xff] (%p31_p3), %v363_v3  ;;  %v369_v6 = vld [vmem:[%s2427_s6 + $0x30] sm:$0xff] (%p31_p3) }
  0x15   : > { %366 = vst [vmem:[%s2432_s7 + $0x20] sm:$0xff] %v365_v4  ;;  %368 = vst [vmem:[%s2432_s7 + $0x28] sm:$0xff] %v367_v5  ;;  %v371_v7 = vld [vmem:[%s2427_s6 + $0x38] sm:$0xff]  ;;  %v373_v8 = vld [vmem:[%s2427_s6 + $0x40] sm:$0xff] }
  0x16   : > { %370 = vst [vmem:[%s2432_s7 + $0x30] sm:$0xff] %v369_v6  ;;  %372 = vst [vmem:[%s2432_s7 + $0x38] sm:$0xff] %v371_v7  ;;  %v375_v9 = vld [vmem:[%s2427_s6 + $0x48] sm:$0xff]  ;;  %v377_v10 = vld [vmem:[%s2427_s6 + $0x50] sm:$0xff] }
  0x17   : > { %374 = vst [vmem:[%s2432_s7 + $0x40] sm:$0xff] %v373_v8  ;;  %v379_v11 = vld [vmem:[%s2427_s6 + $0x58] sm:$0xff]  ;;  %376 = vst [vmem:[%s2432_s7 + $0x48] sm:$0xff] %v375_v9  ;;  %v381_v12 = vld [vmem:[%s2427_s6 + $0x60] sm:$0xff] }
  0x18   : > { %378 = vst [vmem:[%s2432_s7 + $0x50] sm:$0xff] %v377_v10  ;;  %380 = vst [vmem:[%s2432_s7 + $0x58] sm:$0xff] %v379_v11  ;;  %v383_v13 = vld [vmem:[%s2427_s6 + $0x68] sm:$0xff]  ;;  %v385_v14 = vld [vmem:[%s2427_s6 + $0x70] sm:$0xff] }
  0x19   : > { %382 = vst [vmem:[%s2432_s7 + $0x60] sm:$0xff] %v381_v12  ;;  %384 = vst [vmem:[%s2432_s7 + $0x68] sm:$0xff] %v383_v13  ;;  %v387_v15 = vld [vmem:[%s2427_s6 + $0x78] sm:$0xff]  ;;  %v389_v16 = vld [vmem:[%s2427_s6 + $0x80] sm:$0xff] }
  0x1a   : > { %386 = vst [vmem:[%s2432_s7 + $0x70] sm:$0xff] %v385_v14  ;;  %v391_v17 = vld [vmem:[%s2427_s6 + $0x88] sm:$0xff]  ;;  %388 = vst [vmem:[%s2432_s7 + $0x78] sm:$0xff] %v387_v15  ;;  %v393_v18 = vld [vmem:[%s2427_s6 + $0x120] sm:$0xff] }
  0x1b   : > { %390 = vst [vmem:[%s2432_s7 + $0x80] sm:$0xff] %v389_v16  ;;  %392 = vst [vmem:[%s2432_s7 + $0x88] sm:$0xff] %v391_v17  ;;  %v395_v19 = vld [vmem:[%s2427_s6 + $0x128] sm:$0xff]  ;;  %v397_v20 = vld [vmem:[%s2427_s6 + $0x130] sm:$0xff] }
  0x1c   : > { %394 = vst [vmem:[%s2432_s7 + $0x90] sm:$0xff] %v393_v18  ;;  %396 = vst [vmem:[%s2432_s7 + $0x98] sm:$0xff] %v395_v19  ;;  %v399_v21 = vld [vmem:[%s2427_s6 + $0x138] sm:$0xff]  ;;  %v401_v22 = vld [vmem:[%s2427_s6 + $0x140] sm:$0xff] }
  0x1d   : > { %398 = vst [vmem:[%s2432_s7 + $0xa0] sm:$0xff] %v397_v20  ;;  %v403_v23 = vld [vmem:[%s2427_s6 + $0x148] sm:$0xff]  ;;  %400 = vst [vmem:[%s2432_s7 + $0xa8] sm:$0xff] %v399_v21  ;;  %v405_v24 = vld [vmem:[%s2427_s6 + $0x150] sm:$0xff] }
  0x1e   : > { %402 = vst [vmem:[%s2432_s7 + $0xb0] sm:$0xff] %v401_v22  ;;  %404 = vst [vmem:[%s2432_s7 + $0xb8] sm:$0xff] %v403_v23  ;;  %v407_v25 = vld [vmem:[%s2427_s6 + $0x158] sm:$0xff]  ;;  %v409_v26 = vld [vmem:[%s2427_s6 + $0x160] sm:$0xff] }
  0x1f   : > { %406 = vst [vmem:[%s2432_s7 + $0xc0] sm:$0xff] %v405_v24  ;;  %408 = vst [vmem:[%s2432_s7 + $0xc8] sm:$0xff] %v407_v25  ;;  %v411_v27 = vld [vmem:[%s2427_s6 + $0x168] sm:$0xff]  ;;  %v413_v28 = vld [vmem:[%s2427_s6 + $0x170] sm:$0xff] }
  0x20   : > { %410 = vst [vmem:[%s2432_s7 + $0xd0] sm:$0xff] %v409_v26  ;;  %v415_v29 = vld [vmem:[%s2427_s6 + $0x178] sm:$0xff]  ;;  %412 = vst [vmem:[%s2432_s7 + $0xd8] sm:$0xff] %v411_v27  ;;  %v417_v30 = vld [vmem:[%s2427_s6 + $0x180] sm:$0xff] }
  0x21   : > { %414 = vst [vmem:[%s2432_s7 + $0xe0] sm:$0xff] %v413_v28  ;;  %416 = vst [vmem:[%s2432_s7 + $0xe8] sm:$0xff] %v415_v29  ;;  %v419_v31 = vld [vmem:[%s2427_s6 + $0x188] sm:$0xff]  ;;  %v421_v32 = vld [vmem:[%s2427_s6 + $0x190] sm:$0xff] }
  0x22   : > { %418 = vst [vmem:[%s2432_s7 + $0xf0] sm:$0xff] %v417_v30  ;;  %420 = vst [vmem:[%s2432_s7 + $0xf8] sm:$0xff] %v419_v31  ;;  %v423_v33 = vld [vmem:[%s2427_s6 + $0x198] sm:$0xff]  ;;  %v425_v34 = vld [vmem:[%s2427_s6 + $0x1a0] sm:$0xff] }
  0x23   : > { %422 = vst [vmem:[%s2432_s7 + $0x100] sm:$0xff] %v421_v32  ;;  %v427_v35 = vld [vmem:[%s2427_s6 + $0x1a8] sm:$0xff]  ;;  %424 = vst [vmem:[%s2432_s7 + $0x108] sm:$0xff] %v423_v33  ;;  %v429_v36 = vld [vmem:[%s2427_s6 + $0x240] sm:$0xff] }
  0x24   : > { %426 = vst [vmem:[%s2432_s7 + $0x110] sm:$0xff] %v425_v34  ;;  %428 = vst [vmem:[%s2432_s7 + $0x118] sm:$0xff] %v427_v35  ;;  %v431_v37 = vld [vmem:[%s2427_s6 + $0x248] sm:$0xff]  ;;  %v433_v38 = vld [vmem:[%s2427_s6 + $0x250] sm:$0xff] }
  0x25   : > { %430 = vst [vmem:[%s2432_s7 + $0x120] sm:$0xff] %v429_v36  ;;  %432 = vst [vmem:[%s2432_s7 + $0x128] sm:$0xff] %v431_v37  ;;  %v435_v39 = vld [vmem:[%s2427_s6 + $0x258] sm:$0xff]  ;;  %v437_v40 = vld [vmem:[%s2427_s6 + $0x260] sm:$0xff] }
  0x26   : > { %434 = vst [vmem:[%s2432_s7 + $0x130] sm:$0xff] %v433_v38  ;;  %v439_v41 = vld [vmem:[%s2427_s6 + $0x268] sm:$0xff]  ;;  %436 = vst [vmem:[%s2432_s7 + $0x138] sm:$0xff] %v435_v39  ;;  %v441_v42 = vld [vmem:[%s2427_s6 + $0x270] sm:$0xff] }
  0x27   : > { %438 = vst [vmem:[%s2432_s7 + $0x140] sm:$0xff] %v437_v40  ;;  %440 = vst [vmem:[%s2432_s7 + $0x148] sm:$0xff] %v439_v41  ;;  %v443_v43 = vld [vmem:[%s2427_s6 + $0x278] sm:$0xff]  ;;  %v445_v44 = vld [vmem:[%s2427_s6 + $0x280] sm:$0xff] }
  0x28   : > { %442 = vst [vmem:[%s2432_s7 + $0x150] sm:$0xff] %v441_v42  ;;  %444 = vst [vmem:[%s2432_s7 + $0x158] sm:$0xff] %v443_v43  ;;  %v447_v45 = vld [vmem:[%s2427_s6 + $0x288] sm:$0xff]  ;;  %v449_v46 = vld [vmem:[%s2427_s6 + $0x290] sm:$0xff] }
  0x29   : > { %446 = vst [vmem:[%s2432_s7 + $0x160] sm:$0xff] %v445_v44  ;;  %v451_v47 = vld [vmem:[%s2427_s6 + $0x298] sm:$0xff]  ;;  %448 = vst [vmem:[%s2432_s7 + $0x168] sm:$0xff] %v447_v45  ;;  %v453_v48 = vld [vmem:[%s2427_s6 + $0x2a0] sm:$0xff] }
  0x2a   : > { %450 = vst [vmem:[%s2432_s7 + $0x170] sm:$0xff] %v449_v46  ;;  %452 = vst [vmem:[%s2432_s7 + $0x178] sm:$0xff] %v451_v47  ;;  %v455_v49 = vld [vmem:[%s2427_s6 + $0x2a8] sm:$0xff]  ;;  %v457_v50 = vld [vmem:[%s2427_s6 + $0x2b0] sm:$0xff] }
  0x2b   : > { %454 = vst [vmem:[%s2432_s7 + $0x180] sm:$0xff] %v453_v48  ;;  %456 = vst [vmem:[%s2432_s7 + $0x188] sm:$0xff] %v455_v49  ;;  %v459_v51 = vld [vmem:[%s2427_s6 + $0x2b8] sm:$0xff]  ;;  %v461_v52 = vld [vmem:[%s2427_s6 + $0x2c0] sm:$0xff] }
  0x2c   : > { %458 = vst [vmem:[%s2432_s7 + $0x190] sm:$0xff] %v457_v50  ;;  %v463_v53 = vld [vmem:[%s2427_s6 + $0x2c8] sm:$0xff]  ;;  %460 = vst [vmem:[%s2432_s7 + $0x198] sm:$0xff] %v459_v51  ;;  %v465_v54 = vld [vmem:[%s2427_s6 + $0x360] sm:$0xff] }
  0x2d   : > { %462 = vst [vmem:[%s2432_s7 + $0x1a0] sm:$0xff] %v461_v52  ;;  %464 = vst [vmem:[%s2432_s7 + $0x1a8] sm:$0xff] %v463_v53  ;;  %v467_v55 = vld [vmem:[%s2427_s6 + $0x368] sm:$0xff]  ;;  %v469_v56 = vld [vmem:[%s2427_s6 + $0x370] sm:$0xff] }
  0x2e   : > { %466 = vst [vmem:[%s2432_s7 + $0x1b0] sm:$0xff] %v465_v54  ;;  %468 = vst [vmem:[%s2432_s7 + $0x1b8] sm:$0xff] %v467_v55  ;;  %v471_v57 = vld [vmem:[%s2427_s6 + $0x378] sm:$0xff]  ;;  %v473_v58 = vld [vmem:[%s2427_s6 + $0x380] sm:$0xff] }
  0x2f   : > { %470 = vst [vmem:[%s2432_s7 + $0x1c0] sm:$0xff] %v469_v56  ;;  %v475_v59 = vld [vmem:[%s2427_s6 + $0x388] sm:$0xff]  ;;  %472 = vst [vmem:[%s2432_s7 + $0x1c8] sm:$0xff] %v471_v57  ;;  %v477_v60 = vld [vmem:[%s2427_s6 + $0x390] sm:$0xff] }
  0x30   : > { %474 = vst [vmem:[%s2432_s7 + $0x1d0] sm:$0xff] %v473_v58  ;;  %476 = vst [vmem:[%s2432_s7 + $0x1d8] sm:$0xff] %v475_v59  ;;  %v479_v61 = vld [vmem:[%s2427_s6 + $0x398] sm:$0xff]  ;;  %v481_v62 = vld [vmem:[%s2427_s6 + $0x3a0] sm:$0xff] }
  0x31   : > { %478 = vst [vmem:[%s2432_s7 + $0x1e0] sm:$0xff] %v477_v60  ;;  %480 = vst [vmem:[%s2432_s7 + $0x1e8] sm:$0xff] %v479_v61  ;;  %v483_v63 = vld [vmem:[%s2427_s6 + $0x3a8] sm:$0xff]  ;;  %v485_v0 = vld [vmem:[%s2427_s6 + $0x3b0] sm:$0xff] }
  0x32   : > { %482 = vst [vmem:[%s2432_s7 + $0x1f0] sm:$0xff] %v481_v62  ;;  %v487_v1 = vld [vmem:[%s2427_s6 + $0x3b8] sm:$0xff]  ;;  %484 = vst [vmem:[%s2432_s7 + $0x1f8] sm:$0xff] %v483_v63  ;;  %v489_v2 = vld [vmem:[%s2427_s6 + $0x3c0] sm:$0xff] }
  0x33   : > { %486 = vst [vmem:[%s2432_s7 + $0x200] sm:$0xff] %v485_v0  ;;  %488 = vst [vmem:[%s2432_s7 + $0x208] sm:$0xff] %v487_v1  ;;  %v491_v3 = vld [vmem:[%s2427_s6 + $0x3c8] sm:$0xff]  ;;  %v493_v4 = vld [vmem:[%s2427_s6 + $0x3d0] sm:$0xff] }
  0x34   : > { %490 = vst [vmem:[%s2432_s7 + $0x210] sm:$0xff] %v489_v2  ;;  %492 = vst [vmem:[%s2432_s7 + $0x218] sm:$0xff] %v491_v3  ;;  %v495_v5 = vld [vmem:[%s2427_s6 + $0x3d8] sm:$0xff]  ;;  %v497_v6 = vld [vmem:[%s2427_s6 + $0x3e0] sm:$0xff] }
  0x35   : > { %494 = vst [vmem:[%s2432_s7 + $0x220] sm:$0xff] %v493_v4  ;;  %v499_v7 = vld [vmem:[%s2427_s6 + $0x3e8] sm:$0xff]  ;;  %496 = vst [vmem:[%s2432_s7 + $0x228] sm:$0xff] %v495_v5 }
  0x36   : > { %498 = vst [vmem:[%s2432_s7 + $0x230] sm:$0xff] %v497_v6  ;;  %500 = vst [vmem:[%s2432_s7 + $0x238] sm:$0xff] %v499_v7 }
  0x37 PF: > { %p2063_p5 = scmp.ge.s32.totalorder %s2359_s20, 1  ;;  %p505_p6 = scmp.lt.s32.totalorder %s2359_s20, 3 }
  0x39   : > { %p506_p7 = pnand %p2063_p5, %p505_p6 }
  0x3a   : > { %v2580_v8 = vld [vmem:[%s3051_s1 + $0x8] sm:$0xff] (!%p506_p7)  ;;  %vm638_vm0 = vcmask (!%p506_p7), 1040384   ;;  %vm639_vm1 = vcmask (!%p506_p7), 1041408   ;;  %v2585_v9 = vld [vmem:[%s3051_s1] sm:$0xff] (!%p506_p7)  ;;  %v2361_v10 = vmov (!%p506_p7), 65535   ;;  %v2362_v14 = vmov (!%p506_p7), 0  }
  0x3b   : > { %509 = sbr.rel (%p506_p7) target bundleno = 679 (0x2a7), region = 74  ;;  %v640_v11 = vsel (!%p506_p7), %vm638_vm0, 4294967295, %v2361_v10  ;;  %v2589_v12 = vcombine.high (!%p506_p7), %v2580_v8, %v2580_v8  ;;  %v2593_v13 = vcombine.low (!%p506_p7), %v2580_v8, %v2580_v8  ;;  %1160 = vmatprep.mubr.bf16.mxu0 (!%p506_p7), %v2362_v14  ;;  %v2065_v15 = vcombine.high (!%p506_p7), %v2585_v9, %v2585_v9  ;;  %s512_s12 = sand.u32 (!%p506_p7), 1, %s2351_s18   ;;  %v2602_v16 = vld [vmem:[%s3051_s1 + $0x10] sm:$0xff] (!%p506_p7)  ;;  %680 = vmatprep.mubr.bf16.mxu1 (!%p506_p7), %v2362_v14 }
  0x3c   : > { %v2605_v17 = vsel (!%p506_p7), %vm639_vm1, %v640_v11, 0  ;;  %s2282_s15 = smul.u32 (!%p506_p7), 576, %s512_s12  ;;  %v2091_v18 = vcombine.high (!%p506_p7), %v2580_v8, %v2602_v16  ;;  %v2064_v19 = vcombine.low (!%p506_p7), %v2585_v9, %v2585_v9  ;;  %v2090_v40 = vcombine.low (!%p506_p7), %v2580_v8, %v2602_v16  ;;  %p537_p8 = scmp.lt.s32.totalorder (!%p506_p7), %s2058_s21, 1 }
  0x3d   : > { %v1109_v20 = vrot.slane (!%p506_p7), %v2589_v12, 2  ;;  %v1108_v21 = vrot.slane (!%p506_p7), %v2593_v13, 2  ;;  %v618_v22 = vshrl.u32 (!%p506_p7), %v2065_v15, 16  ;;  %v621_v23 = vshll.u32 (!%p506_p7), %v2065_v15, 16 }
  0x3e   : > { %v1283_v24 = vshrl.u32 (!%p506_p7), %v2091_v18, 16  ;;  %v1286_v25 = vshll.u32 (!%p506_p7), %v2091_v18, 16  ;;  %v610_v26 = vshrl.u32 (!%p506_p7), %v2064_v19, 16  ;;  %v613_v27 = vshll.u32 (!%p506_p7), %v2064_v19, 16  ;;  %s2615_s16 = scalar_lea.vmem (!%p506_p7), [#allocation2], %s2282_s15 }
  0x3f   : > { %v1126_v28 = vand.u32 (!%p506_p7), %v1109_v20, %v2605_v17  ;;  %v1123_v29 = vand.u32 (!%p506_p7), %v1108_v21, %v2605_v17  ;;  %v620_v30 = vrot.slane (!%p506_p7), %v618_v22, 1  ;;  %v623_v31 = vrot.slane (!%p506_p7), %v621_v23, 2  ;;  %v584_v32 = vld [vmem:[%s2615_s16 + $0x1b0] sm:$0xff] (!%p506_p7)  ;;  %v585_v33 = vld [vmem:[%s2615_s16 + $0x1c0] sm:$0xff] (!%p506_p7)  ;;  %v569_v11 = vld [vmem:[%s2615_s16 + $0x128] sm:$0x1] (!%p506_p7) }
  0x40   : > { %v1285_v34 = vrot.slane (!%p506_p7), %v1283_v24, 3  ;;  %v1288_v35 = vrot.slane (!%p506_p7), %v1286_v25, 4  ;;  %v612_v36 = vrot.slane (!%p506_p7), %v610_v26, 1  ;;  %v1104_v38 = vpack.c.bf16 (!%p506_p7), %v585_v33, %v584_v32  ;;  %v2622_v41 = vld [vmem:[%s2615_s16 + $0xa0] sm:$0xff] (!%p506_p7)  ;;  %v2625_v42 = vld [vmem:[%s2615_s16 + $0xb0] sm:$0xff] (!%p506_p7) }
  0x41   : > { %1128 = vmatprep.subr.bf16.mxu0 (!%p506_p7), %v1126_v28  ;;  %v624_v37 = vor.u32 (!%p506_p7), %v623_v31, %v620_v30  ;;  %v615_v39 = vrot.slane (!%p506_p7), %v613_v27, 2  ;;  %vm625_vm2 = vcmask (!%p506_p7), 23552   ;;  %v1512_v44 = vpack.c.bf16 (!%p506_p7), %v2625_v42, %v2622_v41  ;;  %v559_v49 = vld [vmem:[%s2615_s16 + $0x90] sm:$0xff] (!%p506_p7)  ;;  %v587_v56 = vld [vmem:[%s2615_s16 + $0x1e0] sm:$0xff] (!%p506_p7) }
  0x42   : > { %1129 = vmatpush1.bf16.msra.mxu0 %v1123_v29  ;;  %v1289_v43 = vor.u32 %v1288_v35, %v1285_v34  ;;  %v1275_v47 = vshrl.u32 %v2090_v40, 16  ;;  %v1278_v48 = vshll.u32 %v2090_v40, 16  ;;  %v600_v54 = vpack.c.bf16 %v2622_v41, %v559_v49  ;;  %v586_v55 = vld [vmem:[%s2615_s16 + $0x1d0] sm:$0xff]  ;;  %v2646_v0 = vld [vmem:[%s2615_s16 + $0xc0] sm:$0xff]  ;;  %v2689_v29 = vld [vmem:[%s2615_s16 + $0x148] sm:$0x1] }
  0x43   : > { %v646_v45 = vand.u32 %v2605_v17, %v624_v37  ;;  %v616_v46 = vor.u32 %v615_v39, %v612_v36  ;;  %v735_v57 = vand.u32 %v2065_v15, %v2605_v17  ;;  %v2097_v59 = vcombine.high %v2602_v16, %v2602_v16  ;;  %v588_v3 = vld [vmem:[%s2615_s16 + $0x1f0] sm:$0xff]  ;;  %v589_v4 = vld [vmem:[%s2615_s16 + $0x200] sm:$0xff]  ;;  %s3060_s21 = smov (!%p537_p8, %s2058_s21), 1 }
  0x44   : > { %v1306_v50 = vand.u32 %v1289_v43, %v2605_v17  ;;  %v1277_v52 = vrot.slane %v1275_v47, 3  ;;  %v1280_v53 = vrot.slane %v1278_v48, 4  ;;  %v733_v60 = vand.u32 %v2064_v19, %v2605_v17  ;;  %v2656_v6 = vld [vmem:[%s2615_s16 + $0xd0] sm:$0xff]  ;;  %v2659_v7 = vld [vmem:[%s2615_s16 + $0xe0] sm:$0xff]  ;;  %v571_v19 = vld [vmem:[%s2615_s16 + $0x138] sm:$0x1]  ;;  %s539_s17 = scalar_lea.vmem %s3055_s5, %s3060_s21 }
  0x45   : > { %648 = vmatprep.subr.bf16.mxu1 %v646_v45  ;;  %2086 = vmatmul.mubr.msk.bf16.vlgmr.msra.gmra.mrb[0].mxu0 %vm625_vm2, %v1104_v38  ;;  %v643_v51 = vand.u32 %v2605_v17, %v616_v46  ;;  %v1105_v62 = vpack.c.bf16 %v587_v56, %v586_v55  ;;  %v1404_v63 = vrot.slane %v2097_v59, 1  ;;  %v601_v2 = vpack.c.bf16 %v2646_v0, %v2625_v42  ;;  %v2662_v10 = vld [vmem:[%s2615_s16 + $0x120] sm:$0xff]  ;;  %v2667_v15 = vld [vmem:[%s2615_s16 + $0x130] sm:$0xff]  ;;  %v556_v45 = vld [vmem:[%s2615_s16 + $0x78] sm:$0x1] }
  0x46   : > { %1308 = vmatprep.subr.bf16.mxu0 %v1306_v50  ;;  %1170 = vmatprep.mubr.bf16.mxu0 %v2362_v14  ;;  %v1281_v58 = vor.u32 %v1280_v53, %v1277_v52  ;;  %v1106_v5 = vpack.c.bf16 %v589_v4, %v588_v3  ;;  %v2075_v18 = vcombine.high %v2585_v9, %v2580_v8  ;;  %v590_v20 = vld [vmem:[%s2615_s16 + $0x210] sm:$0xff]  ;;  %v591_v21 = vld [vmem:[%s2615_s16 + $0x220] sm:$0xff]  ;;  %vm826_vm3 = vcmask 1046528   ;;  %v575_v53 = vld [vmem:[%s2615_s16 + $0x158] sm:$0x1] }
  0x47   : > { %649 = vmatpush1.bf16.msra.mxu1 %v643_v51  ;;  %v1421_v1 = vand.u32 %v1404_v63, %v2605_v17  ;;  %v2677_v22 = vcombine.low %v2602_v16, %v2602_v16  ;;  %v1233_v24 = vrot.slane %v2662_v10, 1  ;;  %v1234_v25 = vrot.slane %v569_v11, 1  ;;  %v2682_v26 = vld [vmem:[%s2615_s16 + $0x140] sm:$0xff]  ;;  %v2693_v31 = vld [vmem:[%s2615_s16 + $0x150] sm:$0xff] }
  0x48   : > { %737 = vmatprep.subr.bf16.mxu1 %v735_v57  ;;  %v1303_v61 = vand.u32 %v1281_v58, %v2605_v17  ;;  %v869_v23 = vrot.slane %v2075_v18, 3  ;;  %v602_v27 = vpack.c.bf16 %v2659_v7, %v2656_v6  ;;  %v1236_v16 = vrot.slane %v2667_v15, 1  ;;  %v2696_v34 = vld [vmem:[%s2615_s16 + $0xf0] sm:$0xff]  ;;  %v2699_v35 = vld [vmem:[%s2615_s16 + $0x100] sm:$0xff] }
  0x49   : > { %v1237_v28 = vrot.slane %v571_v19, 1  ;;  %v1525_v32 = vshrl.u32 %v2097_v59, 16  ;;  %v1528_v33 = vshll.u32 %v2097_v59, 16  ;;  %v1403_v36 = vrot.slane %v2677_v22, 1  ;;  %v2705_v40 = vld [vmem:[%s2615_s16 + $0x70] sm:$0xff]  ;;  %v2708_v43 = vld [vmem:[%s2615_s16 + $0x80] sm:$0xff] }
  0x4a   : > { %2066 = vmatmul.mubr.msk.bf16.vlgmr.msra.gmra.mrb[0].mxu1 %vm625_vm2, %v600_v54  ;;  %1309 = vmatpush1.bf16.msra.mxu0 %v1303_v61  ;;  %v886_v30 = vand.u32 %v869_v23, %v2605_v17  ;;  %v1239_v37 = vrot.slane %v2682_v26, 1  ;;  %v1107_v38 = vpack.c.bf16 %v591_v21, %v590_v20  ;;  %v1240_v39 = vrot.slane %v2689_v29, 1  ;;  %v2717_v51 = vld [vmem:[%s2615_s16 + $0x110] sm:$0xff]  ;;  %v2728_v58 = vld [vmem:[%s2615_s16 + $0x160] sm:$0xff] }
  0x4b   : > { %690 = vmatprep.mubr.bf16.mxu1 %v2362_v14  ;;  %738 = vmatpush1.bf16.msra.mxu1 %v733_v60  ;;  %v1527_v46 = vrot.slane %v1525_v32, 2  ;;  %v1530_v47 = vrot.slane %v1528_v33, 3  ;;  %v1242_v48 = vrot.slane %v2693_v31, 1  ;;  %v848_v49 = vrot.slane %v2705_v40, 1  ;;  %v2731_v59 = vld [vmem:[%s2615_s16 + $0x170] sm:$0xff]  ;;  %v2737_v63 = vld [vmem:[%s2615_s16 + $0x180] sm:$0xff] }
  0x4c   : > { %1423 = vmatprep.subr.bf16.mxu0 %v1421_v1  ;;  %888 = vmatprep.subr.bf16.mxu1 %v886_v30  ;;  %v1641_v50 = vrot.slane %v2708_v43, 1  ;;  %v603_v52 = vpack.c.bf16 %v2699_v35, %v2696_v34  ;;  %v849_v54 = vrot.slane %v556_v45, 1  ;;  %v993_v55 = vshll.u32 %v2589_v12, 16  ;;  %v2760_v23 = vld [vmem:[%s2615_s16] sm:$0xff] }
  0x4d   : > { %2087 = vmatmul.mubr.msk.bf16.gmra.mrb[4].mxu0 %vm625_vm2, %v1105_v62  ;;  %v1235_v56 = vsel %vm826_vm3, %v1233_v24, %v1234_v25  ;;  %v1238_v57 = vsel %vm826_vm3, %v1236_v16, %v1237_v28  ;;  %v984_v60 = vshrl.u32 %v2593_v13, 16  ;;  %v986_v61 = vshll.u32 %v2593_v13, 16  ;;  %v558_v62 = vld [vmem:[%s2615_s16 + $0x88] sm:$0x1]  ;;  %v2763_v24 = vld [vmem:[%s2615_s16 + $0x10] sm:$0xff] }
  0x4e   : > { %1180 = vmatprep.mubr.bf16.mxu0 %v2362_v14  ;;  %v1531_v1 = vor.u32 %v1530_v47, %v1527_v46  ;;  %v991_v3 = vshrl.u32 %v2589_v12, 16  ;;  %v995_v4 = vrot.slane %v993_v55, 1  ;;  %v977_v18 = vpack.c.bf16 %v2667_v15, %v2662_v10  ;;  %v579_v55 = vld [vmem:[%s2615_s16 + $0x178] sm:$0x1]  ;;  %v2326_v10 = vld [vmem:[%s3053_s3 + $0x10] sm:$0xff]  }
  0x4f   : > { %v988_v11 = vrot.slane %v986_v61, 1  ;;  %v1513_v13 = vpack.c.bf16 %v2656_v6, %v2646_v0  ;;  %v978_v19 = vpack.c.bf16 %v2693_v31, %v2682_v26  ;;  %v1265_v20 = vpack.c.bf16 %v1238_v57, %v1235_v56  ;;  %v2796_v57 = vld [vmem:[%s2615_s16 + $0x20] sm:$0xff]  ;;  %v2323_v6 = vld [vmem:[%s3053_s3 + $0x48] sm:$0xff]   ;;  %v2327_v15 = vld [vmem:[%s3053_s3 + $0x58] sm:$0xff]  }
  0x50   : > { %v1514_v21 = vpack.c.bf16 %v2696_v34, %v2659_v7  ;;  %v1418_v12 = vand.u32 %v1403_v36, %v2605_v17  ;;  %v1243_v25 = vrot.slane %v575_v53, 1  ;;  %v1548_v28 = vand.u32 %v1531_v1, %v2605_v17  ;;  %v577_v53 = vld [vmem:[%s2615_s16 + $0x168] sm:$0x1]  ;;  %v2322_v0 = vld [vmem:[%s3053_s3] sm:$0xff]   ;;  %v2325_v7 = vld [vmem:[%s3053_s3 + $0x50] sm:$0xff]  }
  0x51   : > { %v1642_v30 = vrot.slane %v558_v62, 1  ;;  %v996_v32 = vor.u32 %v995_v4, %v991_v3  ;;  %v596_v36 = vpack.c.bf16 %v2763_v24, %v2760_v23  ;;  %v1241_v46 = vsel %vm826_vm3, %v1239_v37, %v1240_v39  ;;  %v583_v3 = vld [vmem:[%s2615_s16 + $0x198] sm:$0x1]  ;;  %v2329_v31 = vld [vmem:[%s3053_s3 + $0x60] sm:$0xff]  }
  0x52   : > { %2067 = vmatmul.mubr.msk.bf16.gmra.mrb[4].mxu1 %vm625_vm2, %v601_v2  ;;  %v2074_v2 = vcombine.low %v2585_v9, %v2580_v8  ;;  %v979_v8 = vpack.c.bf16 %v2731_v59, %v2728_v58  ;;  %v1515_v9 = vpack.c.bf16 %v2717_v51, %v2699_v35  ;;  %v1244_v47 = vsel %vm826_vm3, %v1242_v48, %v1243_v25  ;;  %v2328_v26 = vld [vmem:[%s3053_s3 + $0x18] sm:$0xff]   ;;  %v2330_v34 = vld [vmem:[%s3053_s3 + $0x20] sm:$0xff]   ;;  %v2331_v35 = vld [vmem:[%s3053_s3 + $0x68] sm:$0xff]  }
  0x53   : > { %700 = vmatprep.mubr.bf16.mxu1 %v2362_v14  ;;  %v2780_v45 = vsel %vm826_vm3, %v1641_v50, %v1642_v30  ;;  %v1013_v50 = vand.u32 %v996_v32, %v2605_v17  ;;  %v1245_v37 = vrot.slane %v2728_v58, 1  ;;  %v1246_v39 = vrot.slane %v577_v53, 1  ;;  %v2334_v51 = vld [vmem:[%s3053_s3 + $0x30] sm:$0xff]   ;;  %v2335_v58 = vld [vmem:[%s3053_s3 + $0x78] sm:$0xff]  }
  0x54   : > { %v868_v29 = vrot.slane %v2074_v2, 3  ;;  %v1248_v48 = vrot.slane %v2731_v59, 1  ;;  %v1249_v56 = vrot.slane %v579_v55, 1  ;;  %v581_v2 = vld [vmem:[%s2615_s16 + $0x188] sm:$0x1]  ;;  %v2336_v59 = vld [vmem:[%s3053_s3 + $0x38] sm:$0xff]  }
  0x55   : > { %2088 = vmatmul.mubr.msk.bf16.gmra.mrb[8].mxu0 %vm625_vm2, %v1106_v5  ;;  %v2743_v5 = vld [vmem:[%s2615_s16 + $0x190] sm:$0xff]  ;;  %v1247_v62 = vsel %vm826_vm3, %v1245_v37, %v1246_v39  ;;  %v1252_v25 = vrot.slane %v581_v2, 1  ;;  %v544_v37 = vld [vmem:[%s2615_s16 + $0x18] sm:$0x1] }
  0x56   : > { %1190 = vmatprep.mubr.bf16.mxu0 %v2362_v14  ;;  %v980_v16 = vpack.c.bf16 %v2743_v5, %v2737_v63  ;;  %v1250_v1 = vsel %vm826_vm3, %v1248_v48, %v1249_v56  ;;  %v2835_v39 = vld [vmem:[%s3051_s1 + $0x18] sm:$0x33] }
  0x57   : > { %v1267_v4 = vpack.c.bf16 %v1250_v1, %v1247_v62  ;;  %v831_v1 = vrot.slane %v544_v37, 1  ;;  %v2107_v2 = vcombine.high %v2835_v39, %v2835_v39 }
  0x5a   : > { %2068 = vmatmul.mubr.msk.bf16.gmra.mrb[8].mxu1 %vm625_vm2, %v602_v27  ;;  %v2765_v27 = vor.u32 %v988_v11, %v984_v60  ;;  %v2799_v60 = vld [vmem:[%s2615_s16 + $0x30] sm:$0xff]  ;;  %v2811_v11 = vld [vmem:[%s2615_s16 + $0x40] sm:$0xff] }
  0x5b   : > { %710 = vmatprep.mubr.bf16.mxu1 %v2362_v14  ;;  %v597_v61 = vpack.c.bf16 %v2799_v60, %v2796_v57 }
  0x5c   : > { %v1010_v33 = vand.u32 %v2765_v27, %v2605_v17 }
  0x5d   : > { %2089 = vmatmul.mubr.msk.bf16.gmra.mrb[12].mxu0 %vm625_vm2, %v1107_v38  ;;  %v2777_v38 = vsel %vm826_vm3, %v848_v49, %v849_v54  ;;  %v883_v49 = vand.u32 %v868_v29, %v2605_v17  ;;  %v1266_v54 = vpack.c.bf16 %v1244_v47, %v1241_v46  ;;  %v1255_v29 = vrot.slane %v583_v3, 1 }
  0x5e   : > { %1340 = vmatprep.mubr.bf16.mxu0 %v2362_v14  ;;  %v1517_v46 = vshrl.u32 %v2677_v22, 16  ;;  %v1520_v47 = vshll.u32 %v2677_v22, 16  ;;  %v827_v22 = vrot.slane %v2760_v23, 1  ;;  %v1397_v3 = vpack.c.bf16 %v2796_v57, %v2763_v24 }
  0x60   : > { %v1519_v55 = vrot.slane %v1517_v46, 2 }
  0x62   : > { %2069 = vmatmul.mubr.msk.bf16.gmra.mrb[12].mxu1 %vm625_vm2, %v603_v52  ;;  %v1648_v52 = vpack.c.bf16 %v2780_v45, %v2777_v38 }
  0x63   : > { %769 = vmatprep.mubr.bf16.mxu1 %v2362_v14 }
  0x65   : > { %2092 = vmatmul.mubr.msk.bf16.vlgmr.msra.gmra.mrb[0].mxu0 %vm625_vm2, %v1265_v20  ;;  %v2814_v20 = vld [vmem:[%s2615_s16 + $0x50] sm:$0xff] }
  0x66   : > { %1424 = vmatpush1.bf16.msra.mxu0 %v1418_v12  ;;  %1350 = vmatprep.mubr.bf16.mxu0 %v2362_v14  ;;  %v1251_v12 = vrot.slane %v2737_v63, 1  ;;  %v598_v30 = vpack.c.bf16 %v2814_v20, %v2811_v11  ;;  %v842_v37 = vrot.slane %v2814_v20, 1 }
  0x67   : > { %1550 = vmatprep.subr.bf16.mxu0 %v1548_v28  ;;  %v1254_v28 = vrot.slane %v2743_v5, 1 }
  0x68   : > { %v1253_v32 = vsel %vm826_vm3, %v1251_v12, %v1252_v25  ;;  %v1670_v25 = vand.u32 %v2107_v2, %v2605_v17  ;;  %v1400_v2 = vpack.c.bf16 %v2708_v43, %v2705_v40  ;;  %v2333_v43 = vld [vmem:[%s3053_s3 + $0x70] sm:$0xff]  }
  0x6a   : > { %2070 = vmatmul.mubr.msk.bf16.vlgmr.msra.gmra.mrb[0].mxu1 %vm625_vm2, %v596_v36  ;;  %v1256_v36 = vsel %vm826_vm3, %v1254_v28, %v1255_v29  ;;  %v546_v28 = vld [vmem:[%s2615_s16 + $0x28] sm:$0x1]  ;;  %v548_v29 = vld [vmem:[%s2615_s16 + $0x38] sm:$0x1] }
  0x6b   : > { %779 = vmatprep.mubr.bf16.mxu1 %v2362_v14  ;;  %889 = vmatpush1.bf16.msra.mxu1 %v883_v49  ;;  %v1268_v53 = vpack.c.bf16 %v1256_v36, %v1253_v32  ;;  %v1522_v49 = vrot.slane %v1520_v47, 3  ;;  %v836_v32 = vrot.slane %v2799_v60, 1  ;;  %v834_v36 = vrot.slane %v546_v28, 1 }
  0x6c   : > { %1015 = vmatprep.subr.bf16.mxu1 %v1013_v50  ;;  %v553_v50 = vld [vmem:[%s2615_s16 + $0x60] sm:$0xff]  ;;  %v837_v46 = vrot.slane %v548_v29, 1  ;;  %v1398_v47 = vpack.c.bf16 %v2811_v11, %v2799_v60  ;;  %v839_v60 = vrot.slane %v2811_v11, 1 }
  0x6d   : > { %2093 = vmatmul.mubr.msk.bf16.gmra.mrb[4].mxu0 %vm625_vm2, %v1266_v54  ;;  %v542_v54 = vld [vmem:[%s2615_s16 + $0x8] sm:$0x1]  ;;  %v599_v48 = vpack.c.bf16 %v2705_v40, %v553_v50  ;;  %v1523_v56 = vor.u32 %v1522_v49, %v1519_v55  ;;  %v552_v49 = vld [vmem:[%s2615_s16 + $0x58] sm:$0x1]  ;;  %v845_v11 = vrot.slane %v553_v50, 1 }
  0x6e   : > { %1360 = vmatprep.mubr.bf16.mxu0 %v2362_v14  ;;  %v828_v62 = vrot.slane %v542_v54, 1  ;;  %v838_v55 = vsel %vm826_vm3, %v836_v32, %v837_v46  ;;  %v2332_v40 = vld [vmem:[%s3053_s3 + $0x28] sm:$0xff]  }
  0x6f   : > { %v1545_v23 = vand.u32 %v1523_v56, %v2605_v17  ;;  %v1399_v56 = vpack.c.bf16 %v553_v50, %v2814_v20 }
  0x72   : > { %2071 = vmatmul.mubr.msk.bf16.gmra.mrb[4].mxu1 %vm625_vm2, %v597_v61  ;;  %v830_v61 = vrot.slane %v2763_v24, 1 }
  0x73   : > { %789 = vmatprep.mubr.bf16.mxu1 %v2362_v14 }
  0x74   : > { %v2851_v12 = vsel %vm826_vm3, %v830_v61, %v831_v1  ;;  %v554_v61 = vld [vmem:[%s2615_s16 + $0x68] sm:$0x1] }
  0x75   : > { %2094 = vmatmul.mubr.msk.bf16.gmra.mrb[8].mxu0 %vm625_vm2, %v1267_v4  ;;  %v829_v4 = vsel %vm826_vm3, %v827_v22, %v828_v62  ;;  %v846_v1 = vrot.slane %v554_v61, 1 }
  0x76   : > { %1370 = vmatprep.mubr.bf16.mxu0 %v2362_v14  ;;  %v859_v24 = vpack.c.bf16 %v2851_v12, %v829_v4 }
  0x77   : > { %v847_v20 = vsel %vm826_vm3, %v845_v11, %v846_v1 }
  0x7a   : > { %2072 = vmatmul.mubr.msk.bf16.gmra.mrb[8].mxu1 %vm625_vm2, %v598_v30  ;;  %v833_v30 = vrot.slane %v2796_v57, 1  ;;  %v550_v57 = vld [vmem:[%s2615_s16 + $0x48] sm:$0x1] }
  0x7b   : > { %799 = vmatprep.mubr.bf16.mxu1 %v2362_v14  ;;  %v840_v22 = vrot.slane %v550_v57, 1 }
  0x7d   : > { %2095 = vmatmul.mubr.msk.bf16.gmra.mrb[12].mxu0 %vm625_vm2, %v1268_v53  ;;  %v835_v53 = vsel %vm826_vm3, %v833_v30, %v834_v36  ;;  %v841_v27 = vsel %vm826_vm3, %v839_v60, %v840_v22 }
  0x7e   : > { %1455 = vmatprep.mubr.bf16.mxu0 %v2362_v14  ;;  %v860_v54 = vpack.c.bf16 %v838_v55, %v835_v53  ;;  %v1646_v41 = vpack.c.bf16 %v841_v27, %v838_v55 }
  0x82   : > { %2073 = vmatmul.mubr.msk.bf16.gmra.mrb[12].mxu1 %vm625_vm2, %v599_v48  ;;  %v843_v48 = vrot.slane %v552_v49, 1 }
  0x83   : > { %920 = vmatprep.mubr.bf16.mxu1 %v2362_v14 }
  0x85   : > { %2098 = vmatmul.mubr.msk.bf16.vlgmr.msra.gmra.mrb[0].mxu0 %vm625_vm2, %v1397_v3  ;;  %v862_v3 = vpack.c.bf16 %v2777_v38, %v847_v20 }
  0x86   : > { %1551 = vmatpush1.bf16.msra.mxu0 %v1545_v23  ;;  %1465 = vmatprep.mubr.bf16.mxu0 %v2362_v14  ;;  %v2106_v23 = vcombine.low %v2835_v39, %v2835_v39 }
  0x87   : > { %1672 = vmatprep.subr.bf16.mxu0 %v1670_v25  ;;  %v1761_v25 = vld [vmem:[%s3052_s2] sm:$0x3] }
  0x88   : > { %v1667_v50 = vand.u32 %v2106_v23, %v2605_v17  ;;  %v1645_v17 = vpack.c.bf16 %v835_v53, %v2851_v12 }
  0x8a   : > { %2076 = vmatmul.mubr.msk.bf16.vlgmr.msra.gmra.mrb[0].mxu1 %vm625_vm2, %v859_v24 }
  0x8b   : > { %930 = vmatprep.mubr.bf16.mxu1 %v2362_v14  ;;  %1016 = vmatpush1.bf16.msra.mxu1 %v1010_v33  ;;  %v844_v33 = vsel %vm826_vm3, %v842_v37, %v843_v48 }
  0x8c   : > { %v861_v62 = vpack.c.bf16 %v844_v33, %v841_v27  ;;  %v1647_v42 = vpack.c.bf16 %v847_v20, %v844_v33 }
  0x8d   : > { %2099 = vmatmul.mubr.msk.bf16.gmra.mrb[4].mxu0 %vm625_vm2, %v1398_v47 }
  0x8e   : > { %1475 = vmatprep.mubr.bf16.mxu0 %v2362_v14 }
  0x92   : > { %2077 = vmatmul.mubr.msk.bf16.gmra.mrb[4].mxu1 %vm625_vm2, %v860_v54 }
  0x93   : > { %940 = vmatprep.mubr.bf16.mxu1 %v2362_v14 }
  0x95   : > { %2100 = vmatmul.mubr.msk.bf16.gmra.mrb[8].mxu0 %vm625_vm2, %v1399_v56 }
  0x96   : > { %1485 = vmatprep.mubr.bf16.mxu0 %v2362_v14 }
  0x9a   : > { %2078 = vmatmul.mubr.msk.bf16.gmra.mrb[8].mxu1 %vm625_vm2, %v861_v62 }
  0x9b   : > { %950 = vmatprep.mubr.bf16.mxu1 %v2362_v14 }
  0x9d   : > { %2101 = vmatmul.mubr.msk.bf16.gmra.mrb[12].mxu0 %vm625_vm2, %v1400_v2 }
  0x9e   : > { %1582 = vmatprep.mubr.bf16.mxu0 %v2362_v14 }
  0xa2   : > { %2079 = vmatmul.mubr.msk.bf16.gmra.mrb[12].mxu1 %vm625_vm2, %v862_v3 }
  0xa3   : > { %1047 = vmatprep.mubr.bf16.mxu1 %v2362_v14 }
  0xa5   : > { %2102 = vmatmul.mubr.msk.bf16.vlgmr.msra.gmra.mrb[0].mxu0 %vm625_vm2, %v1512_v44  ;;  %v2321_v44 = vld [vmem:[%s3053_s3 + $0x40] sm:$0xff]  }
  0xa6   : > { %1673 = vmatpush1.bf16.msra.mxu0 %v1667_v50  ;;  %1592 = vmatprep.mubr.bf16.mxu0 %v2362_v14 }
  0xa7   : > { %2130 = vmatprep.subr.bf16.mxu1 %v2321_v44 }
  0xaa   : > { %2082 = vmatmul.mubr.msk.bf16.vlgmr.msra.gmra.mrb[0].mxu1 %vm625_vm2, %v977_v18 }
  0xab   : > { %1057 = vmatprep.mubr.bf16.mxu1 %v2362_v14  ;;  %2131 = vmatpush3.bf16.msra.mxu1 %v2322_v0 }
  0xac   : > { %2132 = vmatprep.subr.bf16.mxu1 %v2323_v6 }
  0xad   : > { %2103 = vmatmul.mubr.msk.bf16.gmra.mrb[4].mxu0 %vm625_vm2, %v1513_v13 }
  0xae   : > { %1602 = vmatprep.mubr.bf16.mxu0 %v2362_v14 }
  0xb2   : > { %2083 = vmatmul.mubr.msk.bf16.gmra.mrb[4].mxu1 %vm625_vm2, %v978_v19 }
  0xb3   : > { %1067 = vmatprep.mubr.bf16.mxu1 %v2362_v14 }
  0xb5   : > { %2104 = vmatmul.mubr.msk.bf16.gmra.mrb[8].mxu0 %vm625_vm2, %v1514_v21 }
  0xb6   : > { %1612 = vmatprep.mubr.bf16.mxu0 %v2362_v14 }
  0xba   : > { %2084 = vmatmul.mubr.msk.bf16.gmra.mrb[8].mxu1 %vm625_vm2, %v979_v8 }
  0xbb   : > { %1077 = vmatprep.mubr.bf16.mxu1 %v2362_v14 }
  0xbd   : > { %2105 = vmatmul.mubr.msk.bf16.gmra.mrb[12].mxu0 %vm625_vm2, %v1515_v9 }
  0xbe   : > { %1704 = vmatprep.mubr.bf16.mxu0 %v2362_v14 }
  0xc2   : > { %2085 = vmatmul.mubr.msk.bf16.gmra.mrb[12].mxu1 %vm625_vm2, %v980_v16  ;;  %v1763_v16 = vlaneseq }
  0xc4   : > { %v1764_v39 = vshrl.u32 %v1763_v16, 7 }
  0xc5   : > { %2108 = vmatmul.mubr.msk.bf16.vlgmr.msra.gmra.mrb[0].mxu0 %vm625_vm2, %v1645_v17 }
  0xc6   : > { %1714 = vmatprep.mubr.bf16.mxu0 %v2362_v14  ;;  %v1765_v12 = vsub.s32 0, %v1764_v39  ;;  %v1769_v28 = vsub.s32 1, %v1764_v39 }
  0xc8   : > { %v3004_v32 = vrot.slane %v1761_v25, %v1765_v12  ;;  %v3008_v47 = vrot.slane %v1761_v25, %v1769_v28 }
  0xcd   : > { %2109 = vmatmul.mubr.msk.bf16.gmra.mrb[4].mxu0 %vm625_vm2, %v1646_v41 }
  0xce   : > { %1724 = vmatprep.mubr.bf16.mxu0 %v2362_v14 }
  0xd5   : > { %2110 = vmatmul.mubr.msk.bf16.gmra.mrb[8].mxu0 %vm625_vm2, %v1647_v42 }
  0xd6   : > { %1734 = vmatprep.mubr.bf16.mxu0 %v2362_v14  ;;  %v2324_v14 = vld [vmem:[%s3053_s3 + $0x8] sm:$0xff]  }
  0xd7   : > { %2133 = vmatpush3.bf16.msra.mxu1 %v2324_v14 }
  0xd8   : > { %2134 = vmatprep.subr.bf16.mxu1 %v2325_v7 }
  0xdb   : > { %2135 = vmatpush3.bf16.msra.mxu1 %v2326_v10 }
  0xdc   : > { %2136 = vmatprep.subr.bf16.mxu1 %v2327_v15 }
  0xdd   : > { %2111 = vmatmul.mubr.msk.bf16.gmra.mrb[12].mxu0 %vm625_vm2, %v1648_v52 }
  0xdf   : > { %2137 = vmatpush3.bf16.msra.mxu1 %v2328_v26 }
  0xe0   : > { %2138 = vmatprep.subr.bf16.mxu1 %v2329_v31 }
  0xe3   : > { %2139 = vmatpush3.bf16.msra.mxu1 %v2330_v34 }
  0xe4   : > { %2140 = vmatprep.subr.bf16.mxu1 %v2331_v35 }
  0xe7   : > { %2141 = vmatpush3.bf16.msra.mxu1 %v2332_v40 }
  0xe8   : > { %2142 = vmatprep.subr.bf16.mxu1 %v2333_v43 }
  0xeb   : > { %2143 = vmatpush3.bf16.msra.mxu1 %v2334_v51 }
  0xec   : > { %2144 = vmatprep.subr.bf16.mxu1 %v2335_v58 }
  0xef   : > { %2145 = vmatpush3.bf16.msra.mxu1 %v2336_v59 }
 0x17d   : > { %v1049_v63 = vpop.f32.mrb[0].mxu1 }
 0x17e   : > { %v1051_v5 = vpop.f32.mrb[1].mxu1 }
 0x17f   : > { %v1053_v18 = vpop.f32.mrb[2].mxu1 }
 0x180   : > { %v1055_v13 = vpop.f32.mrb[3].mxu1 }
 0x185   : > { %v1059_v19 = vpop.f32.mrb[4].mxu1 }
 0x186   : > { %v1061_v21 = vpop.f32.mrb[5].mxu1 }
 0x187   : > { %v1063_v8 = vpop.f32.mrb[6].mxu1 }
 0x188   : > { %v1065_v9 = vpop.f32.mrb[7].mxu1 }
 0x18d   : > { %v1069_v38 = vpop.f32.mrb[8].mxu1 }
 0x18e   : > { %v1071_v45 = vpop.f32.mrb[9].mxu1 }
 0x18f   : > { %v1073_v52 = vpop.f32.mrb[10].mxu1 }
 0x190   : > { %v1075_v4 = vpop.f32.mrb[11].mxu1 }
 0x195   : > { %v2998_v29 = vpop.f32.mrb[12].mxu1 }
 0x196   : > { %v3000_v24 = vpop.f32.mrb[13].mxu1 }
 0x197   : > { %v3002_v30 = vpop.f32.mrb[14].mxu1 }
 0x198   : > { %v3006_v36 = vpop.f32.mrb[15].mxu1  ;;  %v1706_v46 = vpop.f32.mrb[0].mxu0 }
 0x199   : > { %v2152_v53 = vadd.f32 %v1706_v46, %v1049_v63  ;;  %v1708_v55 = vpop.f32.mrb[1].mxu0 }
 0x19a   : > { %v2153_v57 = vadd.f32 %v1708_v55, %v1051_v5  ;;  %v1710_v49 = vpop.f32.mrb[2].mxu0 }
 0x19b   : > { %v1773_v54 = vadd.f32 %v2152_v53, %v3004_v32  ;;  %v2154_v60 = vadd.f32 %v1710_v49, %v1053_v18  ;;  %v1712_v37 = vpop.f32.mrb[3].mxu0 }
 0x19c   : > { %v1774_v22 = vadd.f32 %v2153_v57, %v3008_v47  ;;  %v2155_v48 = vadd.f32 %v1712_v37, %v1055_v13 }
 0x19d   : > { %v1775_v56 = vadd.f32 %v2154_v60, %v3004_v32  ;;  %v1789_v33 = vmax.f32 %v1773_v54, 0.0 }
 0x19e   : > { %v1776_v27 = vadd.f32 %v2155_v48, %v3008_v47  ;;  %v1790_v62 = vmax.f32 %v1774_v22, 0.0 }
 0x19f   : > { %v1791_v61 = vmax.f32 %v1775_v56, 0.0 }
 0x1a0   : > { %v1792_v11 = vmax.f32 %v1776_v27, 0.0  ;;  %v1716_v1 = vpop.f32.mrb[4].mxu0 }
 0x1a1   : > { %v1805_v2 = vadd.f32 %v1791_v61, %v1789_v33  ;;  %v2156_v20 = vadd.f32 %v1716_v1, %v1059_v19  ;;  %v1718_v3 = vpop.f32.mrb[5].mxu0 }
 0x1a2   : > { %v1818_v23 = vadd.f32 %v1792_v11, %v1790_v62  ;;  %v2157_v50 = vadd.f32 %v1718_v3, %v1061_v21  ;;  %v1720_v17 = vpop.f32.mrb[6].mxu0 }
 0x1a3   : > { %v1777_v41 = vadd.f32 %v2156_v20, %v3004_v32  ;;  %v2158_v42 = vadd.f32 %v1720_v17, %v1063_v8  ;;  %v1722_v44 = vpop.f32.mrb[7].mxu0 }
 0x1a4   : > { %v1778_v0 = vadd.f32 %v2157_v50, %v3008_v47  ;;  %v2159_v6 = vadd.f32 %v1722_v44, %v1065_v9 }
 0x1a5   : > { %v1793_v14 = vmax.f32 %v1777_v41, 0.0  ;;  %v1779_v7 = vadd.f32 %v2158_v42, %v3004_v32 }
 0x1a6   : > { %v1794_v10 = vmax.f32 %v1778_v0, 0.0  ;;  %v1780_v15 = vadd.f32 %v2159_v6, %v3008_v47 }
 0x1a7   : > { %v1806_v26 = vadd.f32 %v1805_v2, %v1793_v14  ;;  %v1795_v31 = vmax.f32 %v1779_v7, 0.0 }
 0x1a8   : > { %v1819_v34 = vadd.f32 %v1818_v23, %v1794_v10  ;;  %v1796_v35 = vmax.f32 %v1780_v15, 0.0  ;;  %v1726_v40 = vpop.f32.mrb[8].mxu0  ;;  %v1867_v15 = vld [vmem:[%s3054_s4] sm:$0x1] }
 0x1a9   : > { %v1807_v43 = vadd.f32 %v1806_v26, %v1795_v31  ;;  %v2160_v51 = vadd.f32 %v1726_v40, %v1069_v38  ;;  %v1728_v58 = vpop.f32.mrb[9].mxu0 }
 0x1aa   : > { %v1820_v59 = vadd.f32 %v1819_v34, %v1796_v35  ;;  %v2161_v63 = vadd.f32 %v1728_v58, %v1071_v45  ;;  %v1730_v5 = vpop.f32.mrb[10].mxu0 }
 0x1ab   : > { %v1781_v18 = vadd.f32 %v2160_v51, %v3004_v32  ;;  %v2162_v13 = vadd.f32 %v1730_v5, %v1073_v52  ;;  %v1732_v19 = vpop.f32.mrb[11].mxu0 }
 0x1ac   : > { %v1782_v21 = vadd.f32 %v2161_v63, %v3008_v47  ;;  %v2163_v8 = vadd.f32 %v1732_v19, %v1075_v4 }
 0x1ad   : > { %v1797_v9 = vmax.f32 %v1781_v18, 0.0  ;;  %v1783_v16 = vadd.f32 %v2162_v13, %v3004_v32 }
 0x1ae   : > { %v1798_v39 = vmax.f32 %v1782_v21, 0.0  ;;  %v1784_v12 = vadd.f32 %v2163_v8, %v3008_v47 }
 0x1af   : > { %v1808_v25 = vadd.f32 %v1807_v43, %v1797_v9  ;;  %v1799_v28 = vmax.f32 %v1783_v16, 0.0 }
 0x1b0   : > { %v1821_v38 = vadd.f32 %v1820_v59, %v1798_v39  ;;  %v1800_v46 = vmax.f32 %v1784_v12, 0.0  ;;  %v1736_v53 = vpop.f32.mrb[12].mxu0 }
 0x1b1   : > { %v1809_v45 = vadd.f32 %v1808_v25, %v1799_v28  ;;  %v2164_v55 = vadd.f32 %v1736_v53, %v2998_v29  ;;  %v1738_v57 = vpop.f32.mrb[13].mxu0 }
 0x1b2   : > { %v1822_v52 = vadd.f32 %v1821_v38, %v1800_v46  ;;  %v2165_v49 = vadd.f32 %v1738_v57, %v3000_v24  ;;  %v1740_v54 = vpop.f32.mrb[14].mxu0 }
 0x1b3   : > { %v1785_v4 = vadd.f32 %v2164_v55, %v3004_v32  ;;  %v2166_v60 = vadd.f32 %v1740_v54, %v3002_v30  ;;  %v1742_v37 = vpop.f32.mrb[15].mxu0 }
 0x1b4   : > { %v1786_v22 = vadd.f32 %v2165_v49, %v3008_v47  ;;  %v2167_v48 = vadd.f32 %v1742_v37, %v3006_v36 }
 0x1b5   : > { %v1801_v56 = vmax.f32 %v1785_v4, 0.0  ;;  %v1787_v27 = vadd.f32 %v2166_v60, %v3004_v32 }
 0x1b6   : > { %v1802_v33 = vmax.f32 %v1786_v22, 0.0  ;;  %v1788_v29 = vadd.f32 %v2167_v48, %v3008_v47 }
 0x1b7   : > { %v1810_v61 = vadd.f32 %v1809_v45, %v1801_v56  ;;  %v1803_v62 = vmax.f32 %v1787_v27, 0.0 }
 0x1b8   : > { %v1823_v11 = vadd.f32 %v1822_v52, %v1802_v33  ;;  %v1804_v24 = vmax.f32 %v1788_v29, 0.0 }
 0x1b9   : > { %v1811_v1 = vadd.f32 %v1810_v61, %v1803_v62 }
 0x1ba   : > { %v1824_v2 = vadd.f32 %v1823_v11, %v1804_v24 }
 0x1bb   : > { %v1812_v20 = vrot.slane %v1811_v1, 4 }
 0x1bc   : > { %v1825_v3 = vrot.slane %v1824_v2, 4 }
 0x1bd   : > { %v1813_v30 = vadd.f32 %v1812_v20, %v1811_v1 }
 0x1be   : > { %v1826_v23 = vadd.f32 %v1825_v3, %v1824_v2 }
 0x1bf   : > { %v1814_v50 = vrot.slane %v1813_v30, 2 }
 0x1c0   : > { %v1827_v36 = vrot.slane %v1826_v23, 2 }
 0x1c1   : > { %v1815_v17 = vadd.f32 %v1814_v50, %v1813_v30 }
 0x1c2   : > { %v1828_v41 = vadd.f32 %v1827_v36, %v1826_v23 }
 0x1c3   : > { %v1816_v32 = vrot.slane %v1815_v17, 1 }
 0x1c4   : > { %v1829_v42 = vrot.slane %v1828_v41, 1 }
 0x1c5   : > { %v1817_v44 = vadd.f32 %v1816_v32, %v1815_v17 }
 0x1c6   : > { %v1830_v47 = vadd.f32 %v1829_v42, %v1828_v41 }
 0x1c7   : > { %v1831_v0 = vmul.f32 0.015625, %v1817_v44 }
 0x1c8   : > { %v1832_v6 = vmul.f32 0.015625, %v1830_v47 }
 0x1c9   : > { %v1833_v7 = vpack.c.bf16 %v1831_v0, %v1831_v0 }
 0x1ca   : > { %v1834_v14 = vpack.c.bf16 %v1832_v6, %v1832_v6 }
 0x1cc   : > { %1996 = vmatprep.mubr.bf16.mxu1 %v1834_v14 }
 0x1cd   : > { %1997 = vmatmul.mubr.bf16.vlgmr.msra.gmra.mrb[16].mxu1 %v1833_v7 }
 0x2a0   : > { %v2146_v10 = vpop.f32.mrb[16].mxu1 }
 0x2a1   : > { %v2147_v26 = vpop.f32.mrb[17].mxu1 }
 0x2a2   : > { %v2148_v31 = vadd.f32 %v2147_v26, %v2146_v10  ;;  %v2149_v34 = vpop.f32.mrb[18].mxu1 }
 0x2a3   : > { %v2150_v35 = vpop.f32.mrb[19].mxu1 }
 0x2a4   : > { %v1999_v40 = vadd.f32 %v2148_v31, %v1867_v15 }
 0x2a6   : > { %2004 = vst [vmem:[%s539_s17] sm:$0x1] %v1999_v40 }
 0x2a7 PF: > { %p12_p9 = scmp.ge.s32.totalorder %s2410_s22, 4   ;;  %s3056_s18 = smov %s2355_s19 }
 0x2a8   : > { %s3057_s19 = smov %s2419_s25  ;;  %s3058_s20 = smov %s2410_s22 }
 0x2a9   :  { %14 = sbr.rel (!%p12_p9) target bundleno = 2 (0x2), region = 113 }

// kernel: image_caption_forward.3
= control target key start
LH: loop header
LB: loop body
LE: loop exit
PB: predicated region body
PF: predicated region fallthrough
CT: control target
= control target key end

     0   :  { %s2632_s21 = smov 0   ;;  %s2634_s22 = smov 0   ;;  %s3434_s0 = inlined_call_operand.vmem [shape: bf16[16,128], index: 0, kind: input, shape index: {}]   ;;  %s3435_s1 = inlined_call_operand.vmem [shape: bf16[128,512], index: 1, kind: input, shape index: {}]   ;;  %s3436_s2 = inlined_call_operand.vmem [shape: bf16[128,512], index: 2, kind: input, shape index: {}]   ;;  %s3437_s3 = inlined_call_operand.vmem [shape: f32[1,512], index: 3, kind: input, shape index: {}]   ;;  %s3438_s4 = inlined_call_operand.vmem [shape: bf16[128,256], index: 4, kind: input, shape index: {}]   ;;  %s3439_s5 = inlined_call_operand.vmem [shape: f32[1,256], index: 5, kind: input, shape index: {}]   ;;  %s3440_s6 = inlined_call_operand.vmem [shape: f32[16,256], index: 6, kind: output, shape index: {}]  }
   0x1   :  { %s2636_s23 = smov 0  }
   0x2 LB: > { %s2648_s24 = sadd.s32 4294967295, %s2592_s23   ;;  %s2651_s25 = sadd.s32 1, %s2592_s23   ;;  %s2592_s23 = sphi %s2636_s23, %s3444_s23   ;;  %s2588_s22 = sphi %s2634_s22, %s3443_s22   ;;  %s2584_s21 = sphi %s2632_s21, %s3442_s21  }
   0x3   : > { %s104_s26 = ssub.s32 %s2592_s23, %s2651_s25  ;;  %s107_s27 = sadd.s32 1, %s2588_s22 }
   0x4   : > { %p105_p0 = scmp.eq.s32.totalorder %s104_s26, 0  ;;  %p114_p1 = scmp.ne.s32.totalorder %s2588_s22, %s2584_s21 }
   0x5   : > { %p115_p2 = scmp.eq.s32.totalorder %s2592_s23, 0  ;;  %p170_p3 = scmp.eq.s32.totalorder %s2648_s24, 1 }
   0x6   : > { %s2661_s28 = scalar_select %p105_p0, %s2588_s22, %s107_s27  }
   0x7   : > { %p116_p4 = por %p115_p2, %p114_p1  ;;  %p2663_p5 = por %p170_p3, %p114_p1 }
   0x8   : > { %p2140_p6 = scmp.ge.s32.totalorder %s2592_s23, 2 }
   0xa   : > { %204 = sbr.rel (%p2140_p6) target bundleno = 31 (0x1f), region = 32 }
  0x11   : > { %207 = sbr.rel (!%p116_p4) target bundleno = 31 (0x1f), region = 36  ;;  %s209_s30 = sand.u32 (%p116_p4), 1, %s2588_s22  }
  0x12   : > { %s2142_s7 = sshll.u32 (%p116_p4), %s2592_s23, 2  ;;  %s2141_s8 = sshll.u32 (%p116_p4), %s209_s30, 6 }
  0x13   : > { %s2673_s11 = scalar_lea.vmem (%p116_p4), %s3438_s4, %s2142_s7  ;;  %s211_s12 = scalar_lea.vmem (%p116_p4), [#allocation4], %s2141_s8 }
  0x14   : > { %v229_v0 = vld [vmem:[%s2673_s11] sm:$0xf] (%p116_p4)  ;;  %v231_v1 = vld [vmem:[%s2673_s11 + $0x8] sm:$0xf] (%p116_p4)  ;;  %v233_v2 = vld [vmem:[%s2673_s11 + $0x10] sm:$0xf] (%p116_p4) }
  0x15   : > { %230 = vst [vmem:[%s211_s12] sm:$0xf] (%p116_p4), %v229_v0  ;;  %232 = vst [vmem:[%s211_s12 + $0x4] sm:$0xf] (%p116_p4), %v231_v1  ;;  %v235_v3 = vld [vmem:[%s2673_s11 + $0x18] sm:$0xf] (%p116_p4) }
  0x16   : > { %v237_v4 = vld [vmem:[%s2673_s11 + $0x20] sm:$0xf] (%p116_p4)  ;;  %234 = vst [vmem:[%s211_s12 + $0x8] sm:$0xf] (%p116_p4), %v233_v2  ;;  %236 = vst [vmem:[%s211_s12 + $0xc] sm:$0xf] (%p116_p4), %v235_v3 }
  0x17   : > { %238 = vst [vmem:[%s211_s12 + $0x10] sm:$0xf] (%p116_p4), %v237_v4  ;;  %v239_v5 = vld [vmem:[%s2673_s11 + $0x28] sm:$0xf] (%p116_p4)  ;;  %v241_v6 = vld [vmem:[%s2673_s11 + $0x30] sm:$0xf] (%p116_p4) }
  0x18   : > { %v243_v7 = vld [vmem:[%s2673_s11 + $0x38] sm:$0xf]  ;;  %240 = vst [vmem:[%s211_s12 + $0x14] sm:$0xf] %v239_v5  ;;  %242 = vst [vmem:[%s211_s12 + $0x18] sm:$0xf] %v241_v6 }
  0x19   : > { %244 = vst [vmem:[%s211_s12 + $0x1c] sm:$0xf] %v243_v7  ;;  %v245_v8 = vld [vmem:[%s2673_s11 + $0x40] sm:$0xf]  ;;  %v247_v9 = vld [vmem:[%s2673_s11 + $0x48] sm:$0xf] }
  0x1a   : > { %v249_v10 = vld [vmem:[%s2673_s11 + $0x50] sm:$0xf]  ;;  %246 = vst [vmem:[%s211_s12 + $0x20] sm:$0xf] %v245_v8  ;;  %248 = vst [vmem:[%s211_s12 + $0x24] sm:$0xf] %v247_v9 }
  0x1b   : > { %250 = vst [vmem:[%s211_s12 + $0x28] sm:$0xf] %v249_v10  ;;  %v251_v11 = vld [vmem:[%s2673_s11 + $0x58] sm:$0xf]  ;;  %v253_v12 = vld [vmem:[%s2673_s11 + $0x60] sm:$0xf] }
  0x1c   : > { %v255_v13 = vld [vmem:[%s2673_s11 + $0x68] sm:$0xf]  ;;  %252 = vst [vmem:[%s211_s12 + $0x2c] sm:$0xf] %v251_v11  ;;  %254 = vst [vmem:[%s211_s12 + $0x30] sm:$0xf] %v253_v12 }
  0x1d   : > { %256 = vst [vmem:[%s211_s12 + $0x34] sm:$0xf] %v255_v13  ;;  %v257_v14 = vld [vmem:[%s2673_s11 + $0x70] sm:$0xf]  ;;  %v259_v15 = vld [vmem:[%s2673_s11 + $0x78] sm:$0xf] }
  0x1e   : > { %258 = vst [vmem:[%s211_s12 + $0x38] sm:$0xf] %v257_v14  ;;  %260 = vst [vmem:[%s211_s12 + $0x3c] sm:$0xf] %v259_v15 }
  0x1f PF: > { %p2143_p7 = scmp.ge.s32.totalorder %s2592_s23, 1  ;;  %p320_p8 = scmp.lt.s32.totalorder %s2592_s23, 3 }
  0x21   : > { %p321_p9 = pnand %p2143_p7, %p320_p8 }
  0x22   : > { %s327_s13 = sand.u32 (!%p321_p9), 1, %s2584_s21   ;;  %p358_p10 = scmp.lt.s32.totalorder (!%p321_p9), %s2648_s24, 1 }
  0x23   : > { %324 = sbr.rel (%p321_p9) target bundleno = 2471 (0x9a7), region = 81  ;;  %s2144_s14 = sshll.u32 (!%p321_p9), %s327_s13, 6 }
  0x24   : > { %s2145_s15 = sshll.u32 (!%p321_p9), %s327_s13, 4  ;;  %s2702_s20 = scalar_lea.vmem (!%p321_p9), [#allocation4], %s2144_s14 }
  0x25   : > { %s2704_s26 = scalar_lea.vmem (!%p321_p9), [#allocation5], %s2145_s15  ;;  %p2146_p11 = scmp.ne.s32.totalorder (!%p321_p9), %s2648_s24, 0 }
  0x2a   : > { %s2696_s16 = scalar_select %p358_p10, %s2648_s24, 1 }
  0x2b   : > { %365 = sbr.rel (%p2146_p11) target bundleno = 2213 (0x8a5), region = 89  ;;  %v2305_v16 = vld [vmem:[%s3435_s1 + $0x4] ss:$16 sps:$4 sm:$0xff] (!%p2146_p11)   ;;  %v2307_v17 = vld [vmem:[%s3435_s1 + $0xc] ss:$16 sps:$4 sm:$0xff] (!%p2146_p11)   ;;  %v2594_v18 = vmov (!%p2146_p11), 0  }
  0x2c   : > { %s360_s19 = scalar_lea.vmem %s3439_s5, %s2696_s16  ;;  %620 = vmatprep.mubr.bf16.mxu0 (!%p2146_p11), %v2594_v18  ;;  %663 = vmatprep.mubr.bf16.mxu1 (!%p2146_p11), %v2594_v18  ;;  %v2309_v19 = vld [vmem:[%s3435_s1] ss:$16 sps:$4 sm:$0xff] (!%p2146_p11)   ;;  %v2310_v20 = vld [vmem:[%s3435_s1 + $0x8] ss:$16 sps:$4 sm:$0xff] (!%p2146_p11)   ;;  %v2311_v21 = vld [vmem:[%s3435_s1 + $0x24] ss:$16 sps:$4 sm:$0xff] (!%p2146_p11)  }
  0x2d   : > { %588 = vmatprep.subr.bf16.mxu0 (!%p2146_p11), %v2305_v16  ;;  %631 = vmatprep.subr.bf16.mxu1 (!%p2146_p11), %v2307_v17  ;;  %v2313_v22 = vld [vmem:[%s3435_s1 + $0x2c] ss:$16 sps:$4 sm:$0xff] (!%p2146_p11)   ;;  %v2315_v23 = vld [vmem:[%s3435_s1 + $0x20] ss:$16 sps:$4 sm:$0xff] (!%p2146_p11)   ;;  %v2316_v24 = vld [vmem:[%s3435_s1 + $0x28] ss:$16 sps:$4 sm:$0xff] (!%p2146_p11)  }
  0x2e   : > { %589 = vmatpush1.bf16.msra.mxu0 (!%p2146_p11), %v2309_v19  ;;  %632 = vmatpush1.bf16.msra.mxu1 (!%p2146_p11), %v2310_v20  ;;  %v2317_v25 = vld [vmem:[%s3435_s1 + $0x44] ss:$16 sps:$4 sm:$0xff] (!%p2146_p11)   ;;  %v2319_v26 = vld [vmem:[%s3435_s1 + $0x4c] ss:$16 sps:$4 sm:$0xff] (!%p2146_p11)   ;;  %v2321_v27 = vld [vmem:[%s3435_s1 + $0x40] ss:$16 sps:$4 sm:$0xff] (!%p2146_p11)   ;;  %v402_v19 = vlaneseq (!%p2146_p11) }
  0x2f   : > { %590 = vmatprep.subr.bf16.mxu0 (!%p2146_p11), %v2311_v21  ;;  %633 = vmatprep.subr.bf16.mxu1 (!%p2146_p11), %v2313_v22  ;;  %v2322_v28 = vld [vmem:[%s3435_s1 + $0x48] ss:$16 sps:$4 sm:$0xff] (!%p2146_p11)   ;;  %v2323_v29 = vld [vmem:[%s3435_s1 + $0x64] ss:$16 sps:$4 sm:$0xff] (!%p2146_p11)   ;;  %v2325_v30 = vld [vmem:[%s3435_s1 + $0x6c] ss:$16 sps:$4 sm:$0xff] (!%p2146_p11)  }
  0x30   : > { %v2327_v31 = vld [vmem:[%s3435_s1 + $0x60] ss:$16 sps:$4 sm:$0xff] (!%p2146_p11)   ;;  %v2328_v32 = vld [vmem:[%s3435_s1 + $0x68] ss:$16 sps:$4 sm:$0xff] (!%p2146_p11)   ;;  %v2329_v33 = vld [vmem:[%s3435_s1 + $0x84] ss:$16 sps:$4 sm:$0xff] (!%p2146_p11)  }
  0x31   : > { %v2331_v34 = vld [vmem:[%s3435_s1 + $0x8c] ss:$16 sps:$4 sm:$0xff] (!%p2146_p11)   ;;  %v2333_v35 = vld [vmem:[%s3435_s1 + $0x80] ss:$16 sps:$4 sm:$0xff] (!%p2146_p11)   ;;  %v2334_v36 = vld [vmem:[%s3435_s1 + $0x88] ss:$16 sps:$4 sm:$0xff] (!%p2146_p11)  }
  0x32   : > { %591 = vmatpush1.bf16.msra.mxu0 %v2315_v23  ;;  %634 = vmatpush1.bf16.msra.mxu1 %v2316_v24  ;;  %v2335_v37 = vld [vmem:[%s3435_s1 + $0xa4] ss:$16 sps:$4 sm:$0xff]   ;;  %v2337_v38 = vld [vmem:[%s3435_s1 + $0xac] ss:$16 sps:$4 sm:$0xff]   ;;  %v2339_v39 = vld [vmem:[%s3435_s1 + $0xa0] ss:$16 sps:$4 sm:$0xff]  }
  0x33   : > { %592 = vmatprep.subr.bf16.mxu0 %v2317_v25  ;;  %635 = vmatprep.subr.bf16.mxu1 %v2319_v26  ;;  %v2340_v40 = vld [vmem:[%s3435_s1 + $0xa8] ss:$16 sps:$4 sm:$0xff]   ;;  %v2341_v41 = vld [vmem:[%s3435_s1 + $0xc4] ss:$16 sps:$4 sm:$0xff]   ;;  %v2343_v42 = vld [vmem:[%s3435_s1 + $0xcc] ss:$16 sps:$4 sm:$0xff]  }
  0x34   : > { %v2345_v43 = vld [vmem:[%s3435_s1 + $0xc0] ss:$16 sps:$4 sm:$0xff]   ;;  %v2346_v44 = vld [vmem:[%s3435_s1 + $0xc8] ss:$16 sps:$4 sm:$0xff]   ;;  %v2347_v45 = vld [vmem:[%s3435_s1 + $0xe4] ss:$16 sps:$4 sm:$0xff]  }
  0x35   : > { %v2349_v46 = vld [vmem:[%s3435_s1 + $0xec] ss:$16 sps:$4 sm:$0xff]   ;;  %v2351_v47 = vld [vmem:[%s3435_s1 + $0xe0] ss:$16 sps:$4 sm:$0xff]   ;;  %v2352_v48 = vld [vmem:[%s3435_s1 + $0xe8] ss:$16 sps:$4 sm:$0xff]  }
  0x36   : > { %593 = vmatpush1.bf16.msra.mxu0 %v2321_v27  ;;  %636 = vmatpush1.bf16.msra.mxu1 %v2322_v28  ;;  %v2808_v49 = vld [vmem:[%s3436_s2 + $0x4] ss:$16 sps:$4 sm:$0xff]   ;;  %v2813_v50 = vld [vmem:[%s3436_s2 + $0xc] ss:$16 sps:$4 sm:$0xff]   ;;  %v2821_v52 = vld [vmem:[%s3436_s2] ss:$16 sps:$4 sm:$0xff]  }
  0x37   : > { %594 = vmatprep.subr.bf16.mxu0 %v2323_v29  ;;  %637 = vmatprep.subr.bf16.mxu1 %v2325_v30  ;;  %v2353_v51 = vld [vmem:[%s3434_s0] sm:$0xff]   ;;  %v2826_v53 = vld [vmem:[%s3436_s2 + $0x8] ss:$16 sps:$4 sm:$0xff]   ;;  %v2838_v55 = vld [vmem:[%s3436_s2 + $0x2c] ss:$16 sps:$4 sm:$0xff]   ;;  %v403_v20 = vshrl.u32 %v402_v19, 7 }
  0x38   : > { %v2831_v54 = vld [vmem:[%s3436_s2 + $0x24] ss:$16 sps:$4 sm:$0xff]   ;;  %v2843_v56 = vld [vmem:[%s3436_s2 + $0x20] ss:$16 sps:$4 sm:$0xff]   ;;  %v2850_v57 = vld [vmem:[%s3436_s2 + $0x28] ss:$16 sps:$4 sm:$0xff]  }
  0x39   : > { %v2857_v58 = vld [vmem:[%s3436_s2 + $0x44] ss:$16 sps:$4 sm:$0xff]   ;;  %v2862_v59 = vld [vmem:[%s3436_s2 + $0x4c] ss:$16 sps:$4 sm:$0xff]   ;;  %v2871_v60 = vld [vmem:[%s3436_s2 + $0x40] ss:$16 sps:$4 sm:$0xff]  }
  0x3a   : > { %595 = vmatpush1.bf16.msra.mxu0 %v2327_v31  ;;  %638 = vmatpush1.bf16.msra.mxu1 %v2328_v32  ;;  %v2876_v61 = vld [vmem:[%s3436_s2 + $0x48] ss:$16 sps:$4 sm:$0xff]   ;;  %v2881_v62 = vld [vmem:[%s3436_s2 + $0x64] ss:$16 sps:$4 sm:$0xff]   ;;  %v2888_v63 = vld [vmem:[%s3436_s2 + $0x6c] ss:$16 sps:$4 sm:$0xff]  }
  0x3b   : > { %596 = vmatprep.subr.bf16.mxu0 %v2329_v33  ;;  %639 = vmatprep.subr.bf16.mxu1 %v2331_v34  ;;  %v2895_v0 = vld [vmem:[%s3436_s2 + $0x60] ss:$16 sps:$4 sm:$0xff]   ;;  %v2900_v1 = vld [vmem:[%s3436_s2 + $0x68] ss:$16 sps:$4 sm:$0xff]   ;;  %v2907_v2 = vld [vmem:[%s3436_s2 + $0x84] ss:$16 sps:$4 sm:$0xff]  }
  0x3c   : > { %v2912_v3 = vld [vmem:[%s3436_s2 + $0x8c] ss:$16 sps:$4 sm:$0xff]   ;;  %v2919_v4 = vld [vmem:[%s3436_s2 + $0x80] ss:$16 sps:$4 sm:$0xff]   ;;  %v2924_v5 = vld [vmem:[%s3436_s2 + $0x88] ss:$16 sps:$4 sm:$0xff]  }
  0x3d   : > { %v2931_v6 = vld [vmem:[%s3436_s2 + $0xa4] ss:$16 sps:$4 sm:$0xff]   ;;  %v2936_v7 = vld [vmem:[%s3436_s2 + $0xac] ss:$16 sps:$4 sm:$0xff]   ;;  %v2943_v8 = vld [vmem:[%s3436_s2 + $0xa0] ss:$16 sps:$4 sm:$0xff]  }
  0x3e   : > { %597 = vmatpush1.bf16.msra.mxu0 %v2333_v35  ;;  %640 = vmatpush1.bf16.msra.mxu1 %v2334_v36  ;;  %v2948_v9 = vld [vmem:[%s3436_s2 + $0xa8] ss:$16 sps:$4 sm:$0xff]   ;;  %v2955_v10 = vld [vmem:[%s3436_s2 + $0xc4] ss:$16 sps:$4 sm:$0xff]   ;;  %v2960_v11 = vld [vmem:[%s3436_s2 + $0xcc] ss:$16 sps:$4 sm:$0xff]  }
  0x3f   : > { %598 = vmatprep.subr.bf16.mxu0 %v2335_v37  ;;  %641 = vmatprep.subr.bf16.mxu1 %v2337_v38  ;;  %v2967_v12 = vld [vmem:[%s3436_s2 + $0xc0] ss:$16 sps:$4 sm:$0xff]   ;;  %v2972_v13 = vld [vmem:[%s3436_s2 + $0xc8] ss:$16 sps:$4 sm:$0xff]   ;;  %v2979_v14 = vld [vmem:[%s3436_s2 + $0xe4] ss:$16 sps:$4 sm:$0xff]  }
  0x40   : > { %v2984_v15 = vld [vmem:[%s3436_s2 + $0xec] ss:$16 sps:$4 sm:$0xff]   ;;  %v2991_v16 = vld [vmem:[%s3436_s2 + $0xe0] ss:$16 sps:$4 sm:$0xff]   ;;  %v2996_v17 = vld [vmem:[%s3436_s2 + $0xe8] ss:$16 sps:$4 sm:$0xff]  }
  0x41   : > { %v404_v21 = vsub.s32 0, %v403_v20  ;;  %v412_v22 = vsub.s32 2, %v403_v20  ;;  %v400_v23 = vld [vmem:[%s3437_s3] sm:$0xf]  ;;  %v408_v24 = vsub.s32 1, %v403_v20  ;;  %v416_v25 = vsub.s32 3, %v403_v20 }
  0x42   : > { %599 = vmatpush1.bf16.msra.mxu0 %v2339_v39  ;;  %642 = vmatpush1.bf16.msra.mxu1 %v2340_v40  ;;  %vm1901_vm0 = vcmask 1041408   ;;  %vm1903_vm1 = vcmask 1043456   ;;  %vm1905_vm2 = vcmask 1045504  }
  0x43   : > { %600 = vmatprep.subr.bf16.mxu0 %v2341_v41  ;;  %643 = vmatprep.subr.bf16.mxu1 %v2343_v42  ;;  %v405_v26 = vrot.slane %v400_v23, %v404_v21  ;;  %v413_v27 = vrot.slane %v400_v23, %v412_v22  ;;  %v409_v28 = vrot.slane %v400_v23, %v408_v24 }
  0x44   : > { %v417_v29 = vrot.slane %v400_v23, %v416_v25 }
  0x46   : > { %601 = vmatpush1.bf16.msra.mxu0 %v2345_v43  ;;  %644 = vmatpush1.bf16.msra.mxu1 %v2346_v44 }
  0x47   : > { %602 = vmatprep.subr.bf16.mxu0 %v2347_v45  ;;  %645 = vmatprep.subr.bf16.mxu1 %v2349_v46 }
  0x4a   : > { %603 = vmatpush1.bf16.msra.mxu0 %v2351_v47  ;;  %646 = vmatpush1.bf16.msra.mxu1 %v2352_v48 }
  0x4b   : > { %878 = vmatprep.subr.bf16.mxu0 %v2808_v49  ;;  %919 = vmatprep.subr.bf16.mxu1 %v2813_v50 }
  0x4d   : > { %621 = vmatmul.mubr.bf16.vlgmr.msra.gmra.mrb[0].mxu0 %v2353_v51  ;;  %664 = vmatmul.mubr.bf16.vlgmr.msra.gmra.mrb[0].mxu1 %v2353_v51 }
  0x4e   : > { %879 = vmatpush1.bf16.msra.mxu0 %v2821_v52  ;;  %920 = vmatpush1.bf16.msra.mxu1 %v2826_v53 }
  0x4f   : > { %880 = vmatprep.subr.bf16.mxu0 %v2831_v54  ;;  %921 = vmatprep.subr.bf16.mxu1 %v2838_v55 }
  0x50   : > { %910 = vmatprep.mubr.bf16.mxu0 %v2594_v18  ;;  %951 = vmatprep.mubr.bf16.mxu1 %v2594_v18 }
  0x52   : > { %881 = vmatpush1.bf16.msra.mxu0 %v2843_v56  ;;  %922 = vmatpush1.bf16.msra.mxu1 %v2850_v57 }
  0x53   : > { %882 = vmatprep.subr.bf16.mxu0 %v2857_v58  ;;  %923 = vmatprep.subr.bf16.mxu1 %v2862_v59 }
  0x56   : > { %883 = vmatpush1.bf16.msra.mxu0 %v2871_v60  ;;  %924 = vmatpush1.bf16.msra.mxu1 %v2876_v61 }
  0x57   : > { %884 = vmatprep.subr.bf16.mxu0 %v2881_v62  ;;  %925 = vmatprep.subr.bf16.mxu1 %v2888_v63 }
  0x5a   : > { %885 = vmatpush1.bf16.msra.mxu0 %v2895_v0  ;;  %926 = vmatpush1.bf16.msra.mxu1 %v2900_v1 }
  0x5b   : > { %886 = vmatprep.subr.bf16.mxu0 %v2907_v2  ;;  %927 = vmatprep.subr.bf16.mxu1 %v2912_v3 }
  0x5e   : > { %887 = vmatpush1.bf16.msra.mxu0 %v2919_v4  ;;  %928 = vmatpush1.bf16.msra.mxu1 %v2924_v5 }
  0x5f   : > { %888 = vmatprep.subr.bf16.mxu0 %v2931_v6  ;;  %929 = vmatprep.subr.bf16.mxu1 %v2936_v7 }
  0x62   : > { %889 = vmatpush1.bf16.msra.mxu0 %v2943_v8  ;;  %930 = vmatpush1.bf16.msra.mxu1 %v2948_v9 }
  0x63   : > { %890 = vmatprep.subr.bf16.mxu0 %v2955_v10  ;;  %931 = vmatprep.subr.bf16.mxu1 %v2960_v11 }
  0x66   : > { %891 = vmatpush1.bf16.msra.mxu0 %v2967_v12  ;;  %932 = vmatpush1.bf16.msra.mxu1 %v2972_v13 }
  0x67   : > { %892 = vmatprep.subr.bf16.mxu0 %v2979_v14  ;;  %933 = vmatprep.subr.bf16.mxu1 %v2984_v15 }
  0x6a   : > { %893 = vmatpush1.bf16.msra.mxu0 %v2991_v16  ;;  %934 = vmatpush1.bf16.msra.mxu1 %v2996_v17 }
  0x6b   : > { %993 = vmatprep.subr.bf16.mxu0 %v2808_v49  ;;  %1034 = vmatprep.subr.bf16.mxu1 %v2813_v50 }
  0x6d   : > { %911 = vmatmul.mubr.bf16.vlgmr.msra.gmra.mrb[4].mxu0 %v2594_v18  ;;  %952 = vmatmul.mubr.bf16.vlgmr.msra.gmra.mrb[4].mxu1 %v2594_v18 }
  0x6e   : > { %994 = vmatpush1.bf16.msra.mxu0 %v2821_v52  ;;  %1035 = vmatpush1.bf16.msra.mxu1 %v2826_v53 }
  0x6f   : > { %995 = vmatprep.subr.bf16.mxu0 %v2831_v54  ;;  %1036 = vmatprep.subr.bf16.mxu1 %v2838_v55 }
  0x70   : > { %1025 = vmatprep.mubr.bf16.mxu0 %v2594_v18  ;;  %1066 = vmatprep.mubr.bf16.mxu1 %v2594_v18 }
  0x72   : > { %996 = vmatpush1.bf16.msra.mxu0 %v2843_v56  ;;  %1037 = vmatpush1.bf16.msra.mxu1 %v2850_v57 }
  0x73   : > { %997 = vmatprep.subr.bf16.mxu0 %v2857_v58  ;;  %1038 = vmatprep.subr.bf16.mxu1 %v2862_v59 }
  0x76   : > { %998 = vmatpush1.bf16.msra.mxu0 %v2871_v60  ;;  %1039 = vmatpush1.bf16.msra.mxu1 %v2876_v61 }
  0x77   : > { %999 = vmatprep.subr.bf16.mxu0 %v2881_v62  ;;  %1040 = vmatprep.subr.bf16.mxu1 %v2888_v63 }
  0x7a   : > { %1000 = vmatpush1.bf16.msra.mxu0 %v2895_v0  ;;  %1041 = vmatpush1.bf16.msra.mxu1 %v2900_v1 }
  0x7b   : > { %1001 = vmatprep.subr.bf16.mxu0 %v2907_v2  ;;  %1042 = vmatprep.subr.bf16.mxu1 %v2912_v3 }
  0x7e   : > { %1002 = vmatpush1.bf16.msra.mxu0 %v2919_v4  ;;  %1043 = vmatpush1.bf16.msra.mxu1 %v2924_v5 }
  0x7f   : > { %1003 = vmatprep.subr.bf16.mxu0 %v2931_v6  ;;  %1044 = vmatprep.subr.bf16.mxu1 %v2936_v7 }
  0x82   : > { %1004 = vmatpush1.bf16.msra.mxu0 %v2943_v8  ;;  %1045 = vmatpush1.bf16.msra.mxu1 %v2948_v9 }
  0x83   : > { %1005 = vmatprep.subr.bf16.mxu0 %v2955_v10  ;;  %1046 = vmatprep.subr.bf16.mxu1 %v2960_v11 }
  0x86   : > { %1006 = vmatpush1.bf16.msra.mxu0 %v2967_v12  ;;  %1047 = vmatpush1.bf16.msra.mxu1 %v2972_v13 }
  0x87   : > { %1007 = vmatprep.subr.bf16.mxu0 %v2979_v14  ;;  %1048 = vmatprep.subr.bf16.mxu1 %v2984_v15 }
  0x8a   : > { %1008 = vmatpush1.bf16.msra.mxu0 %v2991_v16  ;;  %1049 = vmatpush1.bf16.msra.mxu1 %v2996_v17 }
  0x8b   : > { %1126 = vmatprep.subr.bf16.mxu0 %v2808_v49  ;;  %1167 = vmatprep.subr.bf16.mxu1 %v2813_v50 }
 0x120   : > { %v622_v30 = vpop.f32.mrb[0].mxu0  ;;  %v665_v31 = vpop.f32.mrb[0].mxu1 }
 0x121   : > { %v623_v32 = vadd.f32 %v622_v30, %v405_v26  ;;  %v624_v33 = vpop.f32.mrb[1].mxu0  ;;  %v666_v34 = vadd.f32 %v665_v31, %v413_v27  ;;  %v667_v35 = vpop.f32.mrb[1].mxu1 }
 0x122   : > { %v625_v36 = vadd.f32 %v624_v33, %v409_v28  ;;  %v626_v37 = vpop.f32.mrb[2].mxu0  ;;  %v668_v38 = vadd.f32 %v667_v35, %v417_v29  ;;  %v669_v39 = vpop.f32.mrb[2].mxu1 }
 0x123   : > { %674 = vst [vmem:[#allocation2] sm:$0xff] %v623_v32  ;;  %v627_v40 = vadd.f32 %v626_v37, %v405_v26  ;;  %v628_v41 = vpop.f32.mrb[3].mxu0  ;;  %676 = vst [vmem:[#allocation2 + $0x10] sm:$0xff] %v666_v34  ;;  %v670_v42 = vadd.f32 %v669_v39, %v413_v27  ;;  %v671_v43 = vpop.f32.mrb[3].mxu1 }
 0x124   : > { %675 = vst [vmem:[#allocation2 + $0x8] sm:$0xff] %v625_v36  ;;  %v629_v44 = vadd.f32 %v628_v41, %v409_v28  ;;  %677 = vst [vmem:[#allocation2 + $0x18] sm:$0xff] %v668_v38  ;;  %v672_v45 = vadd.f32 %v671_v43, %v417_v29 }
 0x125   : > { %678 = vst [vmem:[#allocation2 + $0x20] sm:$0xff] %v627_v40  ;;  %680 = vst [vmem:[#allocation2 + $0x30] sm:$0xff] %v670_v42 }
 0x126   : > { %679 = vst [vmem:[#allocation2 + $0x28] sm:$0xff] %v629_v44  ;;  %681 = vst [vmem:[#allocation2 + $0x38] sm:$0xff] %v672_v45 }
 0x12a   : > { %v714_v46 = vld [vmem:[#allocation2] sm:$0x3]  ;;  %v716_v31 = vld [vmem:[#allocation2 + $0x10] sm:$0x3] }
 0x12b   : > { %v715_v19 = vld [vmem:[#allocation2 + $0x8] sm:$0x3]  ;;  %v717_v29 = vld [vmem:[#allocation2 + $0x18] sm:$0x3] }
 0x140   : > { %v912_v47 = vpop.f32.mrb[4].mxu0  ;;  %v953_v48 = vpop.f32.mrb[4].mxu1 }
 0x141   : > { %v960_v51 = vadd.f32 %v912_v47, %v714_v46  ;;  %v914_v20 = vpop.f32.mrb[5].mxu0  ;;  %v955_v21 = vpop.f32.mrb[5].mxu1  ;;  %v962_v33 = vadd.f32 %v953_v48, %v716_v31 }
 0x142   : > { %v961_v22 = vadd.f32 %v914_v20, %v715_v19  ;;  %v916_v23 = vpop.f32.mrb[6].mxu0  ;;  %v957_v24 = vpop.f32.mrb[6].mxu1  ;;  %v963_v30 = vadd.f32 %v955_v21, %v717_v29  ;;  %v990_v29 = vld [vmem:[#allocation2 + $0x8] sm:$0xc] }
 0x143   : > { %v2212_v25 = vmul.f32 -1.442695, %v960_v51  ;;  %v917_v26 = vpop.f32.mrb[7].mxu0  ;;  %v958_v27 = vpop.f32.mrb[7].mxu1  ;;  %v989_v24 = vld [vmem:[#allocation2] sm:$0xc] }
 0x144   : > { %v2213_v28 = vmul.f32 -1.442695, %v961_v22  ;;  %v2214_v32 = vmul.f32 -1.442695, %v963_v30 }
 0x145   : > { %2402 = vpow2.f32 %v2212_v25 }
 0x146   : > { %2404 = vpow2.f32 %v2213_v28 }
 0x147   : > { %2406 = vpow2.f32 %v2214_v32 }
 0x148   : > { %2408 = vtanh.f32 %v962_v33 }
 0x14f   : > { %v2403_v34 = vpop.eup %2402 }
 0x150   : > { %v2405_v35 = vpop.eup %2404  ;;  %v967_v36 = vadd.f32 1.0, %v2403_v34 }
 0x151   : > { %v973_v37 = vadd.f32 1.0, %v2405_v35  ;;  %v2407_v38 = vpop.eup %2406 }
 0x152   : > { %2410 = vrcp.f32 %v967_v36  ;;  %v2409_v39 = vpop.eup %2408  ;;  %v980_v43 = vadd.f32 1.0, %v2407_v38  ;;  %v992_v36 = vld [vmem:[#allocation2 + $0x18] sm:$0xc] }
 0x153   : > { %2412 = vrcp.f32 %v973_v37 }
 0x154   : > { %2414 = vrcp.f32 %v980_v43 }
 0x15c   : > { %v2411_v40 = vpop.eup %2410 }
 0x15d   : > { %v2413_v41 = vpop.eup %2412  ;;  %v984_v42 = vmul.f32 %v2411_v40, %v2409_v39  ;;  %v991_v39 = vld [vmem:[#allocation2 + $0x10] sm:$0xc] }
 0x15e   : > { %v983_v44 = vmul.f32 0.0, %v2413_v41  ;;  %v2415_v46 = vpop.eup %2414 }
 0x160   : > { %v3043_v45 = vadd.f32 %v984_v42, %v983_v44 }
 0x162   : > { %2416 = vtanh.f32 %v3043_v45 }
 0x16c   : > { %v2417_v47 = vpop.eup %2416 }
 0x16d   : > { %v3046_v48 = vmul.f32 %v2417_v47, %v2415_v46 }
 0x16f   : > { %v988_v51 = vpack.c.bf16 %v3046_v48, %v3046_v48 }
 0x171   : > { %1026 = vmatmul.mubr.bf16.vlgmr.msra.gmra.mrb[8].mxu0 %v988_v51  ;;  %1067 = vmatmul.mubr.bf16.vlgmr.msra.gmra.mrb[8].mxu1 %v988_v51 }
 0x172   : > { %1127 = vmatpush1.bf16.msra.mxu0 %v2821_v52  ;;  %1168 = vmatpush1.bf16.msra.mxu1 %v2826_v53 }
 0x173   : > { %1128 = vmatprep.subr.bf16.mxu0 %v2831_v54  ;;  %1169 = vmatprep.subr.bf16.mxu1 %v2838_v55 }
 0x174   : > { %1158 = vmatprep.mubr.bf16.mxu0 %v2594_v18  ;;  %1199 = vmatprep.mubr.bf16.mxu1 %v2594_v18 }
 0x176   : > { %1129 = vmatpush1.bf16.msra.mxu0 %v2843_v56  ;;  %1170 = vmatpush1.bf16.msra.mxu1 %v2850_v57 }
 0x177   : > { %1130 = vmatprep.subr.bf16.mxu0 %v2857_v58  ;;  %1171 = vmatprep.subr.bf16.mxu1 %v2862_v59 }
 0x17a   : > { %1131 = vmatpush1.bf16.msra.mxu0 %v2871_v60  ;;  %1172 = vmatpush1.bf16.msra.mxu1 %v2876_v61 }
 0x17b   : > { %1132 = vmatprep.subr.bf16.mxu0 %v2881_v62  ;;  %1173 = vmatprep.subr.bf16.mxu1 %v2888_v63 }
 0x17e   : > { %1133 = vmatpush1.bf16.msra.mxu0 %v2895_v0  ;;  %1174 = vmatpush1.bf16.msra.mxu1 %v2900_v1 }
 0x17f   : > { %1134 = vmatprep.subr.bf16.mxu0 %v2907_v2  ;;  %1175 = vmatprep.subr.bf16.mxu1 %v2912_v3 }
 0x182   : > { %1135 = vmatpush1.bf16.msra.mxu0 %v2919_v4  ;;  %1176 = vmatpush1.bf16.msra.mxu1 %v2924_v5 }
 0x183   : > { %1136 = vmatprep.subr.bf16.mxu0 %v2931_v6  ;;  %1177 = vmatprep.subr.bf16.mxu1 %v2936_v7 }
 0x186   : > { %1137 = vmatpush1.bf16.msra.mxu0 %v2943_v8  ;;  %1178 = vmatpush1.bf16.msra.mxu1 %v2948_v9 }
 0x187   : > { %1138 = vmatprep.subr.bf16.mxu0 %v2955_v10  ;;  %1179 = vmatprep.subr.bf16.mxu1 %v2960_v11 }
 0x18a   : > { %1139 = vmatpush1.bf16.msra.mxu0 %v2967_v12  ;;  %1180 = vmatpush1.bf16.msra.mxu1 %v2972_v13 }
 0x18b   : > { %1140 = vmatprep.subr.bf16.mxu0 %v2979_v14  ;;  %1181 = vmatprep.subr.bf16.mxu1 %v2984_v15 }
 0x18e   : > { %1141 = vmatpush1.bf16.msra.mxu0 %v2991_v16  ;;  %1182 = vmatpush1.bf16.msra.mxu1 %v2996_v17 }
 0x18f   : > { %1259 = vmatprep.subr.bf16.mxu0 %v2808_v49  ;;  %1300 = vmatprep.subr.bf16.mxu1 %v2813_v50 }
 0x244   : > { %v1027_v19 = vpop.f32.mrb[8].mxu0  ;;  %v1068_v20 = vpop.f32.mrb[8].mxu1 }
 0x245   : > { %v1079_v21 = vrot.slane %v1027_v19, 6  ;;  %v1029_v22 = vpop.f32.mrb[9].mxu0  ;;  %v1070_v23 = vpop.f32.mrb[9].mxu1  ;;  %v1081_v38 = vrot.slane %v1068_v20, 6 }
 0x246   : > { %v1080_v25 = vrot.slane %v1029_v22, 6  ;;  %v1031_v26 = vpop.f32.mrb[10].mxu0  ;;  %v1072_v27 = vpop.f32.mrb[10].mxu1  ;;  %v1082_v35 = vrot.slane %v1070_v23, 6 }
 0x247   : > { %v1087_v28 = vadd.f32 %v1079_v21, %v989_v24  ;;  %v1032_v30 = vpop.f32.mrb[11].mxu0  ;;  %v1073_v31 = vpop.f32.mrb[11].mxu1  ;;  %v1089_v41 = vadd.f32 %v1081_v38, %v991_v39  ;;  %v1111_v21 = vrot.slane %v3043_v45, 6 }
 0x248   : > { %v1088_v32 = vadd.f32 %v1080_v25, %v990_v29  ;;  %v1090_v37 = vadd.f32 %v1082_v35, %v992_v36  ;;  %v1119_v35 = vld [vmem:[#allocation2] sm:$0x30] }
 0x249   : > { %v2215_v33 = vmul.f32 -1.442695, %v1087_v28 }
 0x24a   : > { %v2216_v34 = vmul.f32 -1.442695, %v1088_v32  ;;  %v2217_v40 = vmul.f32 -1.442695, %v1090_v37 }
 0x24b   : > { %2418 = vpow2.f32 %v2215_v33 }
 0x24c   : > { %2420 = vpow2.f32 %v2216_v34 }
 0x24d   : > { %2422 = vpow2.f32 %v2217_v40  ;;  %v1120_v40 = vld [vmem:[#allocation2 + $0x8] sm:$0x30] }
 0x24e   : > { %2424 = vtanh.f32 %v1089_v41 }
 0x255   : > { %v2419_v42 = vpop.eup %2418 }
 0x256   : > { %v2421_v43 = vpop.eup %2420  ;;  %v1094_v44 = vadd.f32 1.0, %v2419_v42 }
 0x257   : > { %v1100_v46 = vadd.f32 1.0, %v2421_v43  ;;  %v2423_v47 = vpop.eup %2422 }
 0x258   : > { %2426 = vrcp.f32 %v1094_v44  ;;  %v2425_v51 = vpop.eup %2424  ;;  %v1107_v24 = vadd.f32 1.0, %v2423_v47 }
 0x259   : > { %2428 = vrcp.f32 %v1100_v46 }
 0x25a   : > { %2430 = vrcp.f32 %v1107_v24 }
 0x262   : > { %v2427_v19 = vpop.eup %2426 }
 0x263   : > { %v2429_v22 = vpop.eup %2428  ;;  %v1114_v23 = vmul.f32 %v2427_v19, %v2425_v51  ;;  %v1122_v51 = vld [vmem:[#allocation2 + $0x18] sm:$0x30] }
 0x264   : > { %v1113_v20 = vmul.f32 %v2429_v22, %v1111_v21  ;;  %v2431_v26 = vpop.eup %2430  ;;  %v1121_v22 = vld [vmem:[#allocation2 + $0x10] sm:$0x30] }
 0x266   : > { %v3085_v25 = vadd.f32 %v1114_v23, %v1113_v20 }
 0x268   : > { %2432 = vtanh.f32 %v3085_v25 }
 0x272   : > { %v2433_v27 = vpop.eup %2432 }
 0x273   : > { %v3088_v28 = vmul.f32 %v2433_v27, %v2431_v26 }
 0x275   : > { %v1118_v29 = vpack.c.bf16 %v3088_v28, %v3088_v28 }
 0x277   : > { %v1124_v30 = vrot.slane %v1118_v29, 1 }
 0x279   : > { %1159 = vmatmul.mubr.bf16.vlgmr.msra.gmra.mrb[12].mxu0 %v1124_v30  ;;  %1200 = vmatmul.mubr.bf16.vlgmr.msra.gmra.mrb[12].mxu1 %v1124_v30 }
 0x27a   : > { %1260 = vmatpush1.bf16.msra.mxu0 %v2821_v52  ;;  %1301 = vmatpush1.bf16.msra.mxu1 %v2826_v53 }
 0x27b   : > { %1261 = vmatprep.subr.bf16.mxu0 %v2831_v54  ;;  %1302 = vmatprep.subr.bf16.mxu1 %v2838_v55 }
 0x27c   : > { %1291 = vmatprep.mubr.bf16.mxu0 %v2594_v18  ;;  %1332 = vmatprep.mubr.bf16.mxu1 %v2594_v18 }
 0x27e   : > { %1262 = vmatpush1.bf16.msra.mxu0 %v2843_v56  ;;  %1303 = vmatpush1.bf16.msra.mxu1 %v2850_v57 }
 0x27f   : > { %1263 = vmatprep.subr.bf16.mxu0 %v2857_v58  ;;  %1304 = vmatprep.subr.bf16.mxu1 %v2862_v59 }
 0x282   : > { %1264 = vmatpush1.bf16.msra.mxu0 %v2871_v60  ;;  %1305 = vmatpush1.bf16.msra.mxu1 %v2876_v61 }
 0x283   : > { %1265 = vmatprep.subr.bf16.mxu0 %v2881_v62  ;;  %1306 = vmatprep.subr.bf16.mxu1 %v2888_v63 }
 0x286   : > { %1266 = vmatpush1.bf16.msra.mxu0 %v2895_v0  ;;  %1307 = vmatpush1.bf16.msra.mxu1 %v2900_v1 }
 0x287   : > { %1267 = vmatprep.subr.bf16.mxu0 %v2907_v2  ;;  %1308 = vmatprep.subr.bf16.mxu1 %v2912_v3 }
 0x28a   : > { %1268 = vmatpush1.bf16.msra.mxu0 %v2919_v4  ;;  %1309 = vmatpush1.bf16.msra.mxu1 %v2924_v5 }
 0x28b   : > { %1269 = vmatprep.subr.bf16.mxu0 %v2931_v6  ;;  %1310 = vmatprep.subr.bf16.mxu1 %v2936_v7 }
 0x28e   : > { %1270 = vmatpush1.bf16.msra.mxu0 %v2943_v8  ;;  %1311 = vmatpush1.bf16.msra.mxu1 %v2948_v9 }
 0x28f   : > { %1271 = vmatprep.subr.bf16.mxu0 %v2955_v10  ;;  %1312 = vmatprep.subr.bf16.mxu1 %v2960_v11 }
 0x292   : > { %1272 = vmatpush1.bf16.msra.mxu0 %v2967_v12  ;;  %1313 = vmatpush1.bf16.msra.mxu1 %v2972_v13 }
 0x293   : > { %1273 = vmatprep.subr.bf16.mxu0 %v2979_v14  ;;  %1314 = vmatprep.subr.bf16.mxu1 %v2984_v15 }
 0x296   : > { %1274 = vmatpush1.bf16.msra.mxu0 %v2991_v16  ;;  %1315 = vmatpush1.bf16.msra.mxu1 %v2996_v17 }
 0x297   : > { %1392 = vmatprep.subr.bf16.mxu0 %v2808_v49  ;;  %1433 = vmatprep.subr.bf16.mxu1 %v2813_v50 }
 0x34c   : > { %v1160_v45 = vpop.f32.mrb[12].mxu0  ;;  %v1201_v31 = vpop.f32.mrb[12].mxu1 }
 0x34d   : > { %v1212_v32 = vrot.slane %v1160_v45, 4  ;;  %v1162_v33 = vpop.f32.mrb[13].mxu0  ;;  %v1203_v34 = vpop.f32.mrb[13].mxu1  ;;  %v1214_v21 = vrot.slane %v1201_v31, 4 }
 0x34e   : > { %v1213_v36 = vrot.slane %v1162_v33, 4  ;;  %v1164_v37 = vpop.f32.mrb[14].mxu0  ;;  %v1205_v38 = vpop.f32.mrb[14].mxu1  ;;  %v1215_v47 = vrot.slane %v1203_v34, 4  ;;  %v1244_v33 = vrot.slane %v3085_v25, 6 }
 0x34f   : > { %v1220_v39 = vadd.f32 %v1212_v32, %v1119_v35  ;;  %v1165_v41 = vpop.f32.mrb[15].mxu0  ;;  %v1206_v42 = vpop.f32.mrb[15].mxu1  ;;  %v1222_v24 = vadd.f32 %v1214_v21, %v1121_v22 }
 0x350   : > { %v1221_v43 = vadd.f32 %v1213_v36, %v1120_v40  ;;  %v1223_v19 = vadd.f32 %v1215_v47, %v1122_v51  ;;  %v1902_v41 = vsel %vm1901_vm0, %v3046_v48, %v3088_v28  ;;  %v1252_v51 = vld [vmem:[#allocation2] sm:$0xc0] }
 0x351   : > { %v2218_v44 = vmul.f32 -1.442695, %v1220_v39 }
 0x352   : > { %v2219_v46 = vmul.f32 -1.442695, %v1221_v43  ;;  %v2220_v23 = vmul.f32 -1.442695, %v1223_v19 }
 0x353   : > { %2434 = vpow2.f32 %v2218_v44 }
 0x354   : > { %2436 = vpow2.f32 %v2219_v46 }
 0x355   : > { %2438 = vpow2.f32 %v2220_v23 }
 0x356   : > { %2440 = vtanh.f32 %v1222_v24  ;;  %v1253_v24 = vld [vmem:[#allocation2 + $0x8] sm:$0xc0] }
 0x35d   : > { %v2435_v20 = vpop.eup %2434 }
 0x35e   : > { %v2437_v26 = vpop.eup %2436  ;;  %v1227_v27 = vadd.f32 1.0, %v2435_v20 }
 0x35f   : > { %v1233_v29 = vadd.f32 1.0, %v2437_v26  ;;  %v2439_v30 = vpop.eup %2438 }
 0x360   : > { %2442 = vrcp.f32 %v1227_v27  ;;  %v2441_v45 = vpop.eup %2440  ;;  %v1240_v36 = vadd.f32 1.0, %v2439_v30 }
 0x361   : > { %2444 = vrcp.f32 %v1233_v29 }
 0x362   : > { %2446 = vrcp.f32 %v1240_v36 }
 0x36a   : > { %v2443_v32 = vpop.eup %2442 }
 0x36b   : > { %v2445_v34 = vpop.eup %2444  ;;  %v1247_v35 = vmul.f32 %v2443_v32, %v2441_v45  ;;  %v1255_v32 = vld [vmem:[#allocation2 + $0x18] sm:$0xc0] }
 0x36c   : > { %v1246_v31 = vmul.f32 %v2445_v34, %v1244_v33  ;;  %v2447_v38 = vpop.eup %2446 }
 0x36e   : > { %v3127_v37 = vadd.f32 %v1247_v35, %v1246_v31  ;;  %v1254_v35 = vld [vmem:[#allocation2 + $0x10] sm:$0xc0] }
 0x370   : > { %2448 = vtanh.f32 %v3127_v37 }
 0x37a   : > { %v2449_v39 = vpop.eup %2448 }
 0x37b   : > { %v1250_v40 = vmul.f32 %v2449_v39, %v2447_v38 }
 0x37d   : > { %v1251_v42 = vpack.c.bf16 %v1250_v40, %v1250_v40  ;;  %v3134_v25 = vsel %vm1903_vm1, %v1902_v41, %v1250_v40 }
 0x37f   : > { %v1257_v43 = vrot.slane %v1251_v42, 2 }
 0x381   : > { %1292 = vmatmul.mubr.bf16.vlgmr.msra.gmra.mrb[16].mxu0 %v1257_v43  ;;  %1333 = vmatmul.mubr.bf16.vlgmr.msra.gmra.mrb[16].mxu1 %v1257_v43 }
 0x382   : > { %1393 = vmatpush1.bf16.msra.mxu0 %v2821_v52  ;;  %1434 = vmatpush1.bf16.msra.mxu1 %v2826_v53 }
 0x383   : > { %1394 = vmatprep.subr.bf16.mxu0 %v2831_v54  ;;  %1435 = vmatprep.subr.bf16.mxu1 %v2838_v55 }
 0x384   : > { %1424 = vmatprep.mubr.bf16.mxu0 %v2594_v18  ;;  %1465 = vmatprep.mubr.bf16.mxu1 %v2594_v18 }
 0x386   : > { %1395 = vmatpush1.bf16.msra.mxu0 %v2843_v56  ;;  %1436 = vmatpush1.bf16.msra.mxu1 %v2850_v57 }
 0x387   : > { %1396 = vmatprep.subr.bf16.mxu0 %v2857_v58  ;;  %1437 = vmatprep.subr.bf16.mxu1 %v2862_v59 }
 0x38a   : > { %1397 = vmatpush1.bf16.msra.mxu0 %v2871_v60  ;;  %1438 = vmatpush1.bf16.msra.mxu1 %v2876_v61 }
 0x38b   : > { %1398 = vmatprep.subr.bf16.mxu0 %v2881_v62  ;;  %1439 = vmatprep.subr.bf16.mxu1 %v2888_v63 }
 0x38e   : > { %1399 = vmatpush1.bf16.msra.mxu0 %v2895_v0  ;;  %1440 = vmatpush1.bf16.msra.mxu1 %v2900_v1 }
 0x38f   : > { %1400 = vmatprep.subr.bf16.mxu0 %v2907_v2  ;;  %1441 = vmatprep.subr.bf16.mxu1 %v2912_v3 }
 0x392   : > { %1401 = vmatpush1.bf16.msra.mxu0 %v2919_v4  ;;  %1442 = vmatpush1.bf16.msra.mxu1 %v2924_v5 }
 0x393   : > { %1402 = vmatprep.subr.bf16.mxu0 %v2931_v6  ;;  %1443 = vmatprep.subr.bf16.mxu1 %v2936_v7 }
 0x396   : > { %1403 = vmatpush1.bf16.msra.mxu0 %v2943_v8  ;;  %1444 = vmatpush1.bf16.msra.mxu1 %v2948_v9 }
 0x397   : > { %1404 = vmatprep.subr.bf16.mxu0 %v2955_v10  ;;  %1445 = vmatprep.subr.bf16.mxu1 %v2960_v11 }
 0x39a   : > { %1405 = vmatpush1.bf16.msra.mxu0 %v2967_v12  ;;  %1446 = vmatpush1.bf16.msra.mxu1 %v2972_v13 }
 0x39b   : > { %1406 = vmatprep.subr.bf16.mxu0 %v2979_v14  ;;  %1447 = vmatprep.subr.bf16.mxu1 %v2984_v15 }
 0x39e   : > { %1407 = vmatpush1.bf16.msra.mxu0 %v2991_v16  ;;  %1448 = vmatpush1.bf16.msra.mxu1 %v2996_v17 }
 0x39f   : > { %1510 = vmatprep.subr.bf16.mxu0 %v2808_v49  ;;  %1551 = vmatprep.subr.bf16.mxu1 %v2813_v50 }
 0x454   : > { %v1293_v48 = vpop.f32.mrb[16].mxu0  ;;  %v1334_v28 = vpop.f32.mrb[16].mxu1 }
 0x455   : > { %v1345_v44 = vrot.slane %v1293_v48, 2  ;;  %v1295_v46 = vpop.f32.mrb[17].mxu0  ;;  %v1336_v47 = vpop.f32.mrb[17].mxu1  ;;  %v1347_v34 = vrot.slane %v1334_v28, 2 }
 0x456   : > { %v1346_v19 = vrot.slane %v1295_v46, 2  ;;  %v1297_v21 = vpop.f32.mrb[18].mxu0  ;;  %v1338_v22 = vpop.f32.mrb[18].mxu1  ;;  %v1348_v45 = vrot.slane %v1336_v47, 2 }
 0x457   : > { %v1353_v23 = vadd.f32 %v1345_v44, %v1252_v51  ;;  %v1298_v20 = vpop.f32.mrb[19].mxu0  ;;  %v1339_v26 = vpop.f32.mrb[19].mxu1  ;;  %v1355_v31 = vadd.f32 %v1347_v34, %v1254_v35  ;;  %v1377_v44 = vrot.slane %v3127_v37, 6 }
 0x458   : > { %v1354_v27 = vadd.f32 %v1346_v19, %v1253_v24  ;;  %v1356_v33 = vadd.f32 %v1348_v45, %v1255_v32 }
 0x459   : > { %v2221_v29 = vmul.f32 -1.442695, %v1353_v23 }
 0x45a   : > { %v2222_v30 = vmul.f32 -1.442695, %v1354_v27  ;;  %v2223_v36 = vmul.f32 -1.442695, %v1356_v33  ;;  %v1388_v27 = vld [vmem:[#allocation2 + $0x38] sm:$0x3] }
 0x45b   : > { %2450 = vpow2.f32 %v2221_v29  ;;  %v1387_v29 = vld [vmem:[#allocation2 + $0x30] sm:$0x3] }
 0x45c   : > { %2452 = vpow2.f32 %v2222_v30 }
 0x45d   : > { %2454 = vpow2.f32 %v2223_v36 }
 0x45e   : > { %2456 = vtanh.f32 %v1355_v31 }
 0x465   : > { %v2451_v38 = vpop.eup %2450 }
 0x466   : > { %v2453_v39 = vpop.eup %2452  ;;  %v1360_v40 = vadd.f32 1.0, %v2451_v38 }
 0x467   : > { %v1366_v41 = vadd.f32 1.0, %v2453_v39  ;;  %v2455_v42 = vpop.eup %2454 }
 0x468   : > { %2458 = vrcp.f32 %v1360_v40  ;;  %v2457_v43 = vpop.eup %2456  ;;  %v1373_v51 = vadd.f32 1.0, %v2455_v42 }
 0x469   : > { %2460 = vrcp.f32 %v1366_v41 }
 0x46a   : > { %2462 = vrcp.f32 %v1373_v51  ;;  %v3223_v51 = vld [vmem:[%s3436_s2] ss:$16 sps:$4 sm:$0xff]  }
 0x472   : > { %v2459_v48 = vpop.eup %2458 }
 0x473   : > { %v2461_v46 = vpop.eup %2460  ;;  %v1380_v47 = vmul.f32 %v2459_v48, %v2457_v43 }
 0x474   : > { %v1379_v28 = vmul.f32 %v2461_v46, %v1377_v44  ;;  %v2463_v21 = vpop.eup %2462 }
 0x476   : > { %v3171_v19 = vadd.f32 %v1380_v47, %v1379_v28  ;;  %v3229_v28 = vld [vmem:[%s3436_s2 + $0x8] ss:$16 sps:$4 sm:$0xff]  }
 0x478   : > { %2464 = vtanh.f32 %v3171_v19  ;;  %v1498_v38 = vrot.slane %v3171_v19, 6  ;;  %v3235_v19 = vld [vmem:[%s3436_s2 + $0x24] ss:$16 sps:$4 sm:$0xff]  }
 0x482   : > { %v2465_v22 = vpop.eup %2464 }
 0x483   : > { %v1383_v23 = vmul.f32 %v2465_v22, %v2463_v21  ;;  %v3241_v21 = vld [vmem:[%s3436_s2 + $0x2c] ss:$16 sps:$4 sm:$0xff]   ;;  %v3249_v22 = vld [vmem:[%s3436_s2 + $0x20] ss:$16 sps:$4 sm:$0xff]  }
 0x485   : > { %v1384_v24 = vpack.c.bf16 %v1383_v23, %v1383_v23  ;;  %v3176_v20 = vsel %vm1905_vm2, %v3134_v25, %v1383_v23  ;;  %v3255_v23 = vld [vmem:[%s3436_s2 + $0x28] ss:$16 sps:$4 sm:$0xff]  }
 0x487   : > { %v1390_v26 = vrot.slane %v1384_v24, 3  ;;  %v3261_v24 = vld [vmem:[%s3436_s2 + $0x44] ss:$16 sps:$4 sm:$0xff]  }
 0x489   : > { %1425 = vmatmul.mubr.bf16.vlgmr.msra.gmra.mrb[20].mxu0 %v1390_v26  ;;  %1466 = vmatmul.mubr.bf16.vlgmr.msra.gmra.mrb[20].mxu1 %v1390_v26  ;;  %v3267_v26 = vld [vmem:[%s3436_s2 + $0x4c] ss:$16 sps:$4 sm:$0xff]  }
 0x48a   : > { %1511 = vmatpush1.bf16.msra.mxu0 %v2821_v52  ;;  %1552 = vmatpush1.bf16.msra.mxu1 %v2826_v53  ;;  %v1385_v52 = vld [vmem:[#allocation2 + $0x20] sm:$0x3] }
 0x48b   : > { %1512 = vmatprep.subr.bf16.mxu0 %v2831_v54  ;;  %1553 = vmatprep.subr.bf16.mxu1 %v2838_v55 }
 0x48c   : > { %1542 = vmatprep.mubr.bf16.mxu0 %v2594_v18  ;;  %1583 = vmatprep.mubr.bf16.mxu1 %v2594_v18 }
 0x48e   : > { %1513 = vmatpush1.bf16.msra.mxu0 %v2843_v56  ;;  %1554 = vmatpush1.bf16.msra.mxu1 %v2850_v57  ;;  %v1386_v56 = vld [vmem:[#allocation2 + $0x28] sm:$0x3] }
 0x48f   : > { %1514 = vmatprep.subr.bf16.mxu0 %v2857_v58  ;;  %1555 = vmatprep.subr.bf16.mxu1 %v2862_v59 }
 0x492   : > { %1515 = vmatpush1.bf16.msra.mxu0 %v2871_v60  ;;  %1556 = vmatpush1.bf16.msra.mxu1 %v2876_v61 }
 0x493   : > { %1516 = vmatprep.subr.bf16.mxu0 %v2881_v62  ;;  %1557 = vmatprep.subr.bf16.mxu1 %v2888_v63 }
 0x496   : > { %1517 = vmatpush1.bf16.msra.mxu0 %v2895_v0  ;;  %1558 = vmatpush1.bf16.msra.mxu1 %v2900_v1 }
 0x497   : > { %1518 = vmatprep.subr.bf16.mxu0 %v2907_v2  ;;  %1559 = vmatprep.subr.bf16.mxu1 %v2912_v3 }
 0x49a   : > { %1519 = vmatpush1.bf16.msra.mxu0 %v2919_v4  ;;  %1560 = vmatpush1.bf16.msra.mxu1 %v2924_v5 }
 0x49b   : > { %1520 = vmatprep.subr.bf16.mxu0 %v2931_v6  ;;  %1561 = vmatprep.subr.bf16.mxu1 %v2936_v7 }
 0x49e   : > { %1521 = vmatpush1.bf16.msra.mxu0 %v2943_v8  ;;  %1562 = vmatpush1.bf16.msra.mxu1 %v2948_v9 }
 0x49f   : > { %1522 = vmatprep.subr.bf16.mxu0 %v2955_v10  ;;  %1563 = vmatprep.subr.bf16.mxu1 %v2960_v11 }
 0x4a2   : > { %1523 = vmatpush1.bf16.msra.mxu0 %v2967_v12  ;;  %1564 = vmatpush1.bf16.msra.mxu1 %v2972_v13 }
 0x4a3   : > { %1524 = vmatprep.subr.bf16.mxu0 %v2979_v14  ;;  %1565 = vmatprep.subr.bf16.mxu1 %v2984_v15 }
 0x4a6   : > { %1525 = vmatpush1.bf16.msra.mxu0 %v2991_v16  ;;  %1566 = vmatpush1.bf16.msra.mxu1 %v2996_v17 }
 0x4a7   : > { %1643 = vmatprep.subr.bf16.mxu0 %v2808_v49  ;;  %1684 = vmatprep.subr.bf16.mxu1 %v2813_v50 }
 0x55c   : > { %v1426_v53 = vpop.f32.mrb[20].mxu0  ;;  %v1467_v54 = vpop.f32.mrb[20].mxu1 }
 0x55d   : > { %v1474_v55 = vadd.f32 %v1426_v53, %v1385_v52  ;;  %v1428_v57 = vpop.f32.mrb[21].mxu0  ;;  %v1469_v58 = vpop.f32.mrb[21].mxu1  ;;  %v1476_v30 = vadd.f32 %v1467_v54, %v1387_v29  ;;  %v3273_v52 = vld [vmem:[%s3436_s2 + $0x40] ss:$16 sps:$4 sm:$0xff]   ;;  %v3279_v53 = vld [vmem:[%s3436_s2 + $0x48] ss:$16 sps:$4 sm:$0xff]  }
 0x55e   : > { %v1475_v59 = vadd.f32 %v1428_v57, %v1386_v56  ;;  %v1430_v60 = vpop.f32.mrb[22].mxu0  ;;  %v1471_v61 = vpop.f32.mrb[22].mxu1  ;;  %v1477_v49 = vadd.f32 %v1469_v58, %v1388_v27  ;;  %v3285_v54 = vld [vmem:[%s3436_s2 + $0x64] ss:$16 sps:$4 sm:$0xff]   ;;  %v1509_v57 = vld [vmem:[#allocation2 + $0x38] sm:$0xc] }
 0x55f   : > { %v2224_v62 = vmul.f32 -1.442695, %v1474_v55  ;;  %v1431_v63 = vpop.f32.mrb[23].mxu0  ;;  %v1472_v37 = vpop.f32.mrb[23].mxu1  ;;  %v3291_v55 = vld [vmem:[%s3436_s2 + $0x6c] ss:$16 sps:$4 sm:$0xff]  }
 0x560   : > { %v2225_v25 = vmul.f32 -1.442695, %v1475_v59  ;;  %v2226_v50 = vmul.f32 -1.442695, %v1477_v49  ;;  %v1508_v60 = vld [vmem:[#allocation2 + $0x30] sm:$0xc] }
 0x561   : > { %2466 = vpow2.f32 %v2224_v62 }
 0x562   : > { %2468 = vpow2.f32 %v2225_v25 }
 0x563   : > { %2470 = vpow2.f32 %v2226_v50 }
 0x564   : > { %2472 = vtanh.f32 %v1476_v30 }
 0x56b   : > { %v2467_v45 = vpop.eup %2466 }
 0x56c   : > { %v2469_v32 = vpop.eup %2468  ;;  %v1481_v33 = vadd.f32 1.0, %v2467_v45 }
 0x56d   : > { %v1487_v34 = vadd.f32 1.0, %v2469_v32  ;;  %v2471_v35 = vpop.eup %2470 }
 0x56e   : > { %2474 = vrcp.f32 %v1481_v33  ;;  %v2473_v36 = vpop.eup %2472  ;;  %v1494_v41 = vadd.f32 1.0, %v2471_v35 }
 0x56f   : > { %2476 = vrcp.f32 %v1487_v34 }
 0x570   : > { %2478 = vrcp.f32 %v1494_v41  ;;  %v2545_v41 = vld [vmem:[%s3436_s2 + $0x68] ss:$16 sps:$4 sm:$0xff]  }
 0x578   : > { %v2475_v31 = vpop.eup %2474 }
 0x579   : > { %v2477_v39 = vpop.eup %2476  ;;  %v1501_v40 = vmul.f32 %v2475_v31, %v2473_v36 }
 0x57a   : > { %v1500_v42 = vmul.f32 %v2477_v39, %v1498_v38  ;;  %v2479_v48 = vpop.eup %2478 }
 0x57c   : > { %v3213_v43 = vadd.f32 %v1501_v40, %v1500_v42  ;;  %v2546_v42 = vld [vmem:[%s3436_s2 + $0x84] ss:$16 sps:$4 sm:$0xff]  }
 0x57e   : > { %2480 = vtanh.f32 %v3213_v43  ;;  %v1628_v30 = vrot.slane %v3213_v43, 6  ;;  %v2547_v43 = vld [vmem:[%s3436_s2 + $0x8c] ss:$16 sps:$4 sm:$0xff]  }
 0x588   : > { %v2481_v44 = vpop.eup %2480 }
 0x589   : > { %v3216_v46 = vmul.f32 %v2481_v44, %v2479_v48  ;;  %v2548_v48 = vld [vmem:[%s3436_s2 + $0x80] ss:$16 sps:$4 sm:$0xff]   ;;  %v2549_v44 = vld [vmem:[%s3436_s2 + $0x88] ss:$16 sps:$4 sm:$0xff]  }
 0x58b   : > { %v1505_v47 = vpack.c.bf16 %v3216_v46, %v3216_v46 }
 0x58d   : > { %1543 = vmatmul.mubr.bf16.vlgmr.msra.gmra.mrb[24].mxu0 %v1505_v47  ;;  %1584 = vmatmul.mubr.bf16.vlgmr.msra.gmra.mrb[24].mxu1 %v1505_v47  ;;  %v2550_v47 = vld [vmem:[%s3436_s2 + $0xa4] ss:$16 sps:$4 sm:$0xff]  }
 0x58e   : > { %1644 = vmatpush1.bf16.msra.mxu0 %v3223_v51  ;;  %1685 = vmatpush1.bf16.msra.mxu1 %v3229_v28 }
 0x58f   : > { %1645 = vmatprep.subr.bf16.mxu0 %v3235_v19  ;;  %1686 = vmatprep.subr.bf16.mxu1 %v3241_v21 }
 0x590   : > { %1675 = vmatprep.mubr.bf16.mxu0 %v2594_v18  ;;  %1716 = vmatprep.mubr.bf16.mxu1 %v2594_v18 }
 0x592   : > { %1646 = vmatpush1.bf16.msra.mxu0 %v3249_v22  ;;  %1687 = vmatpush1.bf16.msra.mxu1 %v3255_v23 }
 0x593   : > { %1647 = vmatprep.subr.bf16.mxu0 %v3261_v24  ;;  %1688 = vmatprep.subr.bf16.mxu1 %v3267_v26 }
 0x596   : > { %1648 = vmatpush1.bf16.msra.mxu0 %v3273_v52  ;;  %1689 = vmatpush1.bf16.msra.mxu1 %v3279_v53 }
 0x597   : > { %1649 = vmatprep.subr.bf16.mxu0 %v3285_v54  ;;  %1690 = vmatprep.subr.bf16.mxu1 %v3291_v55 }
 0x59a   : > { %1650 = vmatpush1.bf16.msra.mxu0 %v2895_v0  ;;  %1691 = vmatpush1.bf16.msra.mxu1 %v2900_v1  ;;  %v2542_v0 = vld [vmem:[%s3436_s2 + $0x4] ss:$16 sps:$4 sm:$0xff]   ;;  %v2543_v1 = vld [vmem:[%s3436_s2 + $0xc] ss:$16 sps:$4 sm:$0xff]  }
 0x59b   : > { %1651 = vmatprep.subr.bf16.mxu0 %v2907_v2  ;;  %1692 = vmatprep.subr.bf16.mxu1 %v2912_v3 }
 0x59e   : > { %1652 = vmatpush1.bf16.msra.mxu0 %v2919_v4  ;;  %1693 = vmatpush1.bf16.msra.mxu1 %v2924_v5 }
 0x59f   : > { %1653 = vmatprep.subr.bf16.mxu0 %v2931_v6  ;;  %1694 = vmatprep.subr.bf16.mxu1 %v2936_v7  ;;  %v1506_v7 = vld [vmem:[#allocation2 + $0x20] sm:$0xc] }
 0x5a2   : > { %1654 = vmatpush1.bf16.msra.mxu0 %v2943_v8  ;;  %1695 = vmatpush1.bf16.msra.mxu1 %v2948_v9 }
 0x5a3   : > { %1655 = vmatprep.subr.bf16.mxu0 %v2955_v10  ;;  %1696 = vmatprep.subr.bf16.mxu1 %v2960_v11 }
 0x5a6   : > { %1656 = vmatpush1.bf16.msra.mxu0 %v2967_v12  ;;  %1697 = vmatpush1.bf16.msra.mxu1 %v2972_v13  ;;  %v1507_v12 = vld [vmem:[#allocation2 + $0x28] sm:$0xc] }
 0x5a7   : > { %1657 = vmatprep.subr.bf16.mxu0 %v2979_v14  ;;  %1698 = vmatprep.subr.bf16.mxu1 %v2984_v15 }
 0x5aa   : > { %1658 = vmatpush1.bf16.msra.mxu0 %v2991_v16  ;;  %1699 = vmatpush1.bf16.msra.mxu1 %v2996_v17 }
 0x5ab   : > { %1776 = vmatprep.subr.bf16.mxu0 %v2542_v0  ;;  %1817 = vmatprep.subr.bf16.mxu1 %v2543_v1 }
 0x660   : > { %v1544_v2 = vpop.f32.mrb[24].mxu0  ;;  %v1585_v3 = vpop.f32.mrb[24].mxu1 }
 0x661   : > { %v1596_v4 = vrot.slane %v1544_v2, 6  ;;  %v1546_v5 = vpop.f32.mrb[25].mxu0  ;;  %v1587_v6 = vpop.f32.mrb[25].mxu1  ;;  %v1598_v59 = vrot.slane %v1585_v3, 6 }
 0x662   : > { %v1597_v8 = vrot.slane %v1546_v5, 6  ;;  %v1548_v9 = vpop.f32.mrb[26].mxu0  ;;  %v1589_v10 = vpop.f32.mrb[26].mxu1  ;;  %v1599_v56 = vrot.slane %v1587_v6, 6 }
 0x663   : > { %v1604_v11 = vadd.f32 %v1596_v4, %v1506_v7  ;;  %v1549_v13 = vpop.f32.mrb[27].mxu0  ;;  %v1590_v14 = vpop.f32.mrb[27].mxu1  ;;  %v1606_v62 = vadd.f32 %v1598_v59, %v1508_v60  ;;  %v1636_v4 = vld [vmem:[#allocation2 + $0x20] sm:$0x30]  ;;  %v1637_v9 = vld [vmem:[#allocation2 + $0x28] sm:$0x30] }
 0x664   : > { %v1605_v15 = vadd.f32 %v1597_v8, %v1507_v12  ;;  %v1607_v58 = vadd.f32 %v1599_v56, %v1509_v57  ;;  %v1638_v57 = vld [vmem:[#allocation2 + $0x30] sm:$0x30] }
 0x665   : > { %v2227_v16 = vmul.f32 -1.442695, %v1604_v11 }
 0x666   : > { %v2228_v17 = vmul.f32 -1.442695, %v1605_v15  ;;  %v2229_v61 = vmul.f32 -1.442695, %v1607_v58 }
 0x667   : > { %2482 = vpow2.f32 %v2227_v16  ;;  %v1639_v16 = vld [vmem:[#allocation2 + $0x38] sm:$0x30] }
 0x668   : > { %2484 = vpow2.f32 %v2228_v17 }
 0x669   : > { %2486 = vpow2.f32 %v2229_v61 }
 0x66a   : > { %2488 = vtanh.f32 %v1606_v62 }
 0x671   : > { %v2483_v63 = vpop.eup %2482 }
 0x672   : > { %v2485_v37 = vpop.eup %2484  ;;  %v1611_v25 = vadd.f32 1.0, %v2483_v63 }
 0x673   : > { %v1617_v27 = vadd.f32 1.0, %v2485_v37  ;;  %v2487_v49 = vpop.eup %2486 }
 0x674   : > { %2490 = vrcp.f32 %v1611_v25  ;;  %v2489_v29 = vpop.eup %2488  ;;  %v1624_v33 = vadd.f32 1.0, %v2487_v49 }
 0x675   : > { %2492 = vrcp.f32 %v1617_v27 }
 0x676   : > { %2494 = vrcp.f32 %v1624_v33 }
 0x67e   : > { %v2491_v50 = vpop.eup %2490 }
 0x67f   : > { %v2493_v45 = vpop.eup %2492  ;;  %v1631_v32 = vmul.f32 %v2491_v50, %v2489_v29 }
 0x680   : > { %v1630_v34 = vmul.f32 %v2493_v45, %v1628_v30  ;;  %v2495_v36 = vpop.eup %2494 }
 0x682   : > { %v3319_v35 = vadd.f32 %v1631_v32, %v1630_v34 }
 0x684   : > { %2496 = vtanh.f32 %v3319_v35  ;;  %v1761_v49 = vrot.slane %v3319_v35, 6 }
 0x68e   : > { %v2497_v31 = vpop.eup %2496 }
 0x68f   : > { %v3322_v38 = vmul.f32 %v2497_v31, %v2495_v36 }
 0x691   : > { %v1635_v39 = vpack.c.bf16 %v3322_v38, %v3322_v38  ;;  %v1907_v31 = vsel %vm1901_vm0, %v3216_v46, %v3322_v38 }
 0x693   : > { %v1641_v40 = vrot.slane %v1635_v39, 1 }
 0x695   : > { %1676 = vmatmul.mubr.bf16.vlgmr.msra.gmra.mrb[28].mxu0 %v1641_v40  ;;  %1717 = vmatmul.mubr.bf16.vlgmr.msra.gmra.mrb[28].mxu1 %v1641_v40 }
 0x696   : > { %1777 = vmatpush1.bf16.msra.mxu0 %v3223_v51  ;;  %1818 = vmatpush1.bf16.msra.mxu1 %v3229_v28  ;;  %v2551_v51 = vld [vmem:[%s3436_s2 + $0xac] ss:$16 sps:$4 sm:$0xff]   ;;  %v2552_v28 = vld [vmem:[%s3436_s2 + $0xa0] ss:$16 sps:$4 sm:$0xff]  }
 0x697   : > { %1778 = vmatprep.subr.bf16.mxu0 %v3235_v19  ;;  %1819 = vmatprep.subr.bf16.mxu1 %v3241_v21  ;;  %v2553_v19 = vld [vmem:[%s3436_s2 + $0xa8] ss:$16 sps:$4 sm:$0xff]   ;;  %v2554_v21 = vld [vmem:[%s3436_s2 + $0xc4] ss:$16 sps:$4 sm:$0xff]  }
 0x698   : > { %1808 = vmatprep.mubr.bf16.mxu0 %v2594_v18  ;;  %1849 = vmatprep.mubr.bf16.mxu1 %v2594_v18  ;;  %v2544_v18 = vld [vmem:[%s3436_s2 + $0x60] ss:$16 sps:$4 sm:$0xff]  }
 0x69a   : > { %1779 = vmatpush1.bf16.msra.mxu0 %v3249_v22  ;;  %1820 = vmatpush1.bf16.msra.mxu1 %v3255_v23  ;;  %v2555_v22 = vld [vmem:[%s3436_s2 + $0xcc] ss:$16 sps:$4 sm:$0xff]   ;;  %v2556_v23 = vld [vmem:[%s3436_s2 + $0xc0] ss:$16 sps:$4 sm:$0xff]  }
 0x69b   : > { %1780 = vmatprep.subr.bf16.mxu0 %v3261_v24  ;;  %1821 = vmatprep.subr.bf16.mxu1 %v3267_v26  ;;  %v2557_v24 = vld [vmem:[%s3436_s2 + $0xc8] ss:$16 sps:$4 sm:$0xff]   ;;  %v2558_v26 = vld [vmem:[%s3436_s2 + $0xe4] ss:$16 sps:$4 sm:$0xff]  }
 0x69e   : > { %1781 = vmatpush1.bf16.msra.mxu0 %v3273_v52  ;;  %1822 = vmatpush1.bf16.msra.mxu1 %v3279_v53  ;;  %v2559_v52 = vld [vmem:[%s3436_s2 + $0xec] ss:$16 sps:$4 sm:$0xff]   ;;  %v2560_v53 = vld [vmem:[%s3436_s2 + $0xe0] ss:$16 sps:$4 sm:$0xff]  }
 0x69f   : > { %1782 = vmatprep.subr.bf16.mxu0 %v3285_v54  ;;  %1823 = vmatprep.subr.bf16.mxu1 %v3291_v55  ;;  %v2561_v54 = vld [vmem:[%s3436_s2 + $0xe8] ss:$16 sps:$4 sm:$0xff]  }
 0x6a2   : > { %1783 = vmatpush1.bf16.msra.mxu0 %v2544_v18  ;;  %1824 = vmatpush1.bf16.msra.mxu1 %v2545_v41 }
 0x6a3   : > { %1784 = vmatprep.subr.bf16.mxu0 %v2546_v42  ;;  %1825 = vmatprep.subr.bf16.mxu1 %v2547_v43 }
 0x6a6   : > { %1785 = vmatpush1.bf16.msra.mxu0 %v2548_v48  ;;  %1826 = vmatpush1.bf16.msra.mxu1 %v2549_v44  ;;  %v1769_v44 = vld [vmem:[#allocation2 + $0x20] sm:$0xc0] }
 0x6a7   : > { %1786 = vmatprep.subr.bf16.mxu0 %v2550_v47  ;;  %1827 = vmatprep.subr.bf16.mxu1 %v2551_v51 }
 0x6aa   : > { %1787 = vmatpush1.bf16.msra.mxu0 %v2552_v28  ;;  %1828 = vmatpush1.bf16.msra.mxu1 %v2553_v19 }
 0x6ab   : > { %1788 = vmatprep.subr.bf16.mxu0 %v2554_v21  ;;  %1829 = vmatprep.subr.bf16.mxu1 %v2555_v22  ;;  %v1770_v21 = vld [vmem:[#allocation2 + $0x28] sm:$0xc0] }
 0x6ae   : > { %1789 = vmatpush1.bf16.msra.mxu0 %v2556_v23  ;;  %1830 = vmatpush1.bf16.msra.mxu1 %v2557_v24 }
 0x6af   : > { %1790 = vmatprep.subr.bf16.mxu0 %v2558_v26  ;;  %1831 = vmatprep.subr.bf16.mxu1 %v2559_v52  ;;  %v1772_v52 = vld [vmem:[#allocation2 + $0x38] sm:$0xc0] }
 0x6b2   : > { %1791 = vmatpush1.bf16.msra.mxu0 %v2560_v53  ;;  %1832 = vmatpush1.bf16.msra.mxu1 %v2561_v54 }
 0x768   : > { %v1677_v55 = vpop.f32.mrb[28].mxu0  ;;  %v1718_v0 = vpop.f32.mrb[28].mxu1 }
 0x769   : > { %v1729_v1 = vrot.slane %v1677_v55, 4  ;;  %v1679_v2 = vpop.f32.mrb[29].mxu0  ;;  %v1720_v3 = vpop.f32.mrb[29].mxu1  ;;  %v1731_v56 = vrot.slane %v1718_v0, 4  ;;  %v1771_v55 = vld [vmem:[#allocation2 + $0x30] sm:$0xc0] }
 0x76a   : > { %v1730_v5 = vrot.slane %v1679_v2, 4  ;;  %v1681_v6 = vpop.f32.mrb[30].mxu0  ;;  %v1722_v7 = vpop.f32.mrb[30].mxu1  ;;  %v1732_v15 = vrot.slane %v1720_v3, 4 }
 0x76b   : > { %v1737_v8 = vadd.f32 %v1729_v1, %v1636_v4  ;;  %v1682_v10 = vpop.f32.mrb[31].mxu0  ;;  %v1723_v11 = vpop.f32.mrb[31].mxu1  ;;  %v1739_v59 = vadd.f32 %v1731_v56, %v1638_v57 }
 0x76c   : > { %v1738_v12 = vadd.f32 %v1730_v5, %v1637_v9  ;;  %v1740_v17 = vadd.f32 %v1732_v15, %v1639_v16 }
 0x76d   : > { %v2230_v13 = vmul.f32 -1.442695, %v1737_v8 }
 0x76e   : > { %v2231_v14 = vmul.f32 -1.442695, %v1738_v12  ;;  %v2232_v58 = vmul.f32 -1.442695, %v1740_v17 }
 0x76f   : > { %2498 = vpow2.f32 %v2230_v13 }
 0x770   : > { %2500 = vpow2.f32 %v2231_v14 }
 0x771   : > { %2502 = vpow2.f32 %v2232_v58 }
 0x772   : > { %2504 = vtanh.f32 %v1739_v59 }
 0x779   : > { %v2499_v60 = vpop.eup %2498 }
 0x77a   : > { %v2501_v61 = vpop.eup %2500  ;;  %v1744_v62 = vadd.f32 1.0, %v2499_v60 }
 0x77b   : > { %v1750_v63 = vadd.f32 1.0, %v2501_v61  ;;  %v2503_v37 = vpop.eup %2502 }
 0x77c   : > { %2506 = vrcp.f32 %v1744_v62  ;;  %v2505_v25 = vpop.eup %2504  ;;  %v1757_v30 = vadd.f32 1.0, %v2503_v37 }
 0x77d   : > { %2508 = vrcp.f32 %v1750_v63 }
 0x77e   : > { %2510 = vrcp.f32 %v1757_v30 }
 0x786   : > { %v2507_v27 = vpop.eup %2506 }
 0x787   : > { %v2509_v29 = vpop.eup %2508  ;;  %v1764_v50 = vmul.f32 %v2507_v27, %v2505_v25 }
 0x788   : > { %v1763_v45 = vmul.f32 %v2509_v29, %v1761_v49  ;;  %v2511_v33 = vpop.eup %2510 }
 0x78a   : > { %v1765_v32 = vadd.f32 %v1764_v50, %v1763_v45 }
 0x78c   : > { %2512 = vtanh.f32 %v1765_v32  ;;  %v1894_v9 = vrot.slane %v1765_v32, 6 }
 0x796   : > { %v2513_v34 = vpop.eup %2512 }
 0x797   : > { %v1767_v36 = vmul.f32 %v2513_v34, %v2511_v33 }
 0x799   : > { %v1768_v39 = vpack.c.bf16 %v1767_v36, %v1767_v36  ;;  %v1908_v40 = vsel %vm1903_vm1, %v1907_v31, %v1767_v36 }
 0x79b   : > { %v1774_v18 = vrot.slane %v1768_v39, 2 }
 0x79d   : > { %1809 = vmatmul.mubr.bf16.vlgmr.msra.gmra.mrb[32].mxu0 %v1774_v18  ;;  %1850 = vmatmul.mubr.bf16.vlgmr.msra.gmra.mrb[32].mxu1 %v1774_v18 }
 0x870   : > { %v1810_v35 = vpop.f32.mrb[32].mxu0  ;;  %v1851_v41 = vpop.f32.mrb[32].mxu1 }
 0x871   : > { %v1862_v42 = vrot.slane %v1810_v35, 2  ;;  %v1812_v43 = vpop.f32.mrb[33].mxu0  ;;  %v1853_v48 = vpop.f32.mrb[33].mxu1  ;;  %v1864_v54 = vrot.slane %v1851_v41, 2 }
 0x872   : > { %v1863_v47 = vrot.slane %v1812_v43, 2  ;;  %v1814_v51 = vpop.f32.mrb[34].mxu0  ;;  %v1855_v28 = vpop.f32.mrb[34].mxu1  ;;  %v1865_v26 = vrot.slane %v1853_v48, 2 }
 0x873   : > { %v1870_v19 = vadd.f32 %v1862_v42, %v1769_v44  ;;  %v1815_v22 = vpop.f32.mrb[35].mxu0  ;;  %v1856_v23 = vpop.f32.mrb[35].mxu1  ;;  %v1872_v1 = vadd.f32 %v1864_v54, %v1771_v55 }
 0x874   : > { %v1871_v46 = vadd.f32 %v1863_v47, %v1770_v21  ;;  %v1873_v53 = vadd.f32 %v1865_v26, %v1772_v52 }
 0x875   : > { %v2233_v38 = vmul.f32 -1.442695, %v1870_v19 }
 0x876   : > { %v2234_v24 = vmul.f32 -1.442695, %v1871_v46  ;;  %v2235_v0 = vmul.f32 -1.442695, %v1873_v53 }
 0x877   : > { %2514 = vpow2.f32 %v2233_v38 }
 0x878   : > { %2516 = vpow2.f32 %v2234_v24 }
 0x879   : > { %2518 = vpow2.f32 %v2235_v0 }
 0x87a   : > { %2520 = vtanh.f32 %v1872_v1 }
 0x881   : > { %v2515_v2 = vpop.eup %2514 }
 0x882   : > { %v2517_v3 = vpop.eup %2516  ;;  %v1877_v4 = vadd.f32 1.0, %v2515_v2 }
 0x883   : > { %v1883_v5 = vadd.f32 1.0, %v2517_v3  ;;  %v2519_v6 = vpop.eup %2518 }
 0x884   : > { %2522 = vrcp.f32 %v1877_v4  ;;  %v2521_v7 = vpop.eup %2520  ;;  %v1890_v12 = vadd.f32 1.0, %v2519_v6 }
 0x885   : > { %2524 = vrcp.f32 %v1883_v5 }
 0x886   : > { %2526 = vrcp.f32 %v1890_v12 }
 0x88e   : > { %v2523_v8 = vpop.eup %2522 }
 0x88f   : > { %v2525_v10 = vpop.eup %2524  ;;  %v1897_v11 = vmul.f32 %v2523_v8, %v2521_v7 }
 0x890   : > { %v1896_v13 = vmul.f32 %v2525_v10, %v1894_v9  ;;  %v2527_v15 = vpop.eup %2526 }
 0x892   : > { %v1898_v14 = vadd.f32 %v1897_v11, %v1896_v13 }
 0x894   : > { %2528 = vtanh.f32 %v1898_v14 }
 0x89e   : > { %v2529_v16 = vpop.eup %2528 }
 0x89f   : > { %v1900_v17 = vmul.f32 %v2529_v16, %v2527_v15 }
 0x8a1   : > { %v1909_v56 = vsel %vm1905_vm2, %v1908_v40, %v1900_v17 }
 0x8a2   : > { %v1910_v57 = vpack.c.bf16 %v1909_v56, %v3176_v20 }
 0x8a4   : > { %1911 = vst [vmem:[#allocation3] sm:$0xff] %v1910_v57 }
 0x8a5 PF: > { %v2562_v58 = vld [vmem:[%s2702_s20] sm:$0xff]   ;;  %v2595_v59 = vmov 0.0   ;;  %v2563_v60 = vld [vmem:[%s2702_s20 + $0x8] sm:$0xff]   ;;  %vm2596_vm3 = vmmov 0   ;;  %v2564_v20 = vld [vmem:[%s2702_s20 + $0x10] sm:$0xff]  }
 0x8a6   : > { %2258 = vmatprep.subr.bf16.mxu0 %v2595_v59  ;;  %2274 = vmatprep.mubr.msk.bf16.mxu0 %vm2596_vm3, %v2595_v59  ;;  %v2565_v61 = vld [vmem:[%s2702_s20 + $0x18] sm:$0xff]   ;;  %v2566_v62 = vld [vmem:[%s2702_s20 + $0x20] sm:$0xff]   ;;  %v2567_v63 = vld [vmem:[%s2702_s20 + $0x28] sm:$0xff]  }
 0x8a7   : > { %2259 = vmatpush3.bf16.msra.mxu0 %v2562_v58  ;;  %v2568_v37 = vld [vmem:[%s2702_s20 + $0x30] sm:$0xff]   ;;  %v2569_v25 = vld [vmem:[%s2702_s20 + $0x38] sm:$0xff]   ;;  %s2246_s20 = sshll.u32 (%p2663_p5), %s2648_s24, 3 }
 0x8a8   : > { %2260 = vmatprep.subr.bf16.mxu0 %v2595_v59  ;;  %v2236_v49 = vld [vmem:[%s360_s19] ss:$0 sm:$0xff]  ;;  %s2035_s19 = scalar_lea.vmem (%p2663_p5), %s3440_s6, %s2246_s20 }
 0x8ab   : > { %2261 = vmatpush3.bf16.msra.mxu0 %v2563_v60  ;;  %v1912_v27 = vld [vmem:[#allocation3] sm:$0xff] }
 0x8ac   : > { %2262 = vmatprep.subr.bf16.mxu0 %v2595_v59 }
 0x8af   : > { %2263 = vmatpush3.bf16.msra.mxu0 %v2564_v20 }
 0x8b0   : > { %2264 = vmatprep.subr.bf16.mxu0 %v2595_v59 }
 0x8b3   : > { %2265 = vmatpush3.bf16.msra.mxu0 %v2565_v61 }
 0x8b4   : > { %2266 = vmatprep.subr.bf16.mxu0 %v2595_v59 }
 0x8b7   : > { %2267 = vmatpush3.bf16.msra.mxu0 %v2566_v62 }
 0x8b8   : > { %2268 = vmatprep.subr.bf16.mxu0 %v2595_v59 }
 0x8bb   : > { %2269 = vmatpush3.bf16.msra.mxu0 %v2567_v63 }
 0x8bc   : > { %2270 = vmatprep.subr.bf16.mxu0 %v2595_v59 }
 0x8bf   : > { %2271 = vmatpush3.bf16.msra.mxu0 %v2568_v37 }
 0x8c0   : > { %2272 = vmatprep.subr.bf16.mxu0 %v2595_v59 }
 0x8c3   : > { %2273 = vmatpush3.bf16.msra.mxu0 %v2569_v25 }
 0x8c6   : > { %2275 = vmatmul.mubr.bf16.vlgmr.msra.gmra.mrb[0].mxu0 %v1912_v27 }
 0x998   : > { %2033 = sbr.rel (!%p2663_p5) target bundleno = 2471 (0x9a7), region = 93 }
 0x999   : > { %v2018_v29 = vpop.f32.mrb[0].mxu0 }
 0x99a   : > { %v2019_v50 = vadd.f32 %v2236_v49, %v2018_v29  ;;  %v2276_v30 = vpop.f32.mrb[1].mxu0 }
 0x99b   : > { %v2021_v45 = vpop.f32.mrb[2].mxu0 }
 0x99c   : > { %2025 = vst [vmem:[%s2704_s26] sm:$0xff] %v2019_v50  ;;  %v2022_v32 = vadd.f32 %v2236_v49, %v2021_v45  ;;  %v2277_v33 = vpop.f32.mrb[3].mxu0 }
 0x99e   : > { %2026 = vst [vmem:[%s2704_s26 + $0x8] sm:$0xff] %v2022_v32 }
 0x9a3   : > { %v2065_v34 = vld [vmem:[%s2704_s26] sm:$0xff] }
 0x9a4   : > { %2066 = vst [vmem:[%s2035_s19] sm:$0xff] %v2065_v34 }
 0x9a5   : > { %v2067_v36 = vld [vmem:[%s2704_s26 + $0x8] sm:$0xff] }
 0x9a6   : > { %2068 = vst [vmem:[%s2035_s19 + $0x10] sm:$0xff] %v2067_v36 }
 0x9a7 PF: > { %p13_p12 = scmp.ge.s32.totalorder %s2651_s25, 4   ;;  %s3442_s21 = smov %s2588_s22 }
 0x9a8   : > { %s3443_s22 = smov %s2661_s28  ;;  %s3444_s23 = smov %s2651_s25 }
 0x9a9   :  { %15 = sbr.rel (!%p13_p12) target bundleno = 2 (0x2), region = 165 }

</bundles_post_ra>
